<compile_context>
chip_gen: v7x
topology: tpu7x:2x2x1
jax: 0.10.0
libtpu: 0.0.40
codegen_flags: <defaults>
</compile_context>

<pallas_src>
import functools

import jax
import jax.numpy as jnp
from jax import lax
from jax.experimental import pallas as pl
from jax.experimental.pallas import tpu as pltpu


# ---------------------------------------------------------------------------
# Fused kernel: conv1+BN1+ReLU -> conv2+BN2 -> (+shortcut) -> ReLU
# ---------------------------------------------------------------------------

def _basic_block_kernel(*refs, TH, WZ, Ho, KH, KW, csc, identity_shortcut, Hup):
    """One (batch, row-block) step.

    Geometry (all static):
      WZ  = Wo + 2              width of the padded/flattened pixel grid
      TZ  = TH + 2              conv1 output rows incl. conv2 halo rows
      npz = TZ * WZ             conv1 / z grid size (flattened)
      npo = TH * WZ             conv2 / output grid size (flattened)
      slab: (TZ + KH) * WZ rows of the zero-padded input, starting at row r*TH.
    Every conv tap is a pure flat-offset window read of the slab (or of z).
    """
    if identity_shortcut:
        (u_hbm, colmask_ref, w1_ref, b1_ref, w2_ref, badd_ref,
         o_ref, slab_ref, z_ref, sem) = refs
        wsc_ref = None
    else:
        (u_hbm, colmask_ref, w1_ref, b1_ref, w2_ref, badd_ref, wsc_ref,
         o_ref, slab_ref, z_ref, sem) = refs

    b = pl.program_id(0)
    r = pl.program_id(1)

    TZ = TH + 2
    npz = TZ * WZ
    npo = TH * WZ
    planes = w2_ref.shape[1]
    rb_flat = slab_ref.shape[0]

    # ---- 1. fetch the halo'd input row slab for this (batch, row-block) ----
    start = (b * Hup + r * TH) * WZ
    dma = pltpu.make_async_copy(u_hbm.at[pl.ds(start, rb_flat), :], slab_ref, sem.at[0])
    dma.start()
    dma.wait()

    # ---- 2. conv1 (+ folded BN1 scale) as ONE im2col matmul, K = KH*KW*C1 ----
    cols = []
    for oh in range(KH):
        for ow in range(KW):
            cols.append(slab_ref[pl.ds(oh * WZ + ow, npz), :])
    patches = jnp.concatenate(cols, axis=1)                       # (npz, KH*KW*C1)
    y1 = jnp.dot(patches, w1_ref[...], preferred_element_type=jnp.float32)
    y1 = jnp.maximum(y1 + b1_ref[...], 0.0)                       # BN1 bias + ReLU

    # ---- 3. zero out-of-image positions -> z = zero-padded conv2 input ----
    pz = lax.broadcasted_iota(jnp.int32, (npz, 1), 0)
    row_lo = jnp.maximum(0, 1 - r * TH) * WZ                      # block 0: zero top halo row
    row_hi = jnp.minimum(TZ, Ho + 1 - r * TH) * WZ                # tail: zero rows >= Ho
    row_ok = (pz >= row_lo) & (pz < row_hi)
    z = jnp.where(row_ok, y1 * colmask_ref[...], 0.0)
    z_ref[pl.ds(0, npz), :] = z.astype(z_ref.dtype)
    z_ref[pl.ds(npz, WZ), :] = jnp.zeros((WZ, planes), z_ref.dtype)   # guard rows

    # ---- 4. conv2 (+ folded BN2 scale) as ONE im2col matmul on z ----
    cols2 = []
    for dh in range(3):
        for dw in range(3):
            cols2.append(z_ref[pl.ds(dh * WZ + dw, npo), :])
    patches2 = jnp.concatenate(cols2, axis=1)                     # (npo, 9*planes)
    out = jnp.dot(patches2, w2_ref[...], preferred_element_type=jnp.float32)

    # ---- 5. shortcut (identity, or folded 1x1-conv+BN) read from the same slab ----
    center = slab_ref[pl.ds(2 * WZ + 2, npo), :]                  # input at the output pixel
    if identity_shortcut:
        sc = center.astype(jnp.float32)
    else:
        sc = jnp.dot(center[:, :csc], wsc_ref[...], preferred_element_type=jnp.float32)

    o_ref[...] = jnp.maximum(out + badd_ref[...] + sc, 0.0).astype(o_ref.dtype)


# ---------------------------------------------------------------------------
# Wrapper: BN folding, stride removal (space-to-depth), padding, tiling
# ---------------------------------------------------------------------------

def _fold_bn(gamma, beta, mean, var, eps):
    scale = gamma / jnp.sqrt(var + eps)
    bias = beta - mean * scale
    return (scale.reshape(1, -1).astype(jnp.float32),
            bias.reshape(1, -1).astype(jnp.float32))


def basic_block_forward(x, params, *, stride=1, eps=1e-5, tile_rows=8,
                        matmul_dtype=jnp.float32):
    """x: (B, Cin, H, W) NCHW (PyTorch layout) -> (B, planes, Ho, Wo)."""
    B, cin, H, W = x.shape
    planes = params["conv1_w"].shape[0]
    Ho = (H - 1) // stride + 1
    Wo = (W - 1) // stride + 1
    identity_shortcut = (stride == 1) and (cin == planes)

    x_nhwc = jnp.transpose(x, (0, 2, 3, 1))                                   # (B,H,W,Cin)
    w1_hw = jnp.transpose(params["conv1_w"], (2, 3, 1, 0)).astype(jnp.float32)  # (3,3,Cin,planes)
    w2_hw = jnp.transpose(params["conv2_w"], (2, 3, 1, 0)).astype(jnp.float32)
    s1, b1 = _fold_bn(params["bn1_g"], params["bn1_b"], params["bn1_m"], params["bn1_v"], eps)
    s2, b2 = _fold_bn(params["bn2_g"], params["bn2_b"], params["bn2_m"], params["bn2_v"], eps)

    # --- stride removal: space-to-depth so the kernel only ever does stride-1 convs ---
    if stride == 1:
        u = x_nhwc
        C1, KH, KW = cin, 3, 3
        tap_mats = [w1_hw[dh + 1, dw + 1] for dh in (-1, 0, 1) for dw in (-1, 0, 1)]
    else:
        s = stride
        Hs, Ws = Ho * s, Wo * s
        x_e = jnp.pad(x_nhwc, ((0, 0), (0, Hs - H), (0, Ws - W), (0, 0)))
        u = x_e.reshape(B, Ho, s, Wo, s, cin).transpose(0, 1, 3, 2, 4, 5)
        u = u.reshape(B, Ho, Wo, s * s * cin)                    # phase channels (p*s+q)*Cin+c
        C1, KH, KW = s * s * cin, 2, 2
        tap_mats = []
        for oh in (-1, 0):
            for ow in (-1, 0):
                blocks = []
                for p in range(s):
                    for q in range(s):
                        dh, dw = s * oh + p, s * ow + q
                        if -1 <= dh <= 1 and -1 <= dw <= 1:
                            blocks.append(w1_hw[dh + 1, dw + 1])
                        else:
                            blocks.append(jnp.zeros((cin, planes), jnp.float32))
                tap_mats.append(jnp.concatenate(blocks, axis=0))  # (s*s*Cin, planes)

    w1cat = jnp.concatenate(tap_mats, axis=0) * s1                # BN1 scale folded into weights
    w2cat = jnp.concatenate([w2_hw[dh + 1, dw + 1] for dh in (-1, 0, 1)
                             for dw in (-1, 0, 1)], axis=0) * s2  # (9*planes, planes)

    if identity_shortcut:
        wsc, badd = None, b2
    else:
        ssc, bsc = _fold_bn(params["sc_g"], params["sc_b"], params["sc_m"], params["sc_v"], eps)
        wsc = jnp.transpose(params["sc_w"].reshape(planes, cin), (1, 0)) * ssc
        badd = b2 + bsc                                           # conv2 + shortcut biases combined

    # --- row-block tiling geometry ---
    TH = max(1, min(tile_rows, Ho))           # output rows per block
    nb = -(-Ho // TH)                         # number of row blocks
    TZ = TH + 2                               # conv1 rows incl. conv2 halo
    WZ = Wo + 2                               # padded row width (= conv2 input width)
    RB = TZ + KH                              # slab rows per block (halo + flat-read guard)
    npz, npo = TZ * WZ, TH * WZ
    K1 = KH * KW * C1

    # zero-pad u so every in-kernel window read is a pure flat offset (no masks/rolls)
    Hup = nb * TH + 2 + KH
    up = jnp.pad(u, ((0, 0), (2, Hup - 2 - Ho), (2, 0), (0, 0)))  # (B, Hup, WZ, C1)
    up_flat = up.reshape(B * Hup * WZ, C1).astype(matmul_dtype)

    # tiny, block-independent column interior mask (replaces the old 9x(Npix,1) masks)
    j = jnp.arange(npz) % WZ
    colmask = ((j >= 1) & (j <= Wo)).astype(jnp.float32).reshape(npz, 1)

    inputs = [up_flat, colmask, w1cat.astype(matmul_dtype), b1,
              w2cat.astype(matmul_dtype), badd]
    in_specs = [
        pl.BlockSpec(memory_space=pl.ANY),                         # raw HBM, manual halo DMA
        pl.BlockSpec((npz, 1), lambda b, r: (0, 0)),
        pl.BlockSpec((K1, planes), lambda b, r: (0, 0)),
        pl.BlockSpec((1, planes), lambda b, r: (0, 0)),
        pl.BlockSpec((9 * planes, planes), lambda b, r: (0, 0)),
        pl.BlockSpec((1, planes), lambda b, r: (0, 0)),
    ]
    if not identity_shortcut:
        inputs.append(wsc.astype(matmul_dtype))
        in_specs.append(pl.BlockSpec((cin, planes), lambda b, r: (0, 0)))

    # VMEM budget: per-block working set with headroom, capped for v7x's 64 MiB VMEM.
    bpe = jnp.dtype(matmul_dtype).itemsize
    work = (RB * WZ * C1 + (TZ + 1) * WZ * planes) * bpe           # slab + z scratch
    work += (npz * K1 + npo * 9 * planes) * bpe                    # im2col live values
    work += 2 * (K1 + 9 * planes + cin + 2) * planes * 4           # weights/biases (dbl-buffered)
    work += 2 * (npz * 128 * 4 + npo * planes * 4)                 # colmask (lane-padded) + out blk
    vmem_limit = int(min(64 * 2 ** 20, max(32 * 2 ** 20, 2 * work)))

    kernel = functools.partial(
        _basic_block_kernel, TH=TH, WZ=WZ, Ho=Ho, KH=KH, KW=KW,
        csc=cin, identity_shortcut=identity_shortcut, Hup=Hup)

    out3 = pl.pallas_call(
        kernel,
        out_shape=jax.ShapeDtypeStruct((B * nb, npo, planes), x.dtype),
        grid=(B, nb),
        in_specs=in_specs,
        out_specs=pl.BlockSpec((None, npo, planes), lambda b, r: (b * nb + r, 0, 0)),
        scratch_shapes=[
            pltpu.VMEM((RB * WZ, C1), matmul_dtype),               # input slab
            pltpu.VMEM(((TZ + 1) * WZ, planes), matmul_dtype),     # z = conv2 input (+guard row)
            pltpu.SemaphoreType.DMA((1,)),
        ],
        compiler_params=pltpu.CompilerParams(
            dimension_semantics=("parallel", "parallel"),
            vmem_limit_bytes=vmem_limit),
    )(*inputs)

    out = out3.reshape(B, nb * TH, WZ, planes)[:, :Ho, :Wo, :]
    return jnp.transpose(out, (0, 3, 1, 2))


# ---------------------------------------------------------------------------
# Pure-JAX reference (mirrors the PyTorch forward, eval-mode BN)
# ---------------------------------------------------------------------------

def reference_basic_block(x, params, *, stride=1, eps=1e-5):
    def conv(inp, w, s, pad):
        return jax.lax.conv_general_dilated(
            inp, w, window_strides=(s, s), padding=((pad, pad), (pad, pad)),
            dimension_numbers=("NCHW", "OIHW", "NCHW"))

    def bn(inp, g, b, m, v):
        g, b, m, v = (a[None, :, None, None] for a in (g, b, m, v))
        return (inp - m) / jnp.sqrt(v + eps) * g + b

    cin = x.shape[1]
    planes = params["conv1_w"].shape[0]
    out = jax.nn.relu(bn(conv(x, params["conv1_w"], stride, 1),
                         params["bn1_g"], params["bn1_b"], params["bn1_m"], params["bn1_v"]))
    out = bn(conv(out, params["conv2_w"], 1, 1),
             params["bn2_g"], params["bn2_b"], params["bn2_m"], params["bn2_v"])
    if stride != 1 or cin != planes:
        sc = bn(conv(x, params["sc_w"], stride, 0),
                params["sc_g"], params["sc_b"], params["sc_m"], params["sc_v"])
    else:
        sc = x
    return jax.nn.relu(out + sc)


def _make_params(key, in_planes, planes, with_shortcut):
    ks = jax.random.split(key, 16)

    def bn_params(k0, k1, k2, k3, c):
        return (jax.random.uniform(k0, (c,), jnp.float32, 0.5, 1.5),   # gamma
                0.1 * jax.random.normal(k1, (c,), jnp.float32),        # beta
                0.1 * jax.random.normal(k2, (c,), jnp.float32),        # running mean
                jax.random.uniform(k3, (c,), jnp.float32, 0.5, 1.5))   # running var

    p = {}
    p["conv1_w"] = 0.3 * jax.random.normal(ks[0], (planes, in_planes, 3, 3), jnp.float32)
    p["bn1_g"], p["bn1_b"], p["bn1_m"], p["bn1_v"] = bn_params(ks[1], ks[2], ks[3], ks[4], planes)
    p["conv2_w"] = 0.3 * jax.random.normal(ks[5], (planes, planes, 3, 3), jnp.float32)
    p["bn2_g"], p["bn2_b"], p["bn2_m"], p["bn2_v"] = bn_params(ks[6], ks[7], ks[8], ks[9], planes)
    if with_shortcut:
        p["sc_w"] = 0.3 * jax.random.normal(ks[10], (planes, in_planes, 1, 1), jnp.float32)
        p["sc_g"], p["sc_b"], p["sc_m"], p["sc_v"] = bn_params(ks[11], ks[12], ks[13], ks[14], planes)
    return p


if __name__ == "__main__":
    key = jax.random.PRNGKey(0)
    k_x, k_p1, k_p2, k_p3 = jax.random.split(key, 4)

    B, H, W = 2, 16, 16

    configs = [
        # (in_planes, planes, stride, tile_rows)
        (4, 4, 1, 8, k_p1),   # identity shortcut, 2 row-blocks
        (4, 8, 1, 7, k_p2),   # 1x1-conv shortcut, ragged row tiling (3 blocks)
        (4, 8, 2, 8, k_p3),   # stride-2 downsample (space-to-depth path) + conv shortcut
    ]

    for in_planes, planes, stride, tile_rows, k_p in configs:
        with_sc = (stride != 1) or (in_planes != planes)
        params = _make_params(k_p, in_planes, planes, with_sc)
        x = jax.random.normal(k_x, (B, in_planes, H, W), jnp.float32)

        out = basic_block_forward(x, params, stride=stride, tile_rows=tile_rows)
        out = jax.block_until_ready(out)
        ref = reference_basic_block(x, params, stride=stride)

        ho = (H - 1) // stride + 1
        assert out.shape == (B, planes, ho, ho), out.shape
        assert jnp.allclose(out, ref, atol=1e-4, rtol=1e-4), (
            f"mismatch vs reference (in={in_planes}, planes={planes}, stride={stride}), "
            f"max abs err {jnp.max(jnp.abs(out - ref))}")

    # bf16 MXU-operand demo (review: v6e/v7x want bf16 matmul inputs, f32 accumulation).
    # Loose tolerance: precision is governed by bf16 operand rounding.
    params = _make_params(k_p3, 4, 8, True)
    x = jax.random.normal(k_x, (B, 4, H, W), jnp.float32)
    out_bf16 = jax.block_until_ready(
        basic_block_forward(x, params, stride=2, tile_rows=8,
                            matmul_dtype=jnp.bfloat16))
    ref = reference_basic_block(x, params, stride=2)
    assert jnp.allclose(out_bf16, ref, atol=0.6, rtol=0.05), (
        f"bf16 demo mismatch, max abs err {jnp.max(jnp.abs(out_bf16 - ref))}")

    print("KERNEL_OK")
</pallas_src>

<mosaic_0001>
module attributes {stable_mosaic.version = 11 : i64} {
  func.func @_basic_block_kernel(%arg0: i32, %arg1: i32, %arg2: memref<756x4xf32, #tpu.memory_space<any>>, %arg3: memref<180x1xf32, #tpu.memory_space<vmem>>, %arg4: memref<36x4xf32, #tpu.memory_space<vmem>>, %arg5: memref<1x4xf32, #tpu.memory_space<vmem>>, %arg6: memref<36x4xf32, #tpu.memory_space<vmem>>, %arg7: memref<1x4xf32, #tpu.memory_space<vmem>>, %arg8: memref<1x144x4xf32, #tpu.memory_space<vmem>>, %arg9: memref<234x4xf32, #tpu.memory_space<vmem>>, %arg10: memref<198x4xf32, #tpu.memory_space<vmem>>, %arg11: memref<1x!tpu.dma_semaphore, #tpu.memory_space<semaphore_mem>>) attributes {dimension_semantics = [#tpu.dimension_semantics<parallel>, #tpu.dimension_semantics<parallel>], iteration_bounds = array<i64: 2, 2>, scalar_prefetch = 0 : i64, scratch_operands = 3 : i64, tpu.core_type = #tpu.core_type<tc>, window_params = [{}, {pipeline_mode = #tpu.pipeline_mode<synchronous>, transform_indices = @transform_1, window_bounds = array<i64: 180, 1>}, {pipeline_mode = #tpu.pipeline_mode<synchronous>, transform_indices = @transform_2, window_bounds = array<i64: 36, 4>}, {pipeline_mode = #tpu.pipeline_mode<synchronous>, transform_indices = @transform_3, window_bounds = array<i64: 1, 4>}, {pipeline_mode = #tpu.pipeline_mode<synchronous>, transform_indices = @transform_4, window_bounds = array<i64: 36, 4>}, {pipeline_mode = #tpu.pipeline_mode<synchronous>, transform_indices = @transform_5, window_bounds = array<i64: 1, 4>}, {transform_indices = @transform_6, window_bounds = array<i64: 1, 144, 4>}]} {
    %c21_i32 = arith.constant 21 : i32
    %0 = arith.muli %arg0, %c21_i32 : i32
    %c8_i32 = arith.constant 8 : i32
    %1 = arith.muli %arg1, %c8_i32 : i32
    %2 = arith.addi %0, %1 : i32
    %c18_i32 = arith.constant 18 : i32
    %3 = arith.muli %2, %c18_i32 : i32
    %c0_i32 = arith.constant 0 : i32
    %c0_i32_0 = arith.constant 0 : i32
    %4 = tpu.memref_slice %arg2[%3, %c0_i32_0] : memref<756x4xf32, #tpu.memory_space<any>> -> memref<234x4xf32, #tpu.memory_space<any>>
    %5 = tpu.memref_slice %arg11[%c0_i32] : memref<1x!tpu.dma_semaphore, #tpu.memory_space<semaphore_mem>> -> memref<1x!tpu.dma_semaphore, #tpu.memory_space<semaphore_mem>>
    %6 = tpu.memref_squeeze %5 : memref<1x!tpu.dma_semaphore, #tpu.memory_space<semaphore_mem>> -> memref<!tpu.dma_semaphore, #tpu.memory_space<semaphore_mem>>
    tpu.enqueue_dma source(%4 : memref<234x4xf32, #tpu.memory_space<any>>) target(%arg9 : memref<234x4xf32, #tpu.memory_space<vmem>>) target_semaphore(%6 : memref<!tpu.dma_semaphore, #tpu.memory_space<semaphore_mem>>)
    %c0_i32_1 = arith.constant 0 : i32
    %c0_i32_2 = arith.constant 0 : i32
    %7 = tpu.memref_slice %arg2[%3, %c0_i32_2] : memref<756x4xf32, #tpu.memory_space<any>> -> memref<234x4xf32, #tpu.memory_space<any>>
    %8 = tpu.memref_slice %arg11[%c0_i32_1] : memref<1x!tpu.dma_semaphore, #tpu.memory_space<semaphore_mem>> -> memref<1x!tpu.dma_semaphore, #tpu.memory_space<semaphore_mem>>
    %9 = tpu.memref_squeeze %8 : memref<1x!tpu.dma_semaphore, #tpu.memory_space<semaphore_mem>> -> memref<!tpu.dma_semaphore, #tpu.memory_space<semaphore_mem>>
    tpu.wait_dma2 semaphore(%9 : memref<!tpu.dma_semaphore, #tpu.memory_space<semaphore_mem>>) src(%7 : memref<234x4xf32, #tpu.memory_space<any>>) dst(%arg9 : memref<234x4xf32, #tpu.memory_space<vmem>>)
    %c0 = arith.constant 0 : index
    %c0_3 = arith.constant 0 : index
    %10 = vector.load %arg9[%c0, %c0_3] : memref<234x4xf32, #tpu.memory_space<vmem>>, vector<180x4xf32>
    %c1 = arith.constant 1 : index
    %c0_4 = arith.constant 0 : index
    %11 = vector.load %arg9[%c1, %c0_4] : memref<234x4xf32, #tpu.memory_space<vmem>>, vector<180x4xf32>
    %c2 = arith.constant 2 : index
    %c0_5 = arith.constant 0 : index
    %12 = vector.load %arg9[%c2, %c0_5] : memref<234x4xf32, #tpu.memory_space<vmem>>, vector<180x4xf32>
    %c18 = arith.constant 18 : index
    %c0_6 = arith.constant 0 : index
    %13 = vector.load %arg9[%c18, %c0_6] : memref<234x4xf32, #tpu.memory_space<vmem>>, vector<180x4xf32>
    %c19 = arith.constant 19 : index
    %c0_7 = arith.constant 0 : index
    %14 = vector.load %arg9[%c19, %c0_7] : memref<234x4xf32, #tpu.memory_space<vmem>>, vector<180x4xf32>
    %c20 = arith.constant 20 : index
    %c0_8 = arith.constant 0 : index
    %15 = vector.load %arg9[%c20, %c0_8] : memref<234x4xf32, #tpu.memory_space<vmem>>, vector<180x4xf32>
    %c36 = arith.constant 36 : index
    %c0_9 = arith.constant 0 : index
    %16 = vector.load %arg9[%c36, %c0_9] : memref<234x4xf32, #tpu.memory_space<vmem>>, vector<180x4xf32>
    %c37 = arith.constant 37 : index
    %c0_10 = arith.constant 0 : index
    %17 = vector.load %arg9[%c37, %c0_10] : memref<234x4xf32, #tpu.memory_space<vmem>>, vector<180x4xf32>
    %c38 = arith.constant 38 : index
    %c0_11 = arith.constant 0 : index
    %18 = vector.load %arg9[%c38, %c0_11] : memref<234x4xf32, #tpu.memory_space<vmem>>, vector<180x4xf32>
    %19 = tpu.concatenate %10, %11, %12, %13, %14, %15, %16, %17, %18 in 1 : vector<180x4xf32>, vector<180x4xf32>, vector<180x4xf32>, vector<180x4xf32>, vector<180x4xf32>, vector<180x4xf32>, vector<180x4xf32>, vector<180x4xf32>, vector<180x4xf32> -> vector<180x36xf32>
    %c0_12 = arith.constant 0 : index
    %c0_13 = arith.constant 0 : index
    %20 = vector.load %arg4[%c0_12, %c0_13] : memref<36x4xf32, #tpu.memory_space<vmem>>, vector<36x4xf32>
    %cst = arith.constant dense<0.000000e+00> : vector<180x4xf32>
    %21 = tpu.matmul %19, %20, %cst {dimension_numbers = #tpu.dot_dimension_numbers<[1], [0], [0], [1], [0, 0, 1, 1], [], []>} : vector<180x36xf32>, vector<36x4xf32>, vector<180x4xf32> -> vector<180x4xf32>
    %c0_14 = arith.constant 0 : index
    %c0_15 = arith.constant 0 : index
    %22 = vector.load %arg5[%c0_14, %c0_15] : memref<1x4xf32, #tpu.memory_space<vmem>>, vector<1x4xf32>
    %23 = vector.broadcast %22 : vector<1x4xf32> to vector<180x4xf32>
    %24 = arith.addf %21, %23 : vector<180x4xf32>
    %cst_16 = arith.constant 0.000000e+00 : f32
    %25 = vector.broadcast %cst_16 : f32 to vector<180x4xf32>
    %26 = arith.maximumf %24, %25 : vector<180x4xf32>
    %27 = tpu.iota {dimensions = array<i32: 0>} : vector<180x1xi32>
    %c8_i32_17 = arith.constant 8 : i32
    %28 = arith.muli %arg1, %c8_i32_17 : i32
    %c1_i32 = arith.constant 1 : i32
    %29 = arith.subi %c1_i32, %28 : i32
    %c0_i32_18 = arith.constant 0 : i32
    %30 = arith.maxsi %c0_i32_18, %29 : i32
    %c18_i32_19 = arith.constant 18 : i32
    %31 = arith.muli %30, %c18_i32_19 : i32
    %c8_i32_20 = arith.constant 8 : i32
    %32 = arith.muli %arg1, %c8_i32_20 : i32
    %c17_i32 = arith.constant 17 : i32
    %33 = arith.subi %c17_i32, %32 : i32
    %c10_i32 = arith.constant 10 : i32
    %34 = arith.minsi %c10_i32, %33 : i32
    %c18_i32_21 = arith.constant 18 : i32
    %35 = arith.muli %34, %c18_i32_21 : i32
    %36 = vector.broadcast %31 : i32 to vector<180x1xi32>
    %37 = arith.cmpi sge, %27, %36 : vector<180x1xi32>
    %38 = vector.broadcast %35 : i32 to vector<180x1xi32>
    %39 = arith.cmpi slt, %27, %38 : vector<180x1xi32>
    %40 = arith.andi %37, %39 : vector<180x1xi1>
    %c0_22 = arith.constant 0 : index
    %c0_23 = arith.constant 0 : index
    %41 = vector.load %arg3[%c0_22, %c0_23] : memref<180x1xf32, #tpu.memory_space<vmem>>, vector<180x1xf32>
    %42 = vector.broadcast %41 : vector<180x1xf32> to vector<180x4xf32>
    %43 = arith.mulf %26, %42 : vector<180x4xf32>
    %cst_24 = arith.constant 0.000000e+00 : f32
    %44 = vector.shape_cast %40 : vector<180x1xi1> to vector<180x1xi1>
    %45 = vector.broadcast %44 : vector<180x1xi1> to vector<180x4xi1>
    %46 = vector.broadcast %cst_24 : f32 to vector<180x4xf32>
    %47 = arith.select %45, %43, %46 : vector<180x4xi1>, vector<180x4xf32>
    %c0_25 = arith.constant 0 : index
    %c0_26 = arith.constant 0 : index
    %48 = vector.load %arg10[%c0_25, %c0_26] : memref<198x4xf32, #tpu.memory_space<vmem>>, vector<180x4xf32>
    tpu.vector_store %arg10[%c0_25, %c0_26], %47 {strides = array<i32>} : memref<198x4xf32, #tpu.memory_space<vmem>>, vector<180x4xf32>,
    %cst_27 = arith.constant 0.000000e+00 : f32
    %49 = vector.broadcast %cst_27 : f32 to vector<18x4xf32>
    %c180 = arith.constant 180 : index
    %c0_28 = arith.constant 0 : index
    %50 = vector.load %arg10[%c180, %c0_28] : memref<198x4xf32, #tpu.memory_space<vmem>>, vector<18x4xf32>
    tpu.vector_store %arg10[%c180, %c0_28], %49 {strides = array<i32>} : memref<198x4xf32, #tpu.memory_space<vmem>>, vector<18x4xf32>,
    %c0_29 = arith.constant 0 : index
    %c0_30 = arith.constant 0 : index
    %51 = vector.load %arg10[%c0_29, %c0_30] : memref<198x4xf32, #tpu.memory_space<vmem>>, vector<144x4xf32>
    %c1_31 = arith.constant 1 : index
    %c0_32 = arith.constant 0 : index
    %52 = vector.load %arg10[%c1_31, %c0_32] : memref<198x4xf32, #tpu.memory_space<vmem>>, vector<144x4xf32>
    %c2_33 = arith.constant 2 : index
    %c0_34 = arith.constant 0 : index
    %53 = vector.load %arg10[%c2_33, %c0_34] : memref<198x4xf32, #tpu.memory_space<vmem>>, vector<144x4xf32>
    %c18_35 = arith.constant 18 : index
    %c0_36 = arith.constant 0 : index
    %54 = vector.load %arg10[%c18_35, %c0_36] : memref<198x4xf32, #tpu.memory_space<vmem>>, vector<144x4xf32>
    %c19_37 = arith.constant 19 : index
    %c0_38 = arith.constant 0 : index
    %55 = vector.load %arg10[%c19_37, %c0_38] : memref<198x4xf32, #tpu.memory_space<vmem>>, vector<144x4xf32>
    %c20_39 = arith.constant 20 : index
    %c0_40 = arith.constant 0 : index
    %56 = vector.load %arg10[%c20_39, %c0_40] : memref<198x4xf32, #tpu.memory_space<vmem>>, vector<144x4xf32>
    %c36_41 = arith.constant 36 : index
    %c0_42 = arith.constant 0 : index
    %57 = vector.load %arg10[%c36_41, %c0_42] : memref<198x4xf32, #tpu.memory_space<vmem>>, vector<144x4xf32>
    %c37_43 = arith.constant 37 : index
    %c0_44 = arith.constant 0 : index
    %58 = vector.load %arg10[%c37_43, %c0_44] : memref<198x4xf32, #tpu.memory_space<vmem>>, vector<144x4xf32>
    %c38_45 = arith.constant 38 : index
    %c0_46 = arith.constant 0 : index
    %59 = vector.load %arg10[%c38_45, %c0_46] : memref<198x4xf32, #tpu.memory_space<vmem>>, vector<144x4xf32>
    %60 = tpu.concatenate %51, %52, %53, %54, %55, %56, %57, %58, %59 in 1 : vector<144x4xf32>, vector<144x4xf32>, vector<144x4xf32>, vector<144x4xf32>, vector<144x4xf32>, vector<144x4xf32>, vector<144x4xf32>, vector<144x4xf32>, vector<144x4xf32> -> vector<144x36xf32>
    %c0_47 = arith.constant 0 : index
    %c0_48 = arith.constant 0 : index
    %61 = vector.load %arg6[%c0_47, %c0_48] : memref<36x4xf32, #tpu.memory_space<vmem>>, vector<36x4xf32>
    %cst_49 = arith.constant dense<0.000000e+00> : vector<144x4xf32>
    %62 = tpu.matmul %60, %61, %cst_49 {dimension_numbers = #tpu.dot_dimension_numbers<[1], [0], [0], [1], [0, 0, 1, 1], [], []>} : vector<144x36xf32>, vector<36x4xf32>, vector<144x4xf32> -> vector<144x4xf32>
    %c38_50 = arith.constant 38 : index
    %c0_51 = arith.constant 0 : index
    %63 = vector.load %arg9[%c38_50, %c0_51] : memref<234x4xf32, #tpu.memory_space<vmem>>, vector<144x4xf32>
    %c0_52 = arith.constant 0 : index
    %c0_53 = arith.constant 0 : index
    %64 = vector.load %arg7[%c0_52, %c0_53] : memref<1x4xf32, #tpu.memory_space<vmem>>, vector<1x4xf32>
    %65 = vector.broadcast %64 : vector<1x4xf32> to vector<144x4xf32>
    %66 = arith.addf %62, %65 : vector<144x4xf32>
    %67 = arith.addf %66, %63 : vector<144x4xf32>
    %cst_54 = arith.constant 0.000000e+00 : f32
    %68 = vector.broadcast %cst_54 : f32 to vector<144x4xf32>
    %69 = arith.maximumf %67, %68 : vector<144x4xf32>
    %c0_55 = arith.constant 0 : index
    %c0_56 = arith.constant 0 : index
    %c0_57 = arith.constant 0 : index
    %70 = vector.load %arg8[%c0_55, %c0_56, %c0_57] : memref<1x144x4xf32, #tpu.memory_space<vmem>>, vector<1x144x4xf32>
    %71 = vector.shape_cast %70 : vector<1x144x4xf32> to vector<144x4xf32>
    %72 = vector.shape_cast %69 : vector<144x4xf32> to vector<1x144x4xf32>
    tpu.vector_store %arg8[%c0_55, %c0_56, %c0_57], %72 {strides = array<i32>} : memref<1x144x4xf32, #tpu.memory_space<vmem>>, vector<1x144x4xf32>,
    return
  }
  func.func @transform_1(%arg0: i32, %arg1: i32) -> (i32, i32) {
    %c0_i32 = arith.constant 0 : i32
    %c0_i32_0 = arith.constant 0 : i32
    %c0_i32_1 = arith.constant 0 : i32
    return %c0_i32, %c0_i32_0 : i32, i32
  }
  func.func @transform_2(%arg0: i32, %arg1: i32) -> (i32, i32) {
    %c0_i32 = arith.constant 0 : i32
    %c0_i32_0 = arith.constant 0 : i32
    %c0_i32_1 = arith.constant 0 : i32
    return %c0_i32, %c0_i32_0 : i32, i32
  }
  func.func @transform_3(%arg0: i32, %arg1: i32) -> (i32, i32) {
    %c0_i32 = arith.constant 0 : i32
    %c0_i32_0 = arith.constant 0 : i32
    %c0_i32_1 = arith.constant 0 : i32
    return %c0_i32, %c0_i32_0 : i32, i32
  }
  func.func @transform_4(%arg0: i32, %arg1: i32) -> (i32, i32) {
    %c0_i32 = arith.constant 0 : i32
    %c0_i32_0 = arith.constant 0 : i32
    %c0_i32_1 = arith.constant 0 : i32
    return %c0_i32, %c0_i32_0 : i32, i32
  }
  func.func @transform_5(%arg0: i32, %arg1: i32) -> (i32, i32) {
    %c0_i32 = arith.constant 0 : i32
    %c0_i32_0 = arith.constant 0 : i32
    %c0_i32_1 = arith.constant 0 : i32
    return %c0_i32, %c0_i32_0 : i32, i32
  }
  func.func @transform_6(%arg0: i32, %arg1: i32) -> (i32, i32, i32) {
    %c2_i32 = arith.constant 2 : i32
    %0 = arith.muli %arg0, %c2_i32 : i32
    %1 = arith.addi %0, %arg1 : i32
    %c0_i32 = arith.constant 0 : i32
    %c0_i32_0 = arith.constant 0 : i32
    %c0_i32_1 = arith.constant 0 : i32
    return %1, %c0_i32, %c0_i32_0 : i32, i32, i32
  }
}

</mosaic_0001>

<bundles_post_ra>
// kernel: tpu_custom_call.1
= control target key start
LH: loop header
LB: loop body
LE: loop exit
PB: predicated region body
PF: predicated region fallthrough
CT: control target
= control target key end

     0   :  { %s3640_s21 = smov 0   ;;  %s3642_s22 = smov 0   ;;  %s5281_s0 = inlined_call_operand.vmem [shape: f32[756,4], index: 0, kind: input, shape index: {}]   ;;  %s5282_s1 = inlined_call_operand.vmem [shape: f32[180,1], index: 1, kind: input, shape index: {}]   ;;  %s5283_s2 = inlined_call_operand.vmem [shape: f32[36,4], index: 2, kind: input, shape index: {}]   ;;  %s5284_s3 = inlined_call_operand.vmem [shape: f32[1,4], index: 3, kind: input, shape index: {}]   ;;  %s5285_s4 = inlined_call_operand.vmem [shape: f32[36,4], index: 4, kind: input, shape index: {}]   ;;  %s5286_s5 = inlined_call_operand.vmem [shape: f32[1,4], index: 5, kind: input, shape index: {}]   ;;  %s5287_s6 = inlined_call_operand.vmem [shape: f32[4,144,4], index: 6, kind: output, shape index: {}]  }
   0x1   :  { %s3644_s23 = smov 0   ;;  %s3646_s24 = smov 0  }
   0x2   :  { %s3648_s25 = smov 0  }
   0x3 LB: > { %s25_s26 = sadd.s32 1, %s3583_s23  ;;  %s28_s27 = sadd.s32 1, %s3587_s24  ;;  %s3591_s25 = sphi %s3648_s25, %s16_s25   ;;  %s3587_s24 = sphi %s3646_s24, %s5387_s24   ;;  %s3583_s23 = sphi %s3644_s23, %s5386_s23   ;;  %s3579_s22 = sphi %s3642_s22, %s5385_s22   ;;  %s3575_s21 = sphi %s3640_s21, %s5384_s21  }
   0x4   : > { %p26_p0 = scmp.ge.s32.totalorder %s25_s26, 2  ;;  %p3256_p1 = scmp.ge.s32.totalorder %s3591_s25, 1 }
   0x5   : > { %p194_p2 = scmp.lt.s32.totalorder %s3591_s25, 5 }
   0x6   : > { %s5389_s26 = smov (%p26_p0, %s25_s26), 0  ;;  %s5391_s27 = smov (!%p26_p0, %s28_s27), %s3587_s24 }
   0x7   : > { %p195_p3 = pnand %p3256_p1, %p194_p2  ;;  %p30_p4 = scmp.ge.s32.totalorder %s5391_s27, 2 }
   0x9   : > { %s5393_s27 = smov (%p30_p4, %s5391_s27), 0  ;;  %198 = sbr.rel (%p195_p3) target bundleno = 1171 (0x493), region = 40 }
  0x10   : > { %s3257_s28 = sshll.u32 %s3579_s22, 1  ;;  %s228_s29 = smul.u32 21, %s3579_s22 }
  0x11   : > { %s220_s30 = sadd.s32 %s3575_s21, %s3257_s28  ;;  %s3670_s7 = sshll.u32 %s3575_s21, 3 }
  0x12   : > { %p221_p5 = scmp.lt.s32.totalorder %s220_s30, 3  ;;  %s230_s8 = sadd.s32 %s3670_s7, %s228_s29 }
  0x13   : > { %s231_s9 = smul.u32 18, %s230_s8 }
  0x14   : > { %s5395_s30 = smov (!%p221_p5, %s220_s30), 3 }
  0x15   : > { %s3676_s12 = scalar_lea.vmem %s5281_s0, %s231_s9  ;;  %s3496_s13 = smul.u32 144, %s5395_s30 }
  0x16   : > { %v270_v0 = vld [vmem:[%s3676_s12] sm:$0xff]  ;;  %v272_v1 = vld [vmem:[%s3676_s12 + $0x8] sm:$0xff]  ;;  %v274_v2 = vld [vmem:[%s3676_s12 + $0x10] sm:$0xff] }
  0x17   : > { %271 = vst [vmem:[#allocation2] sm:$0xff] %v270_v0  ;;  %273 = vst [vmem:[#allocation2 + $0x8] sm:$0xff] %v272_v1  ;;  %v276_v3 = vld [vmem:[%s3676_s12 + $0x18] sm:$0xff]  ;;  %v278_v4 = vld [vmem:[%s3676_s12 + $0x20] sm:$0xff]  ;;  %s3687_s16 = scalar_lea.vmem %s5287_s6, %s3496_s13 }
  0x18   : > { %275 = vst [vmem:[#allocation2 + $0x10] sm:$0xff] %v274_v2  ;;  %v280_v5 = vld [vmem:[%s3676_s12 + $0x28] sm:$0xff]  ;;  %277 = vst [vmem:[#allocation2 + $0x18] sm:$0xff] %v276_v3  ;;  %v282_v6 = vld [vmem:[%s3676_s12 + $0x30] sm:$0xff] }
  0x19   : > { %279 = vst [vmem:[#allocation2 + $0x20] sm:$0xff] %v278_v4  ;;  %281 = vst [vmem:[#allocation2 + $0x28] sm:$0xff] %v280_v5  ;;  %v284_v7 = vld [vmem:[%s3676_s12 + $0x38] sm:$0xff]  ;;  %v286_v8 = vld [vmem:[%s3676_s12 + $0x40] sm:$0xff] }
  0x1a   : > { %283 = vst [vmem:[#allocation2 + $0x30] sm:$0xff] %v282_v6  ;;  %285 = vst [vmem:[#allocation2 + $0x38] sm:$0xff] %v284_v7  ;;  %v288_v9 = vld [vmem:[%s3676_s12 + $0x48] sm:$0xff]  ;;  %v290_v10 = vld [vmem:[%s3676_s12 + $0x50] sm:$0xff] }
  0x1b   : > { %287 = vst [vmem:[#allocation2 + $0x40] sm:$0xff] %v286_v8  ;;  %v292_v11 = vld [vmem:[%s3676_s12 + $0x58] sm:$0xff]  ;;  %289 = vst [vmem:[#allocation2 + $0x48] sm:$0xff] %v288_v9  ;;  %v294_v12 = vld [vmem:[%s3676_s12 + $0x60] sm:$0xff] }
  0x1c   : > { %291 = vst [vmem:[#allocation2 + $0x50] sm:$0xff] %v290_v10  ;;  %293 = vst [vmem:[#allocation2 + $0x58] sm:$0xff] %v292_v11  ;;  %v296_v13 = vld [vmem:[%s3676_s12 + $0x68] sm:$0xff]  ;;  %v298_v14 = vld [vmem:[%s3676_s12 + $0x70] sm:$0xff] }
  0x1d   : > { %295 = vst [vmem:[#allocation2 + $0x60] sm:$0xff] %v294_v12  ;;  %297 = vst [vmem:[#allocation2 + $0x68] sm:$0xff] %v296_v13  ;;  %v300_v15 = vld [vmem:[%s3676_s12 + $0x78] sm:$0xff]  ;;  %v302_v16 = vld [vmem:[%s3676_s12 + $0x80] sm:$0xff] }
  0x1e   : > { %299 = vst [vmem:[#allocation2 + $0x70] sm:$0xff] %v298_v14  ;;  %v304_v17 = vld [vmem:[%s3676_s12 + $0x88] sm:$0xff]  ;;  %301 = vst [vmem:[#allocation2 + $0x78] sm:$0xff] %v300_v15  ;;  %v306_v18 = vld [vmem:[%s3676_s12 + $0x90] sm:$0xff] }
  0x1f   : > { %303 = vst [vmem:[#allocation2 + $0x80] sm:$0xff] %v302_v16  ;;  %305 = vst [vmem:[#allocation2 + $0x88] sm:$0xff] %v304_v17  ;;  %v308_v19 = vld [vmem:[%s3676_s12 + $0x98] sm:$0xff]  ;;  %v310_v20 = vld [vmem:[%s3676_s12 + $0xa0] sm:$0xff] }
  0x20   : > { %307 = vst [vmem:[#allocation2 + $0x90] sm:$0xff] %v306_v18  ;;  %309 = vst [vmem:[#allocation2 + $0x98] sm:$0xff] %v308_v19  ;;  %v312_v21 = vld [vmem:[%s3676_s12 + $0xa8] sm:$0xff]  ;;  %v314_v22 = vld [vmem:[%s3676_s12 + $0xb0] sm:$0xff] }
  0x21   : > { %311 = vst [vmem:[#allocation2 + $0xa0] sm:$0xff] %v310_v20  ;;  %v316_v23 = vld [vmem:[%s3676_s12 + $0xb8] sm:$0xff]  ;;  %313 = vst [vmem:[#allocation2 + $0xa8] sm:$0xff] %v312_v21  ;;  %v318_v24 = vld [vmem:[%s3676_s12 + $0xc0] sm:$0xff] }
  0x22   : > { %315 = vst [vmem:[#allocation2 + $0xb0] sm:$0xff] %v314_v22  ;;  %317 = vst [vmem:[#allocation2 + $0xb8] sm:$0xff] %v316_v23  ;;  %v320_v25 = vld [vmem:[%s3676_s12 + $0xc8] sm:$0xff]  ;;  %v322_v26 = vld [vmem:[%s3676_s12 + $0xd0] sm:$0xff] }
  0x23   : > { %319 = vst [vmem:[#allocation2 + $0xc0] sm:$0xff] %v318_v24  ;;  %321 = vst [vmem:[#allocation2 + $0xc8] sm:$0xff] %v320_v25  ;;  %v324_v27 = vld [vmem:[%s3676_s12 + $0xd8] sm:$0xff] }
  0x24   : > { %323 = vst [vmem:[#allocation2 + $0xd0] sm:$0xff] %v322_v26  ;;  %325 = vst [vmem:[#allocation2 + $0xd8] sm:$0xff] %v324_v27 }
  0x25   : > { %342 = vsyncadd [#allocation4], 3744 }
  0x26   : > { %3571 = dma.done.wait [#allocation4], 3744 }
  0x27   : > { %3572 = vsyncadd [#allocation4], 4294963552  ;;  %v371_v28 = vld [vmem:[#allocation2 + $0x11] sm:$0xff]  ;;  %v369_v29 = vld [vmem:[#allocation2 + $0x1] sm:$0xff]  ;;  %s3593_s17 = smov 4   ;;  %s3594_s18 = smov 8  }
  0x28   : > { %540 = vrot.lane.b32.xlu1 %v371_v28, %s3593_s17  ;;  %536 = vrot.lane.b32.xlu0 %v369_v29, %s3593_s17  ;;  %v372_v30 = vld [vmem:[#allocation2 + $0x19] sm:$0xff]  ;;  %v370_v31 = vld [vmem:[#allocation2 + $0x9] sm:$0xff]  ;;  %v373_v33 = vld [vmem:[#allocation2 + $0x21] sm:$0xff]  ;;  %s3595_s19 = smov 12   ;;  %v3596_v12 = vmov 0.0|0.0   ;;  %vm1209_vm0 = vcmask 31744  }
  0x29   : > { %v374_v32 = vld [vmem:[#allocation2 + $0x29] sm:$0xff]  ;;  %v376_v34 = vld [vmem:[#allocation2 + $0x39] sm:$0xff]  ;;  %v375_v35 = vld [vmem:[#allocation2 + $0x31] sm:$0xff]  ;;  %3476 = vmatprep.subr.bf16.mxu0 %v3596_v12  ;;  %3490 = vmatprep.subr.bf16.mxu1 %v3596_v12  ;;  %v5288_v18 = vmov 0.0   ;;  %vm1483_vm1 = vcmask 1043456   ;;  %vm3598_vm2 = vmmov 0  }
  0x2a   : > { %v378_v36 = vld [vmem:[#allocation2 + $0x49] sm:$0xff]  ;;  %v377_v37 = vld [vmem:[#allocation2 + $0x41] sm:$0xff]  ;;  %v380_v38 = vld [vmem:[#allocation2 + $0x59] sm:$0xff]  ;;  %2047 = vst.msk [vmem:[#allocation3 + $0xb4] sm:$0xff] %vm1209_vm0, %v5288_v18  ;;  %3370 = vmatprep.mubr.msk.f32.mxu0 %vm3598_vm2, %v5288_v18  ;;  %s3599_s12 = smov 16   ;;  %3418 = vmatprep.mubr.msk.f32.mxu1 %vm3598_vm2, %v5288_v18  ;;  %s3600_s13 = smov 24  }
  0x2b   : > { %v379_v39 = vld [vmem:[#allocation2 + $0x51] sm:$0xff]  ;;  %v382_v40 = vld [vmem:[#allocation2 + $0x69] sm:$0xff]  ;;  %v381_v41 = vld [vmem:[#allocation2 + $0x61] sm:$0xff]  ;;  %s3601_s14 = smov 20   ;;  %s3602_s15 = smov 28   ;;  %vm1233_vm3 = vcmask 64512  }
  0x2c   : > { %542 = vrot.lane.b32.xlu1 %v372_v30, %s3593_s17  ;;  %538 = vrot.lane.b32.xlu0 %v370_v31, %s3593_s17  ;;  %v384_v42 = vld [vmem:[#allocation2 + $0x79] sm:$0xff]  ;;  %v383_v43 = vld [vmem:[#allocation2 + $0x71] sm:$0xff]  ;;  %v386_v44 = vld [vmem:[#allocation2 + $0x89] sm:$0xff]  ;;  %s3603_s20 = smov 32   ;;  %vm1257_vm4 = vcmask 97280   ;;  %vm1281_vm5 = vcmask 130048  }
  0x2d   : > { %v385_v45 = vld [vmem:[#allocation2 + $0x81] sm:$0xff]  ;;  %v388_v46 = vld [vmem:[#allocation2 + $0x99] sm:$0xff]  ;;  %v387_v47 = vld [vmem:[#allocation2 + $0x91] sm:$0xff]  ;;  %vm1305_vm6 = vcmask 162816   ;;  %vm1329_vm7 = vcmask 195584   ;;  %vm5292_vm8 = vcmask 228352  }
  0x2e   : > { %v390_v48 = vld [vmem:[#allocation2 + $0xa9] sm:$0xff]  ;;  %v389_v49 = vld [vmem:[#allocation2 + $0xa1] sm:$0xff]  ;;  %v391_v51 = vld [vmem:[#allocation2 + $0xb1] sm:$0xf]  ;;  %vm5291_vm9 = vcmask 261120   ;;  %vm5290_vm10 = vcmask 293888  }
  0x2f   : > { %v392_v50 = vld [vmem:[#allocation2 + $0x2] sm:$0xff]  ;;  %v394_v52 = vld [vmem:[#allocation2 + $0x12] sm:$0xff]  ;;  %v393_v53 = vld [vmem:[#allocation2 + $0xa] sm:$0xff]  ;;  %s1714_s22 = ssub.s32 1, %s3670_s7  ;;  %s1718_s28 = ssub.s32 17, %s3670_s7 }
  0x30   : > { %546 = vrot.lane.b32.xlu1 %v374_v32, %s3593_s17  ;;  %544 = vrot.lane.b32.xlu0 %v373_v33, %s3593_s17  ;;  %v396_v54 = vld [vmem:[#allocation2 + $0x22] sm:$0xff]  ;;  %v395_v55 = vld [vmem:[#allocation2 + $0x1a] sm:$0xff]  ;;  %v398_v56 = vld [vmem:[#allocation2 + $0x32] sm:$0xff]  ;;  %p1715_p6 = scmp.gt.s32.totalorder %s1714_s22, 0  ;;  %p1719_p7 = scmp.lt.s32.totalorder %s1718_s28, 10 }
  0x31   : > { %v397_v57 = vld [vmem:[#allocation2 + $0x2a] sm:$0xff]  ;;  %v3741_v58 = vld [vmem:[#allocation2 + $0x42] sm:$0xff]  ;;  %v399_v59 = vld [vmem:[#allocation2 + $0x3a] sm:$0xff] }
  0x32   : > { %v3746_v60 = vld [vmem:[#allocation2 + $0x52] sm:$0xff]  ;;  %v3748_v61 = vld [vmem:[#allocation2 + $0x4a] sm:$0xff]  ;;  %v3754_v62 = vld [vmem:[#allocation2 + $0x62] sm:$0xff]  ;;  %s5397_s22 = smov (!%p1715_p6, %s1714_s22), 0  ;;  %s5399_s28 = smov (!%p1719_p7, %s1718_s28), 10 }
  0x33   : > { %v3756_v63 = vld [vmem:[#allocation2 + $0x5a] sm:$0xff]  ;;  %v3762_v0 = vld [vmem:[#allocation2 + $0x72] sm:$0xff]  ;;  %v3764_v1 = vld [vmem:[#allocation2 + $0x6a] sm:$0xff]  ;;  %s1717_s7 = smul.u32 18, %s5397_s22 }
  0x34   : > { %550 = vrot.lane.b32.xlu1 %v376_v34, %s3593_s17  ;;  %548 = vrot.lane.b32.xlu0 %v375_v35, %s3593_s17  ;;  %v3770_v2 = vld [vmem:[#allocation2 + $0x82] sm:$0xff]  ;;  %v3772_v3 = vld [vmem:[#allocation2 + $0x7a] sm:$0xff]  ;;  %v3778_v4 = vld [vmem:[#allocation2 + $0x92] sm:$0xff]  ;;  %s1721_s29 = smul.u32 18, %s5399_s28 }
  0x35   : > { %v3780_v5 = vld [vmem:[#allocation2 + $0x8a] sm:$0xff]  ;;  %v3786_v6 = vld [vmem:[#allocation2 + $0xa2] sm:$0xff]  ;;  %v3788_v7 = vld [vmem:[#allocation2 + $0x9a] sm:$0xff] }
  0x36   : > { %v414_v8 = vld [vmem:[#allocation2 + $0xb2] sm:$0xf]  ;;  %v3794_v9 = vld [vmem:[#allocation2 + $0xaa] sm:$0xff]  ;;  %v1401_v10 = vld [vmem:[%s5283_s2] sm:$0xff] }
  0x37   : > { %v1402_v11 = vld [vmem:[%s5283_s2 + $0x8] sm:$0xff]  ;;  %v1403_v14 = vld [vmem:[%s5283_s2 + $0x10] sm:$0xff]  ;;  %v1404_v15 = vld [vmem:[%s5283_s2 + $0x18] sm:$0xff] }
  0x38   : > { %554 = vrot.lane.b32.xlu1 %v378_v36, %s3593_s17  ;;  %552 = vrot.lane.b32.xlu0 %v377_v37, %s3593_s17  ;;  %v3477_v13 = vpack.c.bf16 %v1402_v11, %v1401_v10  ;;  %v3480_v16 = vpack.c.bf16 %v1404_v15, %v1403_v14  ;;  %v418_v17 = vld [vmem:[#allocation2 + $0x13] sm:$0xff]  ;;  %v1405_v19 = vld [vmem:[%s5283_s2 + $0x20] sm:$0xf]  ;;  %v443_v20 = vld [vmem:[#allocation2 + $0x24] sm:$0xff] }
  0x39   : > { %v441_v21 = vld [vmem:[#allocation2 + $0x14] sm:$0xff]  ;;  %v467_v23 = vld [vmem:[#allocation2 + $0x25] sm:$0xff]  ;;  %v442_v24 = vld [vmem:[#allocation2 + $0x1c] sm:$0xff] }
  0x3a   : > { %3478 = vmatpush3.bf16.msra.mxu0 %v3477_v13  ;;  %3493 = vmatpush3.bf16.msra.mxu1 %v3477_v13  ;;  %v419_v22 = vld [vmem:[#allocation2 + $0x1b] sm:$0xff]  ;;  %v490_v25 = vld [vmem:[#allocation2 + $0x26] sm:$0xff]  ;;  %v491_v32 = vld [vmem:[#allocation2 + $0x2e] sm:$0xff] }
  0x3b   : > { %3479 = vmatprep.subr.bf16.mxu0 %v3596_v12  ;;  %3491 = vmatprep.subr.bf16.mxu1 %v3596_v12  ;;  %v468_v28 = vld [vmem:[#allocation2 + $0x2d] sm:$0xff]  ;;  %v420_v33 = vld [vmem:[#allocation2 + $0x23] sm:$0xff] }
  0x3c   : > { %558 = vrot.lane.b32.xlu1 %v380_v38, %s3593_s17  ;;  %556 = vrot.lane.b32.xlu0 %v379_v39, %s3593_s17  ;;  %v444_v29 = vld [vmem:[#allocation2 + $0x2c] sm:$0xff]  ;;  %v445_v36 = vld [vmem:[#allocation2 + $0x34] sm:$0xff] }
  0x3d   : > { %v421_v39 = vld [vmem:[#allocation2 + $0x2b] sm:$0xff] }
  0x3e   : > { %3481 = vmatpush3.bf16.msra.mxu0 %v3480_v16  ;;  %3494 = vmatpush3.bf16.msra.mxu1 %v3480_v16  ;;  %v494_v10 = vld [vmem:[#allocation2 + $0x46] sm:$0xff] }
  0x3f   : > { %3368 = vmatprep.subr.mxu0 %v5288_v18  ;;  %3492 = vmatprep.subr.mxu1 %v5288_v18  ;;  %v472_v13 = vld [vmem:[#allocation2 + $0x4d] sm:$0xff] }
  0x40   : > { %562 = vrot.lane.b32.xlu1 %v382_v40, %s3593_s17  ;;  %560 = vrot.lane.b32.xlu0 %v381_v41, %s3593_s17  ;;  %v469_v40 = vld [vmem:[#allocation2 + $0x35] sm:$0xff]  ;;  %v448_v14 = vld [vmem:[#allocation2 + $0x4c] sm:$0xff] }
  0x42   : > { %3369 = vmatpush3.msk.msra.mxu0 %vm1483_vm1, %v1405_v19  ;;  %3495 = vmatpush3.msk.msra.mxu1 %vm1483_vm1, %v1405_v19  ;;  %v424_v19 = vld [vmem:[#allocation2 + $0x43] sm:$0xff] }
  0x44   : > { %566 = vrot.lane.b32.xlu1 %v384_v42, %s3593_s17  ;;  %564 = vrot.lane.b32.xlu0 %v383_v43, %s3593_s17  ;;  %v492_v43 = vld [vmem:[#allocation2 + $0x36] sm:$0xff] }
  0x48   : > { %570 = vrot.lane.b32.xlu1 %v386_v44, %s3593_s17  ;;  %568 = vrot.lane.b32.xlu0 %v385_v45, %s3593_s17 }
  0x4c   : > { %574 = vrot.lane.b32.xlu1 %v388_v46, %s3593_s17  ;;  %572 = vrot.lane.b32.xlu0 %v387_v47, %s3593_s17  ;;  %v470_v46 = vld [vmem:[#allocation2 + $0x3d] sm:$0xff] }
  0x4d   : > { %v446_v47 = vld [vmem:[#allocation2 + $0x3c] sm:$0xff] }
  0x50   : > { %578 = vrot.lane.b32.xlu1 %v390_v48, %s3593_s17  ;;  %576 = vrot.lane.b32.xlu0 %v389_v49, %s3593_s17 }
  0x54   : > { %628 = vrot.lane.b32.xlu1 %v392_v50, %s3594_s18  ;;  %580 = vrot.lane.b32.xlu0 %v391_v51, %s3593_s17  ;;  %v493_v50 = vld [vmem:[#allocation2 + $0x3e] sm:$0xff]  ;;  %v422_v51 = vld [vmem:[#allocation2 + $0x33] sm:$0xff] }
  0x58   : > { %632 = vrot.lane.b32.xlu1 %v394_v52, %s3594_s18  ;;  %630 = vrot.lane.b32.xlu0 %v393_v53, %s3594_s18 }
  0x5c   : > { %636 = vrot.lane.b32.xlu1 %v396_v54, %s3594_s18  ;;  %634 = vrot.lane.b32.xlu0 %v395_v55, %s3594_s18 }
  0x60   : > { %640 = vrot.lane.b32.xlu1 %v398_v56, %s3594_s18  ;;  %638 = vrot.lane.b32.xlu0 %v397_v57, %s3594_s18 }
  0x64   : > { %644 = vrot.lane.b32.xlu1 %v3741_v58, %s3594_s18  ;;  %642 = vrot.lane.b32.xlu0 %v399_v59, %s3594_s18 }
  0x68   : > { %648 = vrot.lane.b32.xlu1 %v3746_v60, %s3594_s18  ;;  %646 = vrot.lane.b32.xlu0 %v3748_v61, %s3594_s18 }
  0x6c   : > { %652 = vrot.lane.b32.xlu1 %v3754_v62, %s3594_s18  ;;  %650 = vrot.lane.b32.xlu0 %v3756_v63, %s3594_s18 }
  0x70   : > { %656 = vrot.lane.b32.xlu1 %v3762_v0, %s3594_s18  ;;  %654 = vrot.lane.b32.xlu0 %v3764_v1, %s3594_s18 }
  0x74   : > { %660 = vrot.lane.b32.xlu1 %v3770_v2, %s3594_s18  ;;  %658 = vrot.lane.b32.xlu0 %v3772_v3, %s3594_s18 }
  0x78   : > { %664 = vrot.lane.b32.xlu1 %v3778_v4, %s3594_s18  ;;  %662 = vrot.lane.b32.xlu0 %v3780_v5, %s3594_s18 }
  0x7c   : > { %668 = vrot.lane.b32.xlu1 %v3786_v6, %s3594_s18  ;;  %666 = vrot.lane.b32.xlu0 %v3788_v7, %s3594_s18 }
  0x80   : > { %672 = vrot.lane.b32.xlu1 %v414_v8, %s3594_s18  ;;  %670 = vrot.lane.b32.xlu0 %v3794_v9, %s3594_s18 }
  0x84   : > { %702 = vrot.lane.b32.xlu1 %v395_v55, %s3595_s19  ;;  %700 = vrot.lane.b32.xlu0 %v394_v52, %s3595_s19 }
  0x88   : > { %706 = vrot.lane.b32.xlu1 %v397_v57, %s3595_s19  ;;  %704 = vrot.lane.b32.xlu0 %v396_v54, %s3595_s19  ;;  %v447_v54 = vld [vmem:[#allocation2 + $0x44] sm:$0xff]  ;;  %v423_v57 = vld [vmem:[#allocation2 + $0x3b] sm:$0xff] }
  0x8c   : > { %710 = vrot.lane.b32.xlu1 %v399_v59, %s3595_s19  ;;  %708 = vrot.lane.b32.xlu0 %v398_v56, %s3595_s19 }
  0x90   : > { %792 = vrot.lane.b32.xlu1 %v418_v17, %s3599_s12  ;;  %712 = vrot.lane.b32.xlu0 %v3741_v58, %s3595_s19  ;;  %v471_v58 = vld [vmem:[#allocation2 + $0x45] sm:$0xff]  ;;  %v495_v17 = vld [vmem:[#allocation2 + $0x4e] sm:$0xff] }
  0x94   : > { %956 = vrot.lane.b32.xlu1 %v443_v20, %s3600_s13  ;;  %884 = vrot.lane.b32.xlu0 %v441_v21, %s3601_s14 }
  0x98   : > { %794 = vrot.lane.b32.xlu1 %v419_v22, %s3599_s12  ;;  %1048 = vrot.lane.b32.xlu0 %v467_v23, %s3602_s15  ;;  %v449_v22 = vld [vmem:[#allocation2 + $0x54] sm:$0xff] }
  0x9a   : > { %v3837_v26 = vpop.permute.xlu1 %540  ;;  %v3839_v27 = vpop.permute.xlu0 %536 }
  0x9c   : > { %886 = vrot.lane.b32.xlu1 %v442_v24, %s3601_s14  ;;  %1140 = vrot.lane.b32.xlu0 %v490_v25, %s3603_s20  ;;  %v473_v25 = vld [vmem:[#allocation2 + $0x55] sm:$0xff] }
  0x9e   : > { %v3843_v30 = vpop.permute.xlu1 %542  ;;  %v3845_v31 = vpop.permute.xlu0 %538 }
  0xa0   : > { %1050 = vrot.lane.b32.xlu1 %v468_v28, %s3602_s15  ;;  %958 = vrot.lane.b32.xlu0 %v444_v29, %s3600_s13 }
  0xa2   : > { %v3849_v34 = vpop.permute.xlu1 %546  ;;  %v3851_v35 = vpop.permute.xlu0 %544 }
  0xa4   : > { %1142 = vrot.lane.b32.xlu1 %v491_v32, %s3603_s20  ;;  %796 = vrot.lane.b32.xlu0 %v420_v33, %s3599_s12  ;;  %v496_v32 = vld [vmem:[#allocation2 + $0x56] sm:$0xff]  ;;  %v425_v33 = vld [vmem:[#allocation2 + $0x4b] sm:$0xff] }
  0xa6   : > { %v3855_v37 = vpop.permute.xlu1 %550  ;;  %v3857_v38 = vpop.permute.xlu0 %548 }
  0xa8   : > { %960 = vrot.lane.b32.xlu1 %v445_v36, %s3600_s13  ;;  %888 = vrot.lane.b32.xlu0 %v443_v20, %s3601_s14 }
  0xaa   : > { %v3861_v41 = vpop.permute.xlu1 %554  ;;  %v3863_v42 = vpop.permute.xlu0 %552 }
  0xac   : > { %798 = vrot.lane.b32.xlu1 %v421_v39, %s3599_s12  ;;  %1052 = vrot.lane.b32.xlu0 %v469_v40, %s3602_s15  ;;  %v450_v40 = vld [vmem:[#allocation2 + $0x5c] sm:$0xff] }
  0xae   : > { %v3867_v44 = vpop.permute.xlu1 %558  ;;  %v3869_v45 = vpop.permute.xlu0 %556 }
  0xb0   : > { %890 = vrot.lane.b32.xlu1 %v444_v29, %s3601_s14  ;;  %1144 = vrot.lane.b32.xlu0 %v492_v43, %s3603_s20 }
  0xb2   : > { %v3873_v48 = vpop.permute.xlu1 %562  ;;  %v3875_v49 = vpop.permute.xlu0 %560 }
  0xb4   : > { %1054 = vrot.lane.b32.xlu1 %v470_v46, %s3602_s15  ;;  %962 = vrot.lane.b32.xlu0 %v446_v47, %s3600_s13 }
  0xb6   : > { %v3879_v52 = vpop.permute.xlu1 %566  ;;  %v3881_v53 = vpop.permute.xlu0 %564 }
  0xb7   : > { %5293 = vst [vmem:[#allocation7_spill] sm:$0xff] %v3879_v52 }
  0xb8   : > { %1146 = vrot.lane.b32.xlu1 %v493_v50, %s3603_s20  ;;  %800 = vrot.lane.b32.xlu0 %v422_v51, %s3599_s12  ;;  %v497_v51 = vld [vmem:[#allocation2 + $0x5e] sm:$0xff] }
  0xba   : > { %v3885_v55 = vpop.permute.xlu1 %570  ;;  %v3887_v56 = vpop.permute.xlu0 %568 }
  0xbc   : > { %964 = vrot.lane.b32.xlu1 %v447_v54, %s3600_s13  ;;  %892 = vrot.lane.b32.xlu0 %v445_v36, %s3601_s14 }
  0xbe   : > { %v3891_v59 = vpop.permute.xlu1 %574  ;;  %v3893_v8 = vpop.permute.xlu0 %572 }
  0xbf   : > { %5294 = vst [vmem:[#allocation8_spill] sm:$0xff] %v3891_v59  ;;  %5295 = vst [vmem:[#allocation9_spill] sm:$0xff] %v3893_v8  ;;  %v347_v8 = vld [vmem:[#allocation2 + $0x8] sm:$0xff] }
  0xc0   : > { %802 = vrot.lane.b32.xlu1 %v423_v57, %s3599_s12  ;;  %1056 = vrot.lane.b32.xlu0 %v471_v58, %s3602_s15 }
  0xc2   : > { %v3897_v11 = vpop.permute.xlu1 %578  ;;  %v3899_v12 = vpop.permute.xlu0 %576 }
  0xc3   : > { %5296 = vst [vmem:[#allocation10_spill] sm:$0xff] %v3897_v11  ;;  %5297 = vst [vmem:[#allocation11_spill] sm:$0xff] %v3899_v12  ;;  %v346_v12 = vld [vmem:[#allocation2] sm:$0xff] }
  0xc4   : > { %894 = vrot.lane.b32.xlu1 %v446_v47, %s3601_s14  ;;  %1148 = vrot.lane.b32.xlu0 %v494_v10, %s3603_s20  ;;  %v451_v10 = vld [vmem:[#allocation2 + $0x64] sm:$0xff] }
  0xc6   : > { %v3903_v15 = vpop.permute.xlu1 %628  ;;  %v3905_v16 = vpop.permute.xlu0 %580 }
  0xc7   : > { %5298 = vst [vmem:[#allocation12_spill] sm:$0xff] %v3905_v16  ;;  %v428_v16 = vld [vmem:[#allocation2 + $0x63] sm:$0xff] }
  0xc8   : > { %1058 = vrot.lane.b32.xlu1 %v472_v13, %s3602_s15  ;;  %966 = vrot.lane.b32.xlu0 %v448_v14, %s3600_s13 }
  0xca   : > { %v3909_v20 = vpop.permute.xlu1 %632  ;;  %v3911_v21 = vpop.permute.xlu0 %630 }
  0xcc   : > { %1150 = vrot.lane.b32.xlu1 %v495_v17, %s3603_s20  ;;  %804 = vrot.lane.b32.xlu0 %v424_v19, %s3599_s12 }
  0xce   : > { %v3915_v23 = vpop.permute.xlu1 %636  ;;  %v3917_v24 = vpop.permute.xlu0 %634 }
  0xd0   : > { %968 = vrot.lane.b32.xlu1 %v449_v22, %s3600_s13  ;;  %896 = vrot.lane.b32.xlu0 %v447_v54, %s3601_s14  ;;  %v426_v54 = vld [vmem:[#allocation2 + $0x53] sm:$0xff] }
  0xd2   : > { %v3921_v28 = vpop.permute.xlu1 %640  ;;  %v3923_v29 = vpop.permute.xlu0 %638 }
  0xd4   : > { %1060 = vrot.lane.b32.xlu1 %v473_v25, %s3602_s15  ;;  %714 = vrot.lane.b32.xlu0 %v3748_v61, %s3595_s19  ;;  %v474_v61 = vld [vmem:[#allocation2 + $0x5d] sm:$0xff]  ;;  %v498_v25 = vld [vmem:[#allocation2 + $0x66] sm:$0xff] }
  0xd6   : > { %v3928_v36 = vpop.permute.xlu1 %644  ;;  %v3930_v39 = vpop.permute.xlu0 %642 }
  0xd8   : > { %1152 = vrot.lane.b32.xlu1 %v496_v32, %s3603_s20  ;;  %806 = vrot.lane.b32.xlu0 %v425_v33, %s3599_s12  ;;  %v427_v32 = vld [vmem:[#allocation2 + $0x5b] sm:$0xff] }
  0xda   : > { %v3934_v43 = vpop.permute.xlu1 %648  ;;  %v3936_v46 = vpop.permute.xlu0 %646 }
  0xdc   : > { %970 = vrot.lane.b32.xlu1 %v450_v40, %s3600_s13  ;;  %898 = vrot.lane.b32.xlu0 %v448_v14, %s3601_s14 }
  0xde   : > { %v3940_v47 = vpop.permute.xlu1 %652  ;;  %v3942_v50 = vpop.permute.xlu0 %650 }
  0xe0   : > { %1062 = vrot.lane.b32.xlu1 %v474_v61, %s3602_s15  ;;  %716 = vrot.lane.b32.xlu0 %v3746_v60, %s3595_s19  ;;  %v475_v60 = vld [vmem:[#allocation2 + $0x65] sm:$0xff] }
  0xe2   : > { %v3947_v57 = vpop.permute.xlu1 %656  ;;  %v3949_v58 = vpop.permute.xlu0 %654 }
  0xe4   : > { %1154 = vrot.lane.b32.xlu1 %v497_v51, %s3603_s20  ;;  %808 = vrot.lane.b32.xlu0 %v426_v54, %s3599_s12 }
  0xe6   : > { %v3953_v13 = vpop.permute.xlu1 %660  ;;  %v3955_v14 = vpop.permute.xlu0 %658 }
  0xe7   : > { %5299 = vst [vmem:[#allocation13_spill] sm:$0xff] %v3955_v14 }
  0xe8   : > { %972 = vrot.lane.b32.xlu1 %v451_v10, %s3600_s13  ;;  %900 = vrot.lane.b32.xlu0 %v449_v22, %s3601_s14  ;;  %v452_v22 = vld [vmem:[#allocation2 + $0x6c] sm:$0xff] }
  0xea   : > { %v3959_v17 = vpop.permute.xlu1 %664  ;;  %v3961_v19 = vpop.permute.xlu0 %662 }
  0xeb   : > { %5300 = vst [vmem:[#allocation14_spill] sm:$0xff] %v3959_v17 }
  0xec   : > { %1064 = vrot.lane.b32.xlu1 %v475_v60, %s3602_s15  ;;  %718 = vrot.lane.b32.xlu0 %v3756_v63, %s3595_s19  ;;  %v476_v63 = vld [vmem:[#allocation2 + $0x6d] sm:$0xff] }
  0xee   : > { %v3966_v33 = vpop.permute.xlu1 %668  ;;  %v3968_v61 = vpop.permute.xlu0 %666 }
  0xef   : > { %5301 = vst [vmem:[#allocation15_spill] sm:$0xff] %v3966_v33  ;;  %5302 = vst [vmem:[#allocation16_spill] sm:$0xff] %v3968_v61  ;;  %v1210_v61 = vsel %vm1209_vm0, %v346_v12, %v3839_v27 }
  0xf0   : > { %1156 = vrot.lane.b32.xlu1 %v498_v25, %s3603_s20  ;;  %810 = vrot.lane.b32.xlu0 %v427_v32, %s3599_s12  ;;  %v499_v25 = vld [vmem:[#allocation2 + $0x6e] sm:$0xff]  ;;  %v1234_v14 = vsel %vm1233_vm3, %v1210_v61, %v3903_v15  ;;  %v478_v15 = vld [vmem:[#allocation2 + $0x7d] sm:$0xff] }
  0xf2   : > { %v3972_v51 = vpop.permute.xlu1 %672  ;;  %v3974_v54 = vpop.permute.xlu0 %670 }
  0xf3   : > { %5303 = vst [vmem:[#allocation17_spill] sm:$0xff] %v3972_v51  ;;  %5304 = vst [vmem:[#allocation18_spill] sm:$0xff] %v3974_v54  ;;  %v3987_v51 = vld [vmem:[#allocation2 + $0x74] sm:$0xff] }
  0xf4   : > { %974 = vrot.lane.b32.xlu1 %v452_v22, %s3600_s13  ;;  %902 = vrot.lane.b32.xlu0 %v450_v40, %s3601_s14 }
  0xf6   : > { %v703_v60 = vpop.permute.xlu1 %702  ;;  %v701_v18 = vpop.permute.xlu0 %700 }
  0xf7   : > { %v1258_v52 = vsel %vm1257_vm4, %v1234_v14, %v701_v18 }
  0xf8   : > { %1066 = vrot.lane.b32.xlu1 %v476_v63, %s3602_s15  ;;  %720 = vrot.lane.b32.xlu0 %v3754_v62, %s3595_s19  ;;  %v477_v62 = vld [vmem:[#allocation2 + $0x75] sm:$0xff] }
  0xfa   : > { %v3981_v32 = vpop.permute.xlu1 %706  ;;  %v3983_v11 = vpop.permute.xlu0 %704 }
  0xfc   : > { %1158 = vrot.lane.b32.xlu1 %v499_v25, %s3603_s20  ;;  %812 = vrot.lane.b32.xlu0 %v428_v16, %s3599_s12  ;;  %v500_v16 = vld [vmem:[#allocation2 + $0x76] sm:$0xff]  ;;  %v429_v25 = vld [vmem:[#allocation2 + $0x6b] sm:$0xff] }
  0xfe   : > { %v3989_v40 = vpop.permute.xlu1 %710  ;;  %v3991_v54 = vpop.permute.xlu0 %708 }
 0x100   : > { %976 = vrot.lane.b32.xlu1 %v3987_v51, %s3600_s13  ;;  %904 = vrot.lane.b32.xlu0 %v451_v10, %s3601_s14 }
 0x102   : > { %v793_v63 = vpop.permute.xlu1 %792  ;;  %v3996_v33 = vpop.permute.xlu0 %712 }
 0x104   : > { %1068 = vrot.lane.b32.xlu1 %v477_v62, %s3602_s15  ;;  %722 = vrot.lane.b32.xlu0 %v3764_v1, %s3595_s19  ;;  %v1282_v1 = vsel %vm1281_vm5, %v1258_v52, %v793_v63  ;;  %v4009_v62 = vld [vmem:[#allocation2 + $0x7c] sm:$0xff]  ;;  %v1211_v52 = vsel %vm1209_vm0, %v347_v8, %v3845_v31  ;;  %v430_v31 = vld [vmem:[#allocation2 + $0x73] sm:$0xff] }
 0x106   : > { %v957_v59 = vpop.permute.xlu1 %956  ;;  %v885_v10 = vpop.permute.xlu0 %884 }
 0x107   : > { %v1306_v17 = vsel %vm1305_vm6, %v1282_v1, %v885_v10  ;;  %v5305_v1 = vmov 0.0  }
 0x108   : > { %1160 = vrot.lane.b32.xlu1 %v500_v16, %s3603_s20  ;;  %814 = vrot.lane.b32.xlu0 %v429_v25, %s3599_s12  ;;  %v1330_v18 = vsel %vm1329_vm7, %v1306_v17, %v957_v59  ;;  %v1235_v16 = vsel %vm1233_vm3, %v1211_v52, %v3911_v21 }
 0x109   : > { %v1259_v10 = vsel %vm1257_vm4, %v1235_v16, %v703_v60  ;;  %v501_v60 = vld [vmem:[#allocation2 + $0x7e] sm:$0xff] }
 0x10a   : > { %v795_v27 = vpop.permute.xlu1 %794  ;;  %v1049_v12 = vpop.permute.xlu0 %1048 }
 0x10b   : > { %v1354_v14 = vsel %vm5292_vm8, %v1330_v18, %v1049_v12  ;;  %v1283_v59 = vsel %vm1281_vm5, %v1259_v10, %v795_v27 }
 0x10c   : > { %978 = vrot.lane.b32.xlu1 %v4009_v62, %s3600_s13  ;;  %906 = vrot.lane.b32.xlu0 %v452_v22, %s3601_s14 }
 0x10e   : > { %v887_v61 = vpop.permute.xlu1 %886  ;;  %v1141_v63 = vpop.permute.xlu0 %1140 }
 0x10f   : > { %v1378_v25 = vsel %vm5291_vm9, %v1354_v14, %v1141_v63  ;;  %v1307_v8 = vsel %vm1305_vm6, %v1283_v59, %v887_v61  ;;  %v4040_v14 = vld [vmem:[#allocation2 + $0x94] sm:$0xff]  ;;  %v3604_v61 = vmov 0   ;;  %v4055_v59 = vld [vmem:[#allocation2 + $0x84] sm:$0xff] }
 0x110   : > { %1070 = vrot.lane.b32.xlu1 %v478_v15, %s3602_s15  ;;  %724 = vrot.lane.b32.xlu0 %v3762_v0, %s3595_s19  ;;  %v434_v0 = vld [vmem:[#allocation2 + $0x93] sm:$0xff] }
 0x111   : > { %3371 = vmatmul.mubr.msk.f32.vlgmr.msra.gmra.mrb[0].mxu0 %vm5290_vm10, %v1378_v25  ;;  %v348_v15 = vld [vmem:[#allocation2 + $0x10] sm:$0xff]  ;;  %3550 = vset.pattern.permute.xlu1 %v3604_v61 }
 0x112   : > { %v1051_v17 = vpop.permute.xlu1 %1050  ;;  %v959_v22 = vpop.permute.xlu0 %958  ;;  %3373 = vmatprep.mubr.msk.f32.mxu0 %vm3598_vm2, %v5305_v1  ;;  %3549 = vset.pattern.permute.xlu0 %v3604_v61 }
 0x113   : > { %v1331_v21 = vsel %vm1329_vm7, %v1307_v8, %v959_v22  ;;  %v349_v22 = vld [vmem:[#allocation2 + $0x18] sm:$0xff] }
 0x114   : > { %816 = vrot.lane.b32.xlu1 %v430_v31, %s3599_s12  ;;  %732 = vrot.lane.b32.xlu0 %v3778_v4, %s3595_s19  ;;  %v1355_v12 = vsel %vm5292_vm8, %v1331_v21, %v1051_v17  ;;  %v1212_v4 = vsel %vm1209_vm0, %v348_v15, %v3837_v26  ;;  %v4063_v21 = vld [vmem:[#allocation2 + $0xa4] sm:$0xff] }
 0x115   : > { %v1236_v25 = vsel %vm1233_vm3, %v1212_v4, %v3909_v20  ;;  %v479_v20 = vld [vmem:[#allocation2 + $0x85] sm:$0xff] }
 0x116   : > { %v1143_v27 = vpop.permute.xlu1 %1142  ;;  %v797_v18 = vpop.permute.xlu0 %796  ;;  %v1260_v10 = vsel %vm1257_vm4, %v1236_v25, %v3983_v11 }
 0x117   : > { %v1379_v52 = vsel %vm5291_vm9, %v1355_v12, %v1143_v27  ;;  %v1284_v26 = vsel %vm1281_vm5, %v1260_v10, %v797_v18 }
 0x118   : > { %824 = vrot.lane.b32.xlu1 %v434_v0, %s3599_s12  ;;  %1162 = vrot.lane.b32.xlu0 %v501_v60, %s3603_s20 }
 0x119   : > { %3374 = vmatmul.mubr.msk.f32.gmra.mrb[2].mxu0 %vm5290_vm10, %v1379_v52 }
 0x11a   : > { %v961_v63 = vpop.permute.xlu1 %960  ;;  %v889_v16 = vpop.permute.xlu0 %888  ;;  %3376 = vmatprep.mubr.msk.f32.mxu0 %vm3598_vm2, %v5305_v1 }
 0x11b   : > { %v1308_v31 = vsel %vm1305_vm6, %v1284_v26, %v889_v16  ;;  %v350_v26 = vld [vmem:[#allocation2 + $0x20] sm:$0xff] }
 0x11c   : > { %916 = vrot.lane.b32.xlu1 %v4040_v14, %s3601_s14  ;;  %908 = vrot.lane.b32.xlu0 %v3987_v51, %s3601_s14  ;;  %v1332_v11 = vsel %vm1329_vm7, %v1308_v31, %v961_v63  ;;  %v1213_v51 = vsel %vm1209_vm0, %v349_v22, %v3843_v30  ;;  %v431_v30 = vld [vmem:[#allocation2 + $0x7b] sm:$0xff]  ;;  %v483_v63 = vld [vmem:[#allocation2 + $0xa5] sm:$0xff] }
 0x11d   : > { %v1237_v12 = vsel %vm1233_vm3, %v1213_v51, %v3917_v24 }
 0x11e   : > { %v799_v8 = vpop.permute.xlu1 %798  ;;  %v1053_v17 = vpop.permute.xlu0 %1052  ;;  %v1261_v18 = vsel %vm1257_vm4, %v1237_v12, %v3981_v32  ;;  %v502_v32 = vld [vmem:[#allocation2 + $0x86] sm:$0xff] }
 0x11f   : > { %v1356_v0 = vsel %vm5292_vm8, %v1332_v11, %v1053_v17  ;;  %v1285_v15 = vsel %vm1281_vm5, %v1261_v18, %v799_v8  ;;  %v435_v8 = vld [vmem:[#allocation2 + $0x9b] sm:$0xff]  ;;  %v1214_v17 = vsel %vm1209_vm0, %v350_v26, %v3851_v35  ;;  %v506_v35 = vld [vmem:[#allocation2 + $0xa6] sm:$0xff] }
 0x120   : > { %726 = vrot.lane.b32.xlu1 %v3772_v3, %s3595_s19  ;;  %980 = vrot.lane.b32.xlu0 %v4055_v59, %s3600_s13  ;;  %v1238_v11 = vsel %vm1233_vm3, %v1214_v17, %v3915_v23  ;;  %v503_v17 = vld [vmem:[#allocation2 + $0x8e] sm:$0xff] }
 0x122   : > { %v891_v60 = vpop.permute.xlu1 %890  ;;  %v1145_v27 = vpop.permute.xlu0 %1144 }
 0x123   : > { %v1380_v3 = vsel %vm5291_vm9, %v1356_v0, %v1145_v27  ;;  %v1309_v52 = vsel %vm1305_vm6, %v1285_v15, %v891_v60  ;;  %v4102_v0 = vld [vmem:[#allocation2 + $0x9c] sm:$0xff] }
 0x124   : > { %1072 = vrot.lane.b32.xlu1 %v479_v20, %s3602_s15  ;;  %988 = vrot.lane.b32.xlu0 %v4063_v21, %s3600_s13  ;;  %v1262_v20 = vsel %vm1257_vm4, %v1238_v11, %v3991_v54  ;;  %v4109_v54 = vld [vmem:[#allocation2 + $0x8c] sm:$0xff] }
 0x125   : > { %3377 = vmatmul.mubr.msk.f32.gmra.mrb[4].mxu0 %vm5290_vm10, %v1380_v3  ;;  %v351_v3 = vld [vmem:[#allocation2 + $0x28] sm:$0xff] }
 0x126   : > { %v1055_v61 = vpop.permute.xlu1 %1054  ;;  %v963_v4 = vpop.permute.xlu0 %962  ;;  %3379 = vmatprep.mubr.msk.f32.mxu0 %vm3598_vm2, %v5305_v1 }
 0x127   : > { %v1333_v24 = vsel %vm1329_vm7, %v1309_v52, %v963_v4 }
 0x128   : > { %818 = vrot.lane.b32.xlu1 %v431_v30, %s3599_s12  ;;  %734 = vrot.lane.b32.xlu0 %v3788_v7, %s3595_s19  ;;  %v1357_v25 = vsel %vm5292_vm8, %v1333_v24, %v1055_v61  ;;  %v480_v24 = vld [vmem:[#allocation2 + $0x8d] sm:$0xff] }
 0x12a   : > { %v1147_v16 = vpop.permute.xlu1 %1146  ;;  %v801_v10 = vpop.permute.xlu0 %800 }
 0x12b   : > { %v1381_v31 = vsel %vm5291_vm9, %v1357_v25, %v1147_v16  ;;  %v1286_v51 = vsel %vm1281_vm5, %v1262_v20, %v801_v10 }
 0x12c   : > { %1164 = vrot.lane.b32.xlu1 %v502_v32, %s3603_s20  ;;  %1080 = vrot.lane.b32.xlu0 %v483_v63, %s3602_s15  ;;  %v4125_v32 = vld [vmem:[#allocation2 + $0xac] sm:$0xff] }
 0x12d   : > { %3380 = vmatmul.mubr.msk.f32.gmra.mrb[6].mxu0 %vm5290_vm10, %v1381_v31  ;;  %v352_v31 = vld [vmem:[#allocation2 + $0x30] sm:$0xff] }
 0x12e   : > { %v965_v7 = vpop.permute.xlu1 %964  ;;  %v893_v22 = vpop.permute.xlu0 %892  ;;  %3382 = vmatprep.mubr.msk.f32.mxu0 %vm3598_vm2, %v5305_v1 }
 0x12f   : > { %v1310_v60 = vsel %vm1305_vm6, %v1286_v51, %v893_v22  ;;  %v1216_v22 = vsel %vm1209_vm0, %v352_v31, %v3857_v38 }
 0x130   : > { %910 = vrot.lane.b32.xlu1 %v4009_v62, %s3601_s14  ;;  %826 = vrot.lane.b32.xlu0 %v435_v8, %s3599_s12  ;;  %v1334_v23 = vsel %vm1329_vm7, %v1310_v60, %v965_v7  ;;  %v1215_v62 = vsel %vm1209_vm0, %v351_v3, %v3849_v34  ;;  %v484_v7 = vld [vmem:[#allocation2 + $0xad] sm:$0xff]  ;;  %v1240_v51 = vsel %vm1233_vm3, %v1216_v22, %v3921_v28  ;;  %v436_v60 = vld [vmem:[#allocation2 + $0xa3] sm:$0xff] }
 0x131   : > { %v1239_v52 = vsel %vm1233_vm3, %v1215_v62, %v3923_v29  ;;  %v507_v3 = vld [vmem:[#allocation2 + $0xae] sm:$0xff] }
 0x132   : > { %v803_v27 = vpop.permute.xlu1 %802  ;;  %v1057_v12 = vpop.permute.xlu0 %1056  ;;  %v1263_v4 = vsel %vm1257_vm4, %v1239_v52, %v3989_v40 }
 0x133   : > { %v1358_v18 = vsel %vm5292_vm8, %v1334_v23, %v1057_v12  ;;  %v1287_v34 = vsel %vm1281_vm5, %v1263_v4, %v803_v27 }
 0x134   : > { %918 = vrot.lane.b32.xlu1 %v4102_v0, %s3601_s14  ;;  %1172 = vrot.lane.b32.xlu0 %v506_v35, %s3603_s20  ;;  %v1264_v35 = vsel %vm1257_vm4, %v1240_v51, %v3996_v33 }
 0x136   : > { %v895_v15 = vpop.permute.xlu1 %894  ;;  %v1149_v30 = vpop.permute.xlu0 %1148 }
 0x137   : > { %v1382_v61 = vsel %vm5291_vm9, %v1358_v18, %v1149_v30  ;;  %v1311_v29 = vsel %vm1305_vm6, %v1287_v34, %v895_v15  ;;  %v353_v18 = vld [vmem:[#allocation2 + $0x38] sm:$0xff] }
 0x138   : > { %728 = vrot.lane.b32.xlu1 %v3770_v2, %s3595_s19  ;;  %982 = vrot.lane.b32.xlu0 %v4109_v54, %s3600_s13  ;;  %v432_v2 = vld [vmem:[#allocation2 + $0x83] sm:$0xff]  ;;  %v481_v34 = vld [vmem:[#allocation2 + $0x95] sm:$0xff] }
 0x139   : > { %3383 = vmatmul.mubr.msk.f32.gmra.mrb[8].mxu0 %vm5290_vm10, %v1382_v61 }
 0x13a   : > { %v1059_v63 = vpop.permute.xlu1 %1058  ;;  %v967_v16 = vpop.permute.xlu0 %966  ;;  %3385 = vmatprep.mubr.msk.f32.mxu0 %vm3598_vm2, %v5305_v1 }
 0x13b   : > { %v1335_v40 = vsel %vm1329_vm7, %v1311_v29, %v967_v16 }
 0x13c   : > { %1074 = vrot.lane.b32.xlu1 %v480_v24, %s3602_s15  ;;  %990 = vrot.lane.b32.xlu0 %v4125_v32, %s3600_s13  ;;  %v1359_v10 = vsel %vm5292_vm8, %v1335_v40, %v1059_v63 }
 0x13e   : > { %v1151_v25 = vpop.permute.xlu1 %1150  ;;  %v805_v26 = vpop.permute.xlu0 %804 }
 0x13f   : > { %v1383_v8 = vsel %vm5291_vm9, %v1359_v10, %v1151_v25  ;;  %v504_v10 = vld [vmem:[#allocation2 + $0x96] sm:$0xff] }
 0x140   : > { %820 = vrot.lane.b32.xlu1 %v432_v2, %s3599_s12  ;;  %736 = vrot.lane.b32.xlu0 %v3786_v6, %s3595_s19  ;;  %v1288_v6 = vsel %vm1281_vm5, %v1264_v35, %v805_v26  ;;  %v354_v2 = vld [vmem:[#allocation2 + $0x40] sm:$0xff]  ;;  %v485_v26 = vld [vmem:[#allocation2 + $0xb5] sm:$0xff] }
 0x141   : > { %3386 = vmatmul.mubr.msk.f32.gmra.mrb[10].mxu0 %vm5290_vm10, %v1383_v8  ;;  %v1218_v31 = vsel %vm1209_vm0, %v354_v2, %v3863_v42  ;;  %v508_v35 = vld [vmem:[#allocation2 + $0xb6] sm:$0xff] }
 0x142   : > { %v969_v11 = vpop.permute.xlu1 %968  ;;  %v897_v20 = vpop.permute.xlu0 %896  ;;  %3388 = vmatprep.mubr.msk.f32.mxu0 %vm3598_vm2, %v5305_v1 }
 0x143   : > { %v1312_v38 = vsel %vm1305_vm6, %v1288_v6, %v897_v20 }
 0x144   : > { %1166 = vrot.lane.b32.xlu1 %v503_v17, %s3603_s20  ;;  %1082 = vrot.lane.b32.xlu0 %v484_v7, %s3602_s15  ;;  %v1336_v28 = vsel %vm1329_vm7, %v1312_v38, %v969_v11  ;;  %v1242_v7 = vsel %vm1233_vm3, %v1218_v31, %v3928_v36  ;;  %v437_v11 = vld [vmem:[#allocation2 + $0xab] sm:$0xff] }
 0x145   : > { %v487_v31 = vld [vmem:[#allocation2 + $0xc5] sm:$0xff] }
 0x146   : > { %v1061_v27 = vpop.permute.xlu1 %1060  ;;  %v715_v12 = vpop.permute.xlu0 %714 }
 0x147   : > { %v1360_v33 = vsel %vm5292_vm8, %v1336_v28, %v1061_v27  ;;  %v355_v27 = vld [vmem:[#allocation2 + $0x48] sm:$0xff] }
 0x148   : > { %912 = vrot.lane.b32.xlu1 %v4055_v59, %s3601_s14  ;;  %828 = vrot.lane.b32.xlu0 %v436_v60, %s3599_s12  ;;  %v1217_v59 = vsel %vm1209_vm0, %v353_v18, %v3855_v37  ;;  %v4174_v37 = vld [vmem:[#allocation2 + $0xb4] sm:$0xff]  ;;  %v1219_v28 = vsel %vm1209_vm0, %v355_v27, %v3861_v41  ;;  %v482_v41 = vld [vmem:[#allocation2 + $0x9d] sm:$0xff] }
 0x149   : > { %v1241_v61 = vsel %vm1233_vm3, %v1217_v59, %v3930_v39  ;;  %v415_v18 = vld [vmem:[#allocation2 + $0xb2] sm:$0xff] }
 0x14a   : > { %v1153_v23 = vpop.permute.xlu1 %1152  ;;  %v807_v62 = vpop.permute.xlu0 %806  ;;  %v1265_v4 = vsel %vm1257_vm4, %v1241_v61, %v715_v12  ;;  %v486_v61 = vld [vmem:[#allocation2 + $0xbd] sm:$0xff] }
 0x14b   : > { %v1384_v15 = vsel %vm5291_vm9, %v1360_v33, %v1153_v23  ;;  %v1243_v23 = vsel %vm1233_vm3, %v1219_v28, %v3936_v46  ;;  %v488_v28 = vld [vmem:[#allocation2 + $0xcd] sm:$0xff] }
 0x14c   : > { %920 = vrot.lane.b32.xlu1 %v4063_v21, %s3601_s14  ;;  %1174 = vrot.lane.b32.xlu0 %v507_v3, %s3603_s20  ;;  %v1289_v21 = vsel %vm1281_vm5, %v1265_v4, %v807_v62 }
 0x14d   : > { %3389 = vmatmul.mubr.msk.f32.gmra.mrb[12].mxu0 %vm5290_vm10, %v1384_v15 }
 0x14e   : > { %v971_v30 = vpop.permute.xlu1 %970  ;;  %v899_v52 = vpop.permute.xlu0 %898  ;;  %3391 = vmatprep.mubr.msk.f32.mxu0 %vm3598_vm2, %v5305_v1 }
 0x14f   : > { %v1313_v24 = vsel %vm1305_vm6, %v1289_v21, %v899_v52  ;;  %v505_v52 = vld [vmem:[#allocation2 + $0x9e] sm:$0xff] }
 0x150   : > { %730 = vrot.lane.b32.xlu1 %v3780_v5, %s3595_s19  ;;  %984 = vrot.lane.b32.xlu0 %v4040_v14, %s3600_s13  ;;  %v1337_v39 = vsel %vm1329_vm7, %v1313_v24, %v971_v30  ;;  %v433_v5 = vld [vmem:[#allocation2 + $0x8b] sm:$0xff] }
 0x152   : > { %v1063_v29 = vpop.permute.xlu1 %1062  ;;  %v717_v63 = vpop.permute.xlu0 %716 }
 0x153   : > { %v1361_v16 = vsel %vm5292_vm8, %v1337_v39, %v1063_v29  ;;  %v1266_v22 = vsel %vm1257_vm4, %v1242_v7, %v717_v63  ;;  %v509_v29 = vld [vmem:[#allocation2 + $0xbe] sm:$0xff]  ;;  %v438_v63 = vld [vmem:[#allocation2 + $0xb3] sm:$0xff] }
 0x154   : > { %1076 = vrot.lane.b32.xlu1 %v481_v34, %s3602_s15  ;;  %992 = vrot.lane.b32.xlu0 %v4174_v37, %s3600_s13  ;;  %v356_v34 = vld [vmem:[#allocation2 + $0x50] sm:$0xff] }
 0x155   : > { %v1220_v39 = vsel %vm1209_vm0, %v356_v34, %v3869_v45  ;;  %v358_v34 = vld [vmem:[#allocation2 + $0x60] sm:$0xff] }
 0x156   : > { %v1155_v14 = vpop.permute.xlu1 %1154  ;;  %v809_v40 = vpop.permute.xlu0 %808 }
 0x157   : > { %v1385_v25 = vsel %vm5291_vm9, %v1361_v16, %v1155_v14  ;;  %v1244_v14 = vsel %vm1233_vm3, %v1220_v39, %v3934_v43 }
 0x158   : > { %822 = vrot.lane.b32.xlu1 %v433_v5, %s3599_s12  ;;  %738 = vrot.lane.b32.xlu0 %v3794_v9, %s3595_s19  ;;  %v1290_v9 = vsel %vm1281_vm5, %v1266_v22, %v809_v40 }
 0x159   : > { %3392 = vmatmul.mubr.msk.f32.gmra.mrb[14].mxu0 %vm5290_vm10, %v1385_v25  ;;  %v464_v25 = vld [vmem:[#allocation2 + $0xc4] sm:$0xff] }
 0x15a   : > { %v973_v8 = vpop.permute.xlu1 %972  ;;  %v901_v17 = vpop.permute.xlu0 %900  ;;  %3394 = vmatprep.mubr.msk.f32.mxu0 %vm3598_vm2, %v5305_v1 }
 0x15b   : > { %v1314_v20 = vsel %vm1305_vm6, %v1290_v9, %v901_v17 }
 0x15c   : > { %1168 = vrot.lane.b32.xlu1 %v504_v10, %s3603_s20  ;;  %1084 = vrot.lane.b32.xlu0 %v485_v26, %s3602_s15  ;;  %v1338_v36 = vsel %vm1329_vm7, %v1314_v20, %v973_v8  ;;  %v416_v8 = vld [vmem:[#allocation2 + $0xba] sm:$0xff] }
 0x15d   : > { %v439_v20 = vld [vmem:[#allocation2 + $0xbb] sm:$0xff] }
 0x15e   : > { %v1065_v42 = vpop.permute.xlu1 %1064  ;;  %v719_v51 = vpop.permute.xlu0 %718 }
 0x15f   : > { %v1362_v6 = vsel %vm5292_vm8, %v1338_v36, %v1065_v42  ;;  %v1267_v62 = vsel %vm1257_vm4, %v1243_v23, %v719_v51  ;;  %v357_v51 = vld [vmem:[#allocation2 + $0x58] sm:$0xff]  ;;  %v465_v36 = vld [vmem:[#allocation2 + $0xcc] sm:$0xff] }
 0x160   : > { %914 = vrot.lane.b32.xlu1 %v4109_v54, %s3601_s14  ;;  %830 = vrot.lane.b32.xlu0 %v437_v11, %s3599_s12  ;;  %v4208_v54 = vld [vmem:[#allocation2 + $0xbc] sm:$0xff]  ;;  %v510_v11 = vld [vmem:[#allocation2 + $0xc6] sm:$0xff] }
 0x162   : > { %v1157_v60 = vpop.permute.xlu1 %1156  ;;  %v811_v38 = vpop.permute.xlu0 %810 }
 0x163   : > { %v1386_v12 = vsel %vm5291_vm9, %v1362_v6, %v1157_v60 }
 0x164   : > { %922 = vrot.lane.b32.xlu1 %v4125_v32, %s3601_s14  ;;  %1176 = vrot.lane.b32.xlu0 %v508_v35, %s3603_s20  ;;  %v1291_v32 = vsel %vm1281_vm5, %v1267_v62, %v811_v38  ;;  %v1221_v35 = vsel %vm1209_vm0, %v357_v51, %v3867_v44  ;;  %v511_v62 = vld [vmem:[#allocation2 + $0xce] sm:$0xff] }
 0x165   : > { %3395 = vmatmul.mubr.msk.f32.gmra.mrb[16].mxu0 %vm5290_vm10, %v1386_v12  ;;  %v1245_v38 = vsel %vm1233_vm3, %v1221_v35, %v3942_v50 }
 0x166   : > { %v975_v3 = vpop.permute.xlu1 %974  ;;  %v903_v33 = vpop.permute.xlu0 %902  ;;  %3397 = vmatprep.mubr.msk.f32.mxu0 %vm3598_vm2, %v5305_v1 }
 0x167   : > { %v1315_v15 = vsel %vm1305_vm6, %v1291_v32, %v903_v33  ;;  %v440_v32 = vld [vmem:[#allocation2 + $0xc3] sm:$0xf] }
 0x168   : > { %994 = vrot.lane.b32.xlu1 %v4208_v54, %s3600_s13  ;;  %986 = vrot.lane.b32.xlu0 %v4102_v0, %s3600_s13  ;;  %v1339_v46 = vsel %vm1329_vm7, %v1315_v15, %v975_v3  ;;  %v417_v3 = vld [vmem:[#allocation2 + $0xc2] sm:$0xf] }
 0x16a   : > { %v1067_v59 = vpop.permute.xlu1 %1066  ;;  %v721_v30 = vpop.permute.xlu0 %720 }
 0x16b   : > { %v1363_v4 = vsel %vm5292_vm8, %v1339_v46, %v1067_v59  ;;  %v1268_v40 = vsel %vm1257_vm4, %v1244_v14, %v721_v30  ;;  %v466_v59 = vld [vmem:[#allocation2 + $0xd4] sm:$0xf]  ;;  %v463_v30 = vld [vmem:[#allocation2 + $0xc4] sm:$0xf] }
 0x16c   : > { %740 = vrot.lane.b32.xlu1 %v415_v18, %s3595_s19  ;;  %1078 = vrot.lane.b32.xlu0 %v482_v41, %s3602_s15  ;;  %v1795_v14 = vld [vmem:[%s5282_s1 + $0x10] sm:$0xff] }
 0x16e   : > { %v1159_v21 = vpop.permute.xlu1 %1158  ;;  %v813_v0 = vpop.permute.xlu0 %812 }
 0x16f   : > { %v1387_v24 = vsel %vm5291_vm9, %v1363_v4, %v1159_v21  ;;  %v1292_v2 = vsel %vm1281_vm5, %v1268_v40, %v813_v0  ;;  %v489_v4 = vld [vmem:[#allocation2 + $0xd5] sm:$0xf] }
 0x170   : > { %1170 = vrot.lane.b32.xlu1 %v505_v52, %s3603_s20  ;;  %1086 = vrot.lane.b32.xlu0 %v486_v61, %s3602_s15  ;;  %v512_v61 = vld [vmem:[#allocation2 + $0xd6] sm:$0xf] }
 0x171   : > { %3398 = vmatmul.mubr.msk.f32.gmra.mrb[18].mxu0 %vm5290_vm10, %v1387_v24  ;;  %v1794_v24 = vld [vmem:[%s5282_s1 + $0x8] sm:$0xff]  ;;  %v1796_v40 = vld [vmem:[%s5282_s1 + $0x18] sm:$0xff] }
 0x172   : > { %v977_v5 = vpop.permute.xlu1 %976  ;;  %v905_v16 = vpop.permute.xlu0 %904  ;;  %3400 = vmatprep.mubr.msk.f32.mxu0 %vm3598_vm2, %v5305_v1 }
 0x173   : > { %v1316_v10 = vsel %vm1305_vm6, %v1292_v2, %v905_v16 }
 0x174   : > { %1178 = vrot.lane.b32.xlu1 %v509_v29, %s3603_s20  ;;  %832 = vrot.lane.b32.xlu0 %v438_v63, %s3599_s12  ;;  %v1340_v43 = vsel %vm1329_vm7, %v1316_v10, %v977_v5  ;;  %v1793_v29 = vld [vmem:[%s5282_s1] sm:$0xff]  ;;  %v1222_v5 = vsel %vm1209_vm0, %v358_v34, %v3875_v49 }
 0x175   : > { %v1246_v16 = vsel %vm1233_vm3, %v1222_v5, %v3940_v47  ;;  %v362_v47 = vld [vmem:[#allocation2 + $0x80] sm:$0xff] }
 0x176   : > { %v1069_v45 = vpop.permute.xlu1 %1068  ;;  %v723_v26 = vpop.permute.xlu0 %722  ;;  %v1809_v34 = vld [vmem:[%s5282_s1 + $0x80] sm:$0xff] }
 0x177   : > { %v1364_v17 = vsel %vm5292_vm8, %v1340_v43, %v1069_v45  ;;  %v1269_v27 = vsel %vm1257_vm4, %v1245_v38, %v723_v26  ;;  %v1797_v43 = vld [vmem:[%s5282_s1 + $0x20] sm:$0xff] }
 0x178   : > { %996 = vrot.lane.b32.xlu1 %v464_v25, %s3600_s13  ;;  %924 = vrot.lane.b32.xlu0 %v4174_v37, %s3601_s14 }
 0x17a   : > { %v1161_v7 = vpop.permute.xlu1 %1160  ;;  %v815_v22 = vpop.permute.xlu0 %814 }
 0x17b   : > { %v1388_v9 = vsel %vm5291_vm9, %v1364_v17, %v1161_v7  ;;  %v1293_v12 = vsel %vm1281_vm5, %v1269_v27, %v815_v22 }
 0x17c   : > { %1088 = vrot.lane.b32.xlu1 %v487_v31, %s3602_s15  ;;  %742 = vrot.lane.b32.xlu0 %v416_v8, %s3595_s19  ;;  %v1798_v31 = vld [vmem:[%s5282_s1 + $0x28] sm:$0xff] }
 0x17d   : > { %3401 = vmatmul.mubr.msk.f32.gmra.mrb[20].mxu0 %vm5290_vm10, %v1388_v9  ;;  %v1226_v9 = vsel %vm1209_vm0, %v362_v47, %v3887_v56  ;;  %v1813_v47 = vld [vmem:[%s5282_s1 + $0xa0] sm:$0xff] }
 0x17e   : > { %v979_v42 = vpop.permute.xlu1 %978  ;;  %v907_v37 = vpop.permute.xlu0 %906  ;;  %3403 = vmatprep.mubr.msk.f32.mxu0 %vm3598_vm2, %v5305_v1 }
 0x17f   : > { %v1317_v33 = vsel %vm1305_vm6, %v1293_v12, %v907_v37 }
 0x180   : > { %1180 = vrot.lane.b32.xlu1 %v510_v11, %s3603_s20  ;;  %834 = vrot.lane.b32.xlu0 %v439_v20, %s3599_s12  ;;  %v1341_v50 = vsel %vm1329_vm7, %v1317_v33, %v979_v42  ;;  %v1250_v11 = vsel %vm1233_vm3, %v1226_v9, %v3953_v13  ;;  %v1799_v20 = vld [vmem:[%s5282_s1 + $0x30] sm:$0xff]  ;;  %v1800_v42 = vld [vmem:[%s5282_s1 + $0x38] sm:$0xff] }
 0x181   : > { %v1804_v33 = vld [vmem:[%s5282_s1 + $0x58] sm:$0xff]  ;;  %v360_v9 = vld [vmem:[#allocation2 + $0x70] sm:$0xff] }
 0x182   : > { %v1071_v6 = vpop.permute.xlu1 %1070  ;;  %v725_v60 = vpop.permute.xlu0 %724 }
 0x183   : > { %v1365_v18 = vsel %vm5292_vm8, %v1341_v50, %v1071_v6  ;;  %v1270_v2 = vsel %vm1257_vm4, %v1246_v16, %v725_v60  ;;  %v1801_v6 = vld [vmem:[%s5282_s1 + $0x40] sm:$0xff]  ;;  %v1802_v60 = vld [vmem:[%s5282_s1 + $0x48] sm:$0xff] }
 0x184   : > { %998 = vrot.lane.b32.xlu1 %v465_v36, %s3600_s13  ;;  %926 = vrot.lane.b32.xlu0 %v4208_v54, %s3601_s14  ;;  %v359_v50 = vld [vmem:[#allocation2 + $0x68] sm:$0xff] }
 0x186   : > { %v817_v23 = vpop.permute.xlu1 %816  ;;  %v733_v44 = vpop.permute.xlu0 %732 }
 0x187   : > { %v1294_v49 = vsel %vm1281_vm5, %v1270_v2, %v817_v23  ;;  %v1274_v37 = vsel %vm1257_vm4, %v1250_v11, %v733_v44 }
 0x188   : > { %1090 = vrot.lane.b32.xlu1 %v488_v28, %s3602_s15  ;;  %744 = vrot.lane.b32.xlu0 %v417_v3, %s3595_s19  ;;  %v1803_v3 = vld [vmem:[%s5282_s1 + $0x50] sm:$0xff] }
 0x18a   : > { %v825_v41 = vpop.permute.xlu1 %824  ;;  %v1163_v54 = vpop.permute.xlu0 %1162 }
 0x18b   : > { %v1389_v15 = vsel %vm5291_vm9, %v1365_v18, %v1163_v54  ;;  %v1298_v56 = vsel %vm1281_vm5, %v1274_v37, %v825_v41  ;;  %v1223_v54 = vsel %vm1209_vm0, %v359_v50, %v3873_v48 }
 0x18c   : > { %1182 = vrot.lane.b32.xlu1 %v511_v62, %s3603_s20  ;;  %836 = vrot.lane.b32.xlu0 %v440_v32, %s3599_s12  ;;  %v1805_v62 = vld [vmem:[%s5282_s1 + $0x60] sm:$0xff]  ;;  %v1806_v32 = vld [vmem:[%s5282_s1 + $0x68] sm:$0xff] }
 0x18d   : > { %3404 = vmatmul.mubr.msk.f32.gmra.mrb[22].mxu0 %vm5290_vm10, %v1389_v15  ;;  %v1247_v15 = vsel %vm1233_vm3, %v1223_v54, %v3949_v58  ;;  %v363_v58 = vld [vmem:[#allocation2 + $0x88] sm:$0xff] }
 0x18e   : > { %v917_v46 = vpop.permute.xlu1 %916  ;;  %v909_v52 = vpop.permute.xlu0 %908  ;;  %3406 = vmatprep.mubr.msk.f32.mxu0 %vm3598_vm2, %v5305_v1  ;;  %v1227_v5 = vsel %vm1209_vm0, %v363_v58, %v3885_v55  ;;  %v5309_v58 = vld [vmem:[#allocation13_spill] sm:$0xff] }
 0x18f   : > { %v1318_v45 = vsel %vm1305_vm6, %v1294_v49, %v909_v52  ;;  %v1322_v13 = vsel %vm1305_vm6, %v1298_v56, %v917_v46  ;;  %v1251_v16 = vsel %vm1233_vm3, %v1227_v5, %v3961_v19 }
 0x190   : > { %1000 = vrot.lane.b32.xlu1 %v466_v59, %s3600_s13  ;;  %928 = vrot.lane.b32.xlu0 %v463_v30, %s3601_s14  ;;  %v1807_v59 = vld [vmem:[%s5282_s1 + $0x70] sm:$0xff]  ;;  %v1808_v30 = vld [vmem:[%s5282_s1 + $0x78] sm:$0xff] }
 0x192   : > { %v4277_v21 = vpop.permute.xlu1 %726  ;;  %v981_v0 = vpop.permute.xlu0 %980 }
 0x193   : > { %v1342_v26 = vsel %vm1329_vm7, %v1318_v45, %v981_v0  ;;  %v1271_v46 = vsel %vm1257_vm4, %v1247_v15, %v4277_v21  ;;  %v1810_v21 = vld [vmem:[%s5282_s1 + $0x88] sm:$0xff] }
 0x194   : > { %1184 = vrot.lane.b32.xlu1 %v512_v61, %s3603_s20  ;;  %1092 = vrot.lane.b32.xlu0 %v489_v4, %s3602_s15 }
 0x196   : > { %v1073_v63 = vpop.permute.xlu1 %1072  ;;  %v989_v39 = vpop.permute.xlu0 %988 }
 0x197   : > { %v1366_v8 = vsel %vm5292_vm8, %v1342_v26, %v1073_v63  ;;  %v1346_v35 = vsel %vm1329_vm7, %v1322_v13, %v989_v39 }
 0x198   : > { %1823 = vperm.xlu1 %3550, %v1794_v24   ;;  %1818 = vperm.xlu0 %3549, %v1793_v29  }
 0x19a   : > { %v819_v25 = vpop.permute.xlu1 %818  ;;  %v4298_v10 = vpop.permute.xlu0 %734 }
 0x19b   : > { %v1295_v48 = vsel %vm1281_vm5, %v1271_v46, %v819_v25  ;;  %v1275_v2 = vsel %vm1257_vm4, %v1251_v16, %v4298_v10  ;;  %v1814_v10 = vld [vmem:[%s5282_s1 + $0xa8] sm:$0xff]  ;;  %v5311_v16 = vld [vmem:[#allocation16_spill] sm:$0xff] }
 0x19c   : > { %1828 = vperm.xlu1 %3550, %v1795_v14   ;;  %1833 = vperm.xlu0 %3549, %v1796_v40   ;;  %v1811_v14 = vld [vmem:[%s5282_s1 + $0x90] sm:$0xff]  ;;  %v1812_v40 = vld [vmem:[%s5282_s1 + $0x98] sm:$0xff] }
 0x19e   : > { %v1165_v17 = vpop.permute.xlu1 %1164  ;;  %v1081_v7 = vpop.permute.xlu0 %1080 }
 0x19f   : > { %v1390_v22 = vsel %vm5291_vm9, %v1366_v8, %v1165_v17  ;;  %v1370_v38 = vsel %vm5292_vm8, %v1346_v35, %v1081_v7  ;;  %v1815_v17 = vld [vmem:[%s5282_s1 + $0xb0] sm:$0xf] }
 0x1a0   : > { %1838 = vperm.xlu1 %3550, %v1797_v43   ;;  %1843 = vperm.xlu0 %3549, %v1798_v31  }
 0x1a1   : > { %3407 = vmatmul.mubr.msk.f32.gmra.mrb[24].mxu0 %vm5290_vm10, %v1390_v22 }
 0x1a2   : > { %v911_v51 = vpop.permute.xlu1 %910  ;;  %v827_v36 = vpop.permute.xlu0 %826  ;;  %3409 = vmatprep.mubr.msk.f32.mxu0 %vm3598_vm2, %v5305_v1 }
 0x1a3   : > { %v1319_v4 = vsel %vm1305_vm6, %v1295_v48, %v911_v51  ;;  %v1299_v19 = vsel %vm1281_vm5, %v1275_v2, %v827_v36 }
 0x1a4   : > { %1848 = vperm.xlu1 %3550, %v1799_v20   ;;  %1853 = vperm.xlu0 %3549, %v1800_v42   ;;  %v1224_v42 = vsel %vm1209_vm0, %v360_v9, %v3881_v53  ;;  %v5312_v9 = vld [vmem:[#allocation11_spill] sm:$0xff] }
 0x1a5   : > { %v1248_v37 = vsel %vm1233_vm3, %v1224_v42, %v3947_v57 }
 0x1a6   : > { %v919_v27 = vpop.permute.xlu1 %918  ;;  %v1173_v12 = vpop.permute.xlu0 %1172 }
 0x1a7   : > { %v1394_v28 = vsel %vm5291_vm9, %v1370_v38, %v1173_v12  ;;  %v1323_v49 = vsel %vm1305_vm6, %v1299_v19, %v919_v27 }
 0x1a8   : > { %1858 = vperm.xlu1 %3550, %v1801_v6   ;;  %1863 = vperm.xlu0 %3549, %v1802_v60   ;;  %v364_v6 = vld [vmem:[#allocation2 + $0x90] sm:$0xff] }
 0x1a9   : > { %3419 = vmatmul.mubr.msk.f32.vlgmr.msra.gmra.mrb[0].mxu1 %vm5290_vm10, %v1394_v28  ;;  %v5306_v28 = vld [vmem:[#allocation9_spill] sm:$0xff] }
 0x1aa   : > { %v4343_v23 = vpop.permute.xlu1 %728  ;;  %v983_v44 = vpop.permute.xlu0 %982  ;;  %3421 = vmatprep.mubr.msk.f32.mxu1 %vm3598_vm2, %v5305_v1  ;;  %v1228_v57 = vsel %vm1209_vm0, %v364_v6, %v5306_v28 }
 0x1ab   : > { %v1343_v0 = vsel %vm1329_vm7, %v1319_v4, %v983_v44  ;;  %v1272_v51 = vsel %vm1257_vm4, %v1248_v37, %v4343_v23  ;;  %v365_v4 = vld [vmem:[#allocation2 + $0x98] sm:$0xff] }
 0x1ac   : > { %1868 = vperm.xlu1 %3550, %v1803_v3   ;;  %1873 = vperm.xlu0 %3549, %v1804_v33   ;;  %v5307_v3 = vld [vmem:[#allocation14_spill] sm:$0xff]  ;;  %v5313_v37 = vld [vmem:[#allocation15_spill] sm:$0xff] }
 0x1ad   : > { %v1252_v33 = vsel %vm1233_vm3, %v1228_v57, %v5307_v3  ;;  %v367_v57 = vld [vmem:[#allocation2 + $0xa8] sm:$0xff] }
 0x1ae   : > { %v1075_v18 = vpop.permute.xlu1 %1074  ;;  %v991_v41 = vpop.permute.xlu0 %990 }
 0x1af   : > { %v1367_v24 = vsel %vm5292_vm8, %v1343_v0, %v1075_v18  ;;  %v1347_v45 = vsel %vm1329_vm7, %v1323_v49, %v991_v41 }
 0x1b0   : > { %1878 = vperm.xlu1 %3550, %v1805_v62   ;;  %1883 = vperm.xlu0 %3549, %v1806_v32  }
 0x1b2   : > { %v821_v52 = vpop.permute.xlu1 %820  ;;  %v4365_v61 = vpop.permute.xlu0 %736 }
 0x1b3   : > { %v1296_v13 = vsel %vm1281_vm5, %v1272_v51, %v821_v52  ;;  %v1276_v23 = vsel %vm1257_vm4, %v1252_v33, %v4365_v61  ;;  %v5308_v61 = vld [vmem:[#allocation7_spill] sm:$0xff]  ;;  %v5314_v33 = vld [vmem:[#allocation10_spill] sm:$0xff] }
 0x1b4   : > { %1888 = vperm.xlu1 %3550, %v1807_v59   ;;  %1893 = vperm.xlu0 %3549, %v1808_v30   ;;  %v361_v30 = vld [vmem:[#allocation2 + $0x78] sm:$0xff] }
 0x1b5   : > { %v1225_v48 = vsel %vm1209_vm0, %v361_v30, %v5308_v61 }
 0x1b6   : > { %v1167_v29 = vpop.permute.xlu1 %1166  ;;  %v1083_v63 = vpop.permute.xlu0 %1082  ;;  %v1249_v0 = vsel %vm1233_vm3, %v1225_v48, %v5309_v58 }
 0x1b7   : > { %v1391_v39 = vsel %vm5291_vm9, %v1367_v24, %v1167_v29  ;;  %v1371_v26 = vsel %vm5292_vm8, %v1347_v45, %v1083_v63  ;;  %v5310_v63 = vld [vmem:[#allocation8_spill] sm:$0xff] }
 0x1b8   : > { %1898 = vperm.xlu1 %3550, %v1809_v34   ;;  %1903 = vperm.xlu0 %3549, %v1810_v21  }
 0x1b9   : > { %3410 = vmatmul.mubr.msk.f32.gmra.mrb[26].mxu0 %vm5290_vm10, %v1391_v39  ;;  %v1229_v39 = vsel %vm1209_vm0, %v365_v4, %v5310_v63 }
 0x1ba   : > { %v913_v25 = vpop.permute.xlu1 %912  ;;  %v829_v55 = vpop.permute.xlu0 %828  ;;  %3412 = vmatprep.mubr.msk.f32.mxu0 %vm3598_vm2, %v5305_v1 }
 0x1bb   : > { %v1320_v35 = vsel %vm1305_vm6, %v1296_v13, %v913_v25  ;;  %v1300_v62 = vsel %vm1281_vm5, %v1276_v23, %v829_v55  ;;  %v1231_v23 = vsel %vm1209_vm0, %v367_v57, %v5314_v33 }
 0x1bc   : > { %1908 = vperm.xlu1 %3550, %v1811_v14   ;;  %1913 = vperm.xlu0 %3549, %v1812_v40   ;;  %v1253_v14 = vsel %vm1233_vm3, %v1229_v39, %v5311_v16 }
 0x1be   : > { %v921_v43 = vpop.permute.xlu1 %920  ;;  %v1175_v31 = vpop.permute.xlu0 %1174 }
 0x1bf   : > { %v1395_v8 = vsel %vm5291_vm9, %v1371_v26, %v1175_v31  ;;  %v1324_v32 = vsel %vm1305_vm6, %v1300_v62, %v921_v43  ;;  %v5315_v62 = vld [vmem:[#allocation18_spill] sm:$0xff] }
 0x1c0   : > { %1918 = vperm.xlu1 %3550, %v1813_v47   ;;  %1923 = vperm.xlu0 %3549, %v1814_v10  }
 0x1c1   : > { %3422 = vmatmul.mubr.msk.f32.gmra.mrb[2].mxu1 %vm5290_vm10, %v1395_v8 }
 0x1c2   : > { %v731_v7 = vpop.permute.xlu1 %730  ;;  %v985_v22 = vpop.permute.xlu0 %984  ;;  %3424 = vmatprep.mubr.msk.f32.mxu1 %vm3598_vm2, %v5305_v1 }
 0x1c3   : > { %v1344_v60 = vsel %vm1329_vm7, %v1320_v35, %v985_v22  ;;  %v1273_v34 = vsel %vm1257_vm4, %v1249_v0, %v731_v7  ;;  %v366_v7 = vld [vmem:[#allocation2 + $0xa0] sm:$0xff] }
 0x1c4   : > { %1928 = vperm.xlu1 %3550, %v1815_v17   ;;  %v5316_v0 = vld [vmem:[#allocation12_spill] sm:$0xff] }
 0x1c6   : > { %v1077_v11 = vpop.permute.xlu1 %1076  ;;  %v993_v20 = vpop.permute.xlu0 %992 }
 0x1c7   : > { %v1368_v38 = vsel %vm5292_vm8, %v1344_v60, %v1077_v11  ;;  %v1348_v18 = vsel %vm1329_vm7, %v1324_v32, %v993_v20  ;;  %v1230_v11 = vsel %vm1209_vm0, %v366_v7, %v5312_v9  ;;  %v1255_v32 = vsel %vm1233_vm3, %v1231_v23, %v5315_v62 }
 0x1c8   : > { %v1254_v51 = vsel %vm1233_vm3, %v1230_v11, %v5313_v37  ;;  %v4515_v7 = vstv %s1721_s29 }
 0x1ca   : > { %v823_v36 = vpop.permute.xlu1 %822  ;;  %v739_v56 = vpop.permute.xlu0 %738 }
 0x1cb   : > { %v1297_v29 = vsel %vm1281_vm5, %v1273_v34, %v823_v36  ;;  %v1277_v2 = vsel %vm1257_vm4, %v1253_v14, %v739_v56 }
 0x1ce   : > { %v1169_v27 = vpop.permute.xlu1 %1168  ;;  %v1085_v12 = vpop.permute.xlu0 %1084 }
 0x1cf   : > { %v1392_v53 = vsel %vm5291_vm9, %v1368_v38, %v1169_v27  ;;  %v1372_v41 = vsel %vm5292_vm8, %v1348_v18, %v1085_v12 }
 0x1d0   : > { %3413 = vmatmul.mubr.msk.f32.gmra.mrb[28].mxu0 %vm5290_vm10, %v1392_v53 }
 0x1d1   : > { %3415 = vmatprep.mubr.msk.f32.mxu0 %vm3598_vm2, %v5305_v1 }
 0x1d2   : > { %v915_v44 = vpop.permute.xlu1 %914  ;;  %v831_v50 = vpop.permute.xlu0 %830 }
 0x1d3   : > { %v1321_v5 = vsel %vm1305_vm6, %v1297_v29, %v915_v44  ;;  %v1301_v49 = vsel %vm1281_vm5, %v1277_v2, %v831_v50 }
 0x1d6   : > { %v923_v54 = vpop.permute.xlu1 %922  ;;  %v1177_v15 = vpop.permute.xlu0 %1176 }
 0x1d7   : > { %v1396_v59 = vsel %vm5291_vm9, %v1372_v41, %v1177_v15  ;;  %v1325_v47 = vsel %vm1305_vm6, %v1301_v49, %v923_v54 }
 0x1d8   : > { %3425 = vmatmul.mubr.msk.f32.gmra.mrb[4].mxu1 %vm5290_vm10, %v1396_v59 }
 0x1d9   : > { %3427 = vmatprep.mubr.msk.f32.mxu1 %vm3598_vm2, %v5305_v1 }
 0x1da   : > { %v995_v46 = vpop.permute.xlu1 %994  ;;  %v987_v52 = vpop.permute.xlu0 %986 }
 0x1db   : > { %v1345_v40 = vsel %vm1329_vm7, %v1321_v5, %v987_v52  ;;  %v1349_v26 = vsel %vm1329_vm7, %v1325_v47, %v995_v46  ;;  %v368_v52 = vld [vmem:[#allocation2 + $0xb0] sm:$0xf] }
 0x1dc   : > { %v1232_v34 = vsel %vm1209_vm0, %v368_v52, %v5316_v0 }
 0x1de   : > { %v741_v21 = vpop.permute.xlu1 %740  ;;  %v1079_v24 = vpop.permute.xlu0 %1078 }
 0x1df   : > { %v1369_v25 = vsel %vm5292_vm8, %v1345_v40, %v1079_v24  ;;  %v1278_v36 = vsel %vm1257_vm4, %v1254_v51, %v741_v21  ;;  %v5317_v24 = vld [vmem:[#allocation17_spill] sm:$0xff] }
 0x1e0   : > { %v1256_v29 = vsel %vm1233_vm3, %v1232_v34, %v5317_v24 }
 0x1e2   : > { %v1171_v55 = vpop.permute.xlu1 %1170  ;;  %v1087_v19 = vpop.permute.xlu0 %1086 }
 0x1e3   : > { %v1393_v45 = vsel %vm5291_vm9, %v1369_v25, %v1171_v55  ;;  %v1373_v31 = vsel %vm5292_vm8, %v1349_v26, %v1087_v19 }
 0x1e4   : > { %v4455_v10 = vpop.f32.mrb[0].mxu0  ;;  %3416 = vmatmul.mubr.msk.f32.gmra.mrb[30].mxu0 %vm5290_vm10, %v1393_v45  ;;  %v1690_v45 = vlaneseq }
 0x1e5   : > { %v3372_v43 = vpop.f32.mrb[1].mxu0 }
 0x1e6   : > { %v1179_v8 = vpop.permute.xlu1 %1178  ;;  %v833_v17 = vpop.permute.xlu0 %832 }
 0x1e7   : > { %v1397_v22 = vsel %vm5291_vm9, %v1373_v31, %v1179_v8  ;;  %v1302_v13 = vsel %vm1281_vm5, %v1278_v36, %v833_v17  ;;  %v4510_v31 = vld [vmem:[%s5284_s3] ss:$0 sm:$0xff]  ;;  %v4513_v17 = vstv %s1717_s7 }
 0x1e8   : > { %3428 = vmatmul.mubr.msk.f32.gmra.mrb[6].mxu1 %vm5290_vm10, %v1397_v22  ;;  %v1554_v22 = vadd.f32 %v4510_v31, %v4455_v10 }
 0x1e9   : > { %3430 = vmatprep.mubr.msk.f32.mxu1 %vm3598_vm2, %v5305_v1 }
 0x1ea   : > { %v997_v20 = vpop.permute.xlu1 %996  ;;  %v925_v42 = vpop.permute.xlu0 %924  ;;  %v1667_v36 = vmax.f32 %v1554_v22, 0.0 }
 0x1eb   : > { %v1326_v6 = vsel %vm1305_vm6, %v1302_v13, %v925_v42 }
 0x1ec   : > { %v4469_v56 = vpop.f32.mrb[2].mxu0  ;;  %v1350_v27 = vsel %vm1329_vm7, %v1326_v6, %v997_v20 }
 0x1ed   : > { %v3375_v35 = vpop.f32.mrb[3].mxu0  ;;  %v1559_v9 = vadd.f32 %v4510_v31, %v4469_v56 }
 0x1ee   : > { %v1089_v60 = vpop.permute.xlu1 %1088  ;;  %v743_v38 = vpop.permute.xlu0 %742 }
 0x1ef   : > { %v1374_v12 = vsel %vm5292_vm8, %v1350_v27, %v1089_v60  ;;  %v1279_v18 = vsel %vm1257_vm4, %v1255_v32, %v743_v38  ;;  %v1668_v56 = vmax.f32 %v1559_v9, 0.0  ;;  %v2872_v32 = vld [vmem:[%s5285_s4 + $0x18] sm:$0xff] }
 0x1f2   : > { %v1181_v53 = vpop.permute.xlu1 %1180  ;;  %v835_v28 = vpop.permute.xlu0 %834 }
 0x1f3   : > { %v1398_v3 = vsel %vm5291_vm9, %v1374_v12, %v1181_v53  ;;  %v1303_v54 = vsel %vm1281_vm5, %v1279_v18, %v835_v28 }
 0x1f4   : > { %3431 = vmatmul.mubr.msk.f32.gmra.mrb[8].mxu1 %vm5290_vm10, %v1398_v3 }
 0x1f5   : > { %3433 = vmatprep.mubr.msk.f32.mxu1 %vm3598_vm2, %v5305_v1 }
 0x1f6   : > { %v999_v44 = vpop.permute.xlu1 %998  ;;  %v927_v50 = vpop.permute.xlu0 %926 }
 0x1f7   : > { %v1327_v59 = vsel %vm1305_vm6, %v1303_v54, %v927_v50 }
 0x1f8   : > { %v1563_v41 = vpop.f32.mrb[4].mxu0  ;;  %v1351_v61 = vsel %vm1329_vm7, %v1327_v59, %v999_v44 }
 0x1f9   : > { %v3378_v15 = vpop.f32.mrb[5].mxu0  ;;  %v1564_v10 = vadd.f32 %v4510_v31, %v1563_v41 }
 0x1fa   : > { %v1091_v30 = vpop.permute.xlu1 %1090  ;;  %v745_v46 = vpop.permute.xlu0 %744 }
 0x1fb   : > { %v1375_v48 = vsel %vm5292_vm8, %v1351_v61, %v1091_v30  ;;  %v1280_v39 = vsel %vm1257_vm4, %v1256_v29, %v745_v46  ;;  %v1669_v28 = vmax.f32 %v1564_v10, 0.0 }
 0x1fe   : > { %v1183_v4 = vpop.permute.xlu1 %1182  ;;  %v837_v58 = vpop.permute.xlu0 %836 }
 0x1ff   : > { %v1399_v21 = vsel %vm5291_vm9, %v1375_v48, %v1183_v4  ;;  %v1304_v16 = vsel %vm1281_vm5, %v1280_v39, %v837_v58 }
 0x200   : > { %v1568_v63 = vpop.f32.mrb[6].mxu0  ;;  %3434 = vmatmul.mubr.msk.f32.gmra.mrb[10].mxu1 %vm5290_vm10, %v1399_v21 }
 0x201   : > { %v3381_v5 = vpop.f32.mrb[7].mxu0  ;;  %3436 = vmatprep.mubr.msk.f32.mxu1 %vm3598_vm2, %v5305_v1  ;;  %v4505_v1 = vshrl.u32 %v1690_v45, 7  ;;  %v1569_v37 = vadd.f32 %v4510_v31, %v1568_v63 }
 0x202   : > { %v1001_v14 = vpop.permute.xlu1 %1000  ;;  %v929_v40 = vpop.permute.xlu0 %928 }
 0x203   : > { %v1328_v2 = vsel %vm1305_vm6, %v1304_v16, %v929_v40  ;;  %v1692_v8 = vadd.s32 8, %v4505_v1  ;;  %v1693_v11 = vadd.s32 16, %v4505_v1  ;;  %v1694_v20 = vadd.s32 24, %v4505_v1 }
 0x204   : > { %v1352_v19 = vsel %vm1329_vm7, %v1328_v2, %v1001_v14  ;;  %vm1723_vm13 = vcmp.ge.s32.totalorder %v4505_v1, %v4513_v17  ;;  %vm1747_vm14 = vcmp.lt.s32.totalorder %v4505_v1, %v4515_v7  ;;  %v1695_v38 = vadd.s32 32, %v4505_v1 }
 0x205   : > { %vm1724_vm11 = vcmp.ge.s32.totalorder %v1692_v8, %v4513_v17  ;;  %vm1748_vm12 = vcmp.lt.s32.totalorder %v1692_v8, %v4515_v7  ;;  %vm4535_vm2 = vmand %vm1723_vm13, %vm1747_vm14  ;;  %v1696_v53 = vadd.s32 40, %v4505_v1  ;;  %v1670_v57 = vmax.f32 %v1569_v37, 0.0 }
 0x206   : > { %v1185_v25 = vpop.permute.xlu1 %1184  ;;  %v1093_v55 = vpop.permute.xlu0 %1092  ;;  %vm4531_vm15 = vmand %vm1724_vm11, %vm1748_vm12  ;;  %vm1750_vm11 = vcmp.lt.s32.totalorder %v1694_v20, %v4515_v7  ;;  %vm1727_vm14 = vcmp.ge.s32.totalorder %v1695_v38, %v4513_v17  ;;  %v1697_v15 = vadd.s32 48, %v4505_v1  ;;  %v1699_v37 = vadd.s32 64, %v4505_v1 }
 0x207   : > { %v1376_v49 = vsel %vm5292_vm8, %v1352_v19, %v1093_v55  ;;  %vm1726_vm8 = vcmp.ge.s32.totalorder %v1694_v20, %v4513_v17  ;;  %v1698_v55 = vadd.s32 56, %v4505_v1 }
 0x208   : > { %v1400_v47 = vsel %vm5291_vm9, %v1376_v49, %v1185_v25  ;;  %vm1749_vm9 = vcmp.lt.s32.totalorder %v1693_v11, %v4515_v7  ;;  %vm4559_vm13 = vmand %vm1726_vm8, %vm1750_vm11  ;;  %vm1729_vm11 = vcmp.ge.s32.totalorder %v1697_v15, %v4513_v17 }
 0x209   : > { %3437 = vmatmul.mubr.msk.f32.gmra.mrb[12].mxu1 %vm5290_vm10, %v1400_v47  ;;  %vm1725_vm10 = vcmp.ge.s32.totalorder %v1693_v11, %v4513_v17 }
 0x20a   : > { %vm4551_vm12 = vmand %vm1725_vm10, %vm1749_vm9  ;;  %vm1728_vm9 = vcmp.ge.s32.totalorder %v1696_v53, %v4513_v17  ;;  %vm1752_vm10 = vcmp.lt.s32.totalorder %v1696_v53, %v4515_v7 }
 0x20c   : > { %v1573_v26 = vpop.f32.mrb[8].mxu0 }
 0x20d   : > { %v3384_v43 = vpop.f32.mrb[9].mxu0  ;;  %v1574_v3 = vadd.f32 %v4510_v31, %v1573_v26 }
 0x20f   : > { %v1671_v59 = vmax.f32 %v1574_v3, 0.0  ;;  %v2870_v3 = vld [vmem:[%s5285_s4 + $0x8] sm:$0xff] }
 0x214   : > { %v1578_v42 = vpop.f32.mrb[10].mxu0 }
 0x215   : > { %v3387_v51 = vpop.f32.mrb[11].mxu0  ;;  %v1579_v33 = vadd.f32 %v4510_v31, %v1578_v42 }
 0x217   : > { %v1824_v35 = vpop.permute.xlu1 %1823  ;;  %v1819_v60 = vpop.permute.xlu0 %1818  ;;  %v1672_v30 = vmax.f32 %v1579_v33, 0.0 }
 0x218   : > { %v1932_v27 = vmul.f32 %v1824_v35, %v1668_v56  ;;  %v1931_v12 = vmul.f32 %v1819_v60, %v1667_v36 }
 0x21a   : > { %v2001_v23 = vsel %vm4531_vm15, %v1932_v27, 0.0  ;;  %v2000_v44 = vsel %vm4535_vm2, %v1931_v12, 0.0  ;;  %vm1751_vm15 = vcmp.lt.s32.totalorder %v1695_v38, %v4515_v7  ;;  %vm1775_vm2 = vmand %vm1728_vm9, %vm1752_vm10  ;;  %vm1731_vm10 = vcmp.ge.s32.totalorder %v1699_v37, %v4513_v17 }
 0x21b   : > { %2024 = vst.msk [vmem:[#allocation3 + $0x8] sm:$0xff] %vm1209_vm0, %v2001_v23  ;;  %2023 = vst.msk [vmem:[#allocation3] sm:$0xff] %vm1209_vm0, %v2000_v44  ;;  %v1829_v62 = vpop.permute.xlu1 %1828  ;;  %v1834_v18 = vpop.permute.xlu0 %1833 }
 0x21c   : > { %v1933_v41 = vmul.f32 %v1829_v62, %v1669_v28  ;;  %v1934_v54 = vmul.f32 %v1834_v18, %v1670_v57  ;;  %vm4572_vm8 = vmand %vm1727_vm14, %vm1751_vm15  ;;  %vm1730_vm14 = vcmp.ge.s32.totalorder %v1698_v55, %v4513_v17  ;;  %vm1754_vm15 = vcmp.lt.s32.totalorder %v1698_v55, %v4515_v7  ;;  %v2869_v57 = vld [vmem:[%s5285_s4] sm:$0xff]  ;;  %v2871_v62 = vld [vmem:[%s5285_s4 + $0x10] sm:$0xff] }
 0x21d   : > { %vm1777_vm9 = vmand %vm1730_vm14, %vm1754_vm15  ;;  %v1700_v28 = vadd.s32 72, %v4505_v1  ;;  %v3482_v44 = vpack.c.bf16 %v2870_v3, %v2869_v57  ;;  %v1702_v55 = vadd.s32 88, %v4505_v1  ;;  %v1707_v3 = vadd.s32 128, %v4505_v1 }
 0x21e   : > { %v2002_v46 = vsel %vm4551_vm12, %v1933_v41, 0.0  ;;  %v2003_v52 = vsel %vm4559_vm13, %v1934_v54, 0.0  ;;  %vm1753_vm12 = vcmp.lt.s32.totalorder %v1697_v15, %v4515_v7  ;;  %v3486_v54 = vpack.c.bf16 %v2872_v32, %v2871_v62 }
 0x21f   : > { %2025 = vst.msk [vmem:[#allocation3 + $0x10] sm:$0xff] %vm1209_vm0, %v2002_v46  ;;  %2026 = vst.msk [vmem:[#allocation3 + $0x18] sm:$0xff] %vm1209_vm0, %v2003_v52  ;;  %v1839_v48 = vpop.permute.xlu1 %1838  ;;  %v1844_v4 = vpop.permute.xlu0 %1843  ;;  %3483 = vmatprep.subr.bf16.mxu1 %v3482_v44 }
 0x220   : > { %v1935_v58 = vmul.f32 %v1839_v48, %v1671_v59  ;;  %v1936_v0 = vmul.f32 %v1844_v4, %v1672_v30  ;;  %v1583_v34 = vpop.f32.mrb[12].mxu0  ;;  %vm1776_vm13 = vmand %vm1729_vm11, %vm1753_vm12  ;;  %vm1732_vm11 = vcmp.ge.s32.totalorder %v1700_v28, %v4513_v17  ;;  %vm1756_vm12 = vcmp.lt.s32.totalorder %v1700_v28, %v4515_v7  ;;  %3485 = vmatpush3.bf16.msra.mxu1 %v3482_v44 }
 0x221   : > { %v1584_v21 = vadd.f32 %v4510_v31, %v1583_v34  ;;  %v3390_v24 = vpop.f32.mrb[13].mxu0  ;;  %3487 = vmatprep.subr.bf16.mxu1 %v3486_v54 }
 0x222   : > { %v2004_v29 = vsel %vm4572_vm8, %v1935_v58, 0.0  ;;  %v2005_v63 = vsel %vm1775_vm2, %v1936_v0, 0.0  ;;  %v2069_v39 = vld [vmem:[#allocation3 + $0x1] sm:$0xff]  ;;  %vm1755_vm8 = vcmp.lt.s32.totalorder %v1699_v37, %v4515_v7  ;;  %v2873_v58 = vld [vmem:[%s5285_s4 + $0x20] sm:$0xf]  ;;  %v1701_v0 = vadd.s32 80, %v4505_v1 }
 0x223   : > { %2027 = vst.msk [vmem:[#allocation3 + $0x20] sm:$0xff] %vm1209_vm0, %v2004_v29  ;;  %2028 = vst.msk [vmem:[#allocation3 + $0x28] sm:$0xff] %vm1209_vm0, %v2005_v63  ;;  %v1673_v5 = vmax.f32 %v1584_v21, 0.0  ;;  %v1849_v16 = vpop.permute.xlu1 %1848  ;;  %2199 = vrot.lane.b32.xlu0 %v2069_v39, %s3593_s17  ;;  %v2087_v40 = vld [vmem:[#allocation3 + $0x2] sm:$0xff]  ;;  %v1854_v9 = vpop.permute.xlu0 %1853 }
 0x224   : > { %vm1778_vm2 = vmand %vm1731_vm10, %vm1755_vm8  ;;  %3489 = vmatpush3.bf16.msra.mxu1 %v3486_v54  ;;  %vm1733_vm14 = vcmp.ge.s32.totalorder %v1701_v0, %v4513_v17  ;;  %vm1757_vm15 = vcmp.lt.s32.totalorder %v1701_v0, %v4515_v7  ;;  %vm1758_vm10 = vcmp.lt.s32.totalorder %v1702_v55, %v4515_v7 }
 0x225   : > { %v1937_v14 = vmul.f32 %v1849_v16, %v1673_v5  ;;  %3447 = vmatprep.subr.msk.mxu1 %vm1483_vm1, %v2873_v58 }
 0x226   : > { %v2070_v2 = vld [vmem:[#allocation3 + $0x9] sm:$0xff]  ;;  %v2089_v49 = vld [vmem:[#allocation3 + $0x12] sm:$0xff] }
 0x227   : > { %v2006_v25 = vsel %vm1776_vm13, %v1937_v14, 0.0  ;;  %2271 = vrot.lane.b32.xlu0 %v2087_v40, %s3594_s18  ;;  %2201 = vrot.lane.b32.xlu1 %v2070_v2, %s3593_s17  ;;  %v2088_v19 = vld [vmem:[#allocation3 + $0xa] sm:$0xff]  ;;  %v2107_v43 = vld [vmem:[#allocation3 + $0x13] sm:$0xff]  ;;  %v1859_v38 = vpop.permute.xlu1 %1858  ;;  %v1864_v46 = vpop.permute.xlu0 %1863  ;;  %vm1779_vm13 = vmand %vm1732_vm11, %vm1756_vm12 }
 0x228   : > { %2029 = vst.msk [vmem:[#allocation3 + $0x30] sm:$0xff] %vm1209_vm0, %v2006_v25  ;;  %v2071_v42 = vld [vmem:[#allocation3 + $0x11] sm:$0xff]  ;;  %3448 = vmatpush3.msk.msra.mxu1 %vm1483_vm1, %v2873_v58  ;;  %vm1780_vm1 = vmand %vm1733_vm14, %vm1757_vm15  ;;  %vm1763_vm14 = vcmp.lt.s32.totalorder %v1707_v3, %v4515_v7  ;;  %v1704_v58 = vadd.s32 104, %v4505_v1 }
 0x229   : > { %v2125_v51 = vld [vmem:[#allocation3 + $0x14] sm:$0xff] }
 0x22a   : > { %v2090_v8 = vld [vmem:[#allocation3 + $0x1a] sm:$0xff]  ;;  %v2127_v12 = vld [vmem:[#allocation3 + $0x24] sm:$0xff] }
 0x22b   : > { %2273 = vrot.lane.b32.xlu1 %v2088_v19, %s3594_s18  ;;  %2327 = vrot.lane.b32.xlu0 %v2089_v49, %s3595_s19  ;;  %v2108_v20 = vld [vmem:[#allocation3 + $0x1b] sm:$0xff]  ;;  %v2145_v15 = vld [vmem:[#allocation3 + $0x25] sm:$0xff]  ;;  %v1869_v16 = vpop.permute.xlu1 %1868 }
 0x22c   : > { %v1588_v45 = vpop.f32.mrb[14].mxu0  ;;  %v2072_v36 = vld [vmem:[#allocation3 + $0x19] sm:$0xff]  ;;  %v2091_v33 = vld [vmem:[#allocation3 + $0x22] sm:$0xff] }
 0x22d   : > { %v1589_v47 = vadd.f32 %v4510_v31, %v1588_v45  ;;  %v3393_v26 = vpop.f32.mrb[15].mxu0  ;;  %v2126_v6 = vld [vmem:[#allocation3 + $0x1c] sm:$0xff]  ;;  %v2163_v34 = vld [vmem:[#allocation3 + $0x26] sm:$0xff] }
 0x22e   : > { %v2109_v61 = vld [vmem:[#allocation3 + $0x23] sm:$0xff] }
 0x22f   : > { %v1674_v22 = vmax.f32 %v1589_v47, 0.0  ;;  %2399 = vrot.lane.b32.xlu0 %v2107_v43, %s3599_s12  ;;  %2329 = vrot.lane.b32.xlu1 %v2090_v8, %s3595_s19  ;;  %v2128_v23 = vld [vmem:[#allocation3 + $0x2c] sm:$0xff]  ;;  %v2073_v21 = vld [vmem:[#allocation3 + $0x21] sm:$0xff] }
 0x230   : > { %v2092_v59 = vld [vmem:[#allocation3 + $0x2a] sm:$0xff] }
 0x231   : > { %v1938_v11 = vmul.f32 %v1854_v9, %v1674_v22  ;;  %v2146_v48 = vld [vmem:[#allocation3 + $0x2d] sm:$0xff]  ;;  %v1874_v22 = vpop.permute.xlu0 %1873 }
 0x232   : > { %v2110_v39 = vld [vmem:[#allocation3 + $0x2b] sm:$0xff] }
 0x233   : > { %v2007_v10 = vsel %vm1777_vm9, %v1938_v11, 0.0  ;;  %2401 = vrot.lane.b32.xlu0 %v2108_v20, %s3599_s12  ;;  %2203 = vrot.lane.b32.xlu1 %v2071_v42, %s3593_s17  ;;  %v2164_v40 = vld [vmem:[#allocation3 + $0x2e] sm:$0xff]  ;;  %vm1734_vm9 = vcmp.ge.s32.totalorder %v1702_v55, %v4513_v17 }
 0x234   : > { %2030 = vst.msk [vmem:[#allocation3 + $0x38] sm:$0xff] %vm1209_vm0, %v2007_v10  ;;  %v2074_v2 = vld [vmem:[#allocation3 + $0x29] sm:$0xff]  ;;  %vm1781_vm8 = vmand %vm1734_vm9, %vm1758_vm10  ;;  %vm1760_vm9 = vcmp.lt.s32.totalorder %v1704_v58, %v4515_v7 }
 0x235   : > { %v1884_v28 = vpop.permute.xlu0 %1883 }
 0x237   : > { %2471 = vrot.lane.b32.xlu1 %v2125_v51, %s3601_s14  ;;  %2205 = vrot.lane.b32.xlu0 %v2072_v36, %s3593_s17 }
 0x238   : > { %v1593_v56 = vpop.f32.mrb[16].mxu0 }
 0x239   : > { %v1594_v13 = vadd.f32 %v4510_v31, %v1593_v56  ;;  %v3396_v35 = vpop.f32.mrb[17].mxu0  ;;  %v1703_v56 = vadd.s32 96, %v4505_v1 }
 0x23a   : > { %v1879_v35 = vpop.permute.xlu1 %1878 }
 0x23b   : > { %v1675_v60 = vmax.f32 %v1594_v13, 0.0  ;;  %2275 = vrot.lane.b32.xlu1 %v2089_v49, %s3594_s18  ;;  %2473 = vrot.lane.b32.xlu0 %v2126_v6, %s3601_s14  ;;  %v2129_v19 = vld [vmem:[#allocation3 + $0x34] sm:$0xff]  ;;  %vm1759_vm11 = vcmp.lt.s32.totalorder %v1703_v56, %v4515_v7 }
 0x23c   : > { %v2093_v26 = vld [vmem:[#allocation3 + $0x32] sm:$0xff] }
 0x23d   : > { %v1939_v27 = vmul.f32 %v1859_v38, %v1675_v60  ;;  %v2147_v11 = vld [vmem:[#allocation3 + $0x35] sm:$0xff] }
 0x23e   : > { %v2111_v10 = vld [vmem:[#allocation3 + $0x33] sm:$0xff] }
 0x23f   : > { %v2008_v53 = vsel %vm1778_vm2, %v1939_v27, 0.0  ;;  %2277 = vrot.lane.b32.xlu0 %v2090_v8, %s3594_s18  ;;  %2527 = vrot.lane.b32.xlu1 %v2127_v12, %s3600_s13  ;;  %v2165_v51 = vld [vmem:[#allocation3 + $0x36] sm:$0xff]  ;;  %vm1735_vm2 = vcmp.ge.s32.totalorder %v1703_v56, %v4513_v17  ;;  %v1705_v56 = vadd.s32 112, %v4505_v1 }
 0x240   : > { %2031 = vst.msk [vmem:[#allocation3 + $0x40] sm:$0xff] %vm1209_vm0, %v2008_v53  ;;  %v2075_v36 = vld [vmem:[#allocation3 + $0x31] sm:$0xff]  ;;  %vm1782_vm12 = vmand %vm1735_vm2, %vm1759_vm11 }
 0x243   : > { %2331 = vrot.lane.b32.xlu1 %v2091_v33, %s3595_s19  ;;  %2529 = vrot.lane.b32.xlu0 %v2128_v23, %s3600_s13 }
 0x244   : > { %v1598_v50 = vpop.f32.mrb[18].mxu0 }
 0x245   : > { %v1599_v18 = vadd.f32 %v4510_v31, %v1598_v50  ;;  %v3399_v41 = vpop.f32.mrb[19].mxu0 }
 0x247   : > { %v1676_v30 = vmax.f32 %v1599_v18, 0.0  ;;  %2599 = vrot.lane.b32.xlu1 %v2145_v15, %s3602_s15  ;;  %2333 = vrot.lane.b32.xlu0 %v2092_v59, %s3595_s19  ;;  %v2130_v43 = vld [vmem:[#allocation3 + $0x3c] sm:$0xff]  ;;  %v4684_v18 = vpop.permute.xlu0 %1893 }
 0x248   : > { %v2094_v20 = vld [vmem:[#allocation3 + $0x3a] sm:$0xff] }
 0x249   : > { %v1940_v52 = vmul.f32 %v1864_v46, %v1676_v30  ;;  %v2148_v37 = vld [vmem:[#allocation3 + $0x3d] sm:$0xff] }
 0x24a   : > { %v2112_v13 = vld [vmem:[#allocation3 + $0x3b] sm:$0xff] }
 0x24b   : > { %v2009_v4 = vsel %vm1779_vm13, %v1940_v52, 0.0  ;;  %2403 = vrot.lane.b32.xlu1 %v2109_v61, %s3599_s12  ;;  %2601 = vrot.lane.b32.xlu0 %v2146_v48, %s3602_s15  ;;  %v2166_v27 = vld [vmem:[#allocation3 + $0x3e] sm:$0xff]  ;;  %vm1739_vm13 = vcmp.ge.s32.totalorder %v1707_v3, %v4513_v17  ;;  %v1904_v52 = vpop.permute.xlu0 %1903 }
 0x24c   : > { %2032 = vst.msk [vmem:[#allocation3 + $0x48] sm:$0xff] %vm1209_vm0, %v2009_v4  ;;  %vm1786_vm15 = vmand %vm1739_vm13, %vm1763_vm14  ;;  %vm1761_vm13 = vcmp.lt.s32.totalorder %v1705_v56, %v4515_v7 }
 0x24f   : > { %2671 = vrot.lane.b32.xlu1 %v2163_v34, %s3603_s20  ;;  %2207 = vrot.lane.b32.xlu0 %v2073_v21, %s3593_s17  ;;  %v4696_v21 = vpop.permute.xlu0 %1913 }
 0x250   : > { %v1603_v24 = vpop.f32.mrb[20].mxu0 }
 0x251   : > { %v1604_v29 = vadd.f32 %v4510_v31, %v1603_v24  ;;  %v3402_v63 = vpop.f32.mrb[21].mxu0 }
 0x253   : > { %v1677_v5 = vmax.f32 %v1604_v29, 0.0  ;;  %2405 = vrot.lane.b32.xlu1 %v2110_v39, %s3599_s12  ;;  %2475 = vrot.lane.b32.xlu0 %v2127_v12, %s3601_s14  ;;  %v2076_v12 = vld [vmem:[#allocation3 + $0x39] sm:$0xff]  ;;  %v2131_v32 = vld [vmem:[#allocation3 + $0x44] sm:$0xff] }
 0x254   : > { %v2149_v61 = vld [vmem:[#allocation3 + $0x45] sm:$0xff] }
 0x255   : > { %v1941_v14 = vmul.f32 %v1869_v16, %v1677_v5  ;;  %v2113_v0 = vld [vmem:[#allocation3 + $0x43] sm:$0xff] }
 0x256   : > { %v2167_v5 = vld [vmem:[#allocation3 + $0x46] sm:$0xff] }
 0x257   : > { %v2010_v25 = vsel %vm1780_vm1, %v1941_v14, 0.0  ;;  %2673 = vrot.lane.b32.xlu1 %v2164_v40, %s3603_s20  ;;  %2209 = vrot.lane.b32.xlu0 %v2074_v2, %s3593_s17  ;;  %vm1736_vm1 = vcmp.ge.s32.totalorder %v1704_v58, %v4513_v17  ;;  %v2077_v16 = vld [vmem:[#allocation3 + $0x41] sm:$0xff]  ;;  %v4707_v40 = vpop.permute.xlu0 %1923 }
 0x258   : > { %2033 = vst.msk [vmem:[#allocation3 + $0x50] sm:$0xff] %vm1209_vm0, %v2010_v25  ;;  %vm1783_vm10 = vmand %vm1736_vm1, %vm1760_vm9  ;;  %v1708_v25 = vadd.s32 136, %v4505_v1 }
 0x25a   : > { %vm1764_vm2 = vcmp.lt.s32.totalorder %v1708_v25, %v4515_v7 }
 0x25b   : > { %2279 = vrot.lane.b32.xlu1 %v2091_v33, %s3594_s18  ;;  %2477 = vrot.lane.b32.xlu0 %v2128_v23, %s3601_s14  ;;  %v4676_v33 = vpop.permute.xlu1 %1888 }
 0x25f   : > { %2281 = vrot.lane.b32.xlu0 %v2092_v59, %s3594_s18  ;;  %2531 = vrot.lane.b32.xlu1 %v2129_v19, %s3600_s13  ;;  %v1899_v54 = vpop.permute.xlu1 %1898  ;;  %v2095_v59 = vld [vmem:[#allocation3 + $0x42] sm:$0xff]  ;;  %v2132_v30 = vld [vmem:[#allocation3 + $0x4c] sm:$0xff] }
 0x260   : > { %v1608_v49 = vpop.f32.mrb[22].mxu0  ;;  %v2096_v48 = vld [vmem:[#allocation3 + $0x4a] sm:$0xff] }
 0x261   : > { %v1609_v45 = vadd.f32 %v4510_v31, %v1608_v49  ;;  %v3405_v47 = vpop.f32.mrb[23].mxu0  ;;  %v2150_v34 = vld [vmem:[#allocation3 + $0x4d] sm:$0xff] }
 0x262   : > { %v2114_v55 = vld [vmem:[#allocation3 + $0x4b] sm:$0xff] }
 0x263   : > { %v1678_v8 = vmax.f32 %v1609_v45, 0.0  ;;  %2335 = vrot.lane.b32.xlu1 %v2093_v26, %s3595_s19  ;;  %2533 = vrot.lane.b32.xlu0 %v2130_v43, %s3600_s13  ;;  %v4693_v4 = vpop.permute.xlu1 %1908 }
 0x265   : > { %v1942_v9 = vmul.f32 %v1874_v22, %v1678_v8  ;;  %v2168_v8 = vld [vmem:[#allocation3 + $0x4e] sm:$0xff] }
 0x266   : > { %v2078_v22 = vld [vmem:[#allocation3 + $0x49] sm:$0xff] }
 0x267   : > { %v2011_v42 = vsel %vm1781_vm8, %v1942_v9, 0.0  ;;  %2603 = vrot.lane.b32.xlu1 %v2147_v11, %s3602_s15  ;;  %2337 = vrot.lane.b32.xlu0 %v2094_v20, %s3595_s19  ;;  %v4703_v39 = vpop.permute.xlu1 %1918  ;;  %vm1740_vm8 = vcmp.ge.s32.totalorder %v1708_v25, %v4513_v17 }
 0x268   : > { %2034 = vst.msk [vmem:[#allocation3 + $0x58] sm:$0xff] %vm1209_vm0, %v2011_v42  ;;  %vm1787_vm11 = vmand %vm1740_vm8, %vm1764_vm2 }
 0x26b   : > { %2407 = vrot.lane.b32.xlu1 %v2111_v10, %s3599_s12  ;;  %2605 = vrot.lane.b32.xlu0 %v2148_v37, %s3602_s15  ;;  %v4712_v49 = vpop.permute.xlu1 %1928 }
 0x26f   : > { %2675 = vrot.lane.b32.xlu1 %v2165_v51, %s3603_s20  ;;  %2211 = vrot.lane.b32.xlu0 %v2075_v36, %s3593_s17  ;;  %v2133_v36 = vld [vmem:[#allocation3 + $0x54] sm:$0xff] }
 0x270   : > { %v2151_v3 = vld [vmem:[#allocation3 + $0x55] sm:$0xff] }
 0x271   : > { %v2079_v58 = vld [vmem:[#allocation3 + $0x51] sm:$0xff] }
 0x273   : > { %2409 = vrot.lane.b32.xlu1 %v2112_v13, %s3599_s12  ;;  %2479 = vrot.lane.b32.xlu0 %v2129_v19, %s3601_s14 }
 0x274   : > { %v1613_v6 = vpop.f32.mrb[24].mxu0 }
 0x275   : > { %v1614_v60 = vadd.f32 %v4510_v31, %v1613_v6  ;;  %v3408_v38 = vpop.f32.mrb[25].mxu0  ;;  %v4740_v6 = vld [vmem:[#allocation3 + $0x52] sm:$0xff] }
 0x277   : > { %v1679_v53 = vmax.f32 %v1614_v60, 0.0  ;;  %2677 = vrot.lane.b32.xlu1 %v2166_v27, %s3603_s20  ;;  %2213 = vrot.lane.b32.xlu0 %v2076_v12, %s3593_s17 }
 0x279   : > { %v1943_v57 = vmul.f32 %v1879_v35, %v1679_v53 }
 0x27b   : > { %v2012_v23 = vsel %vm1782_vm12, %v1943_v57, 0.0  ;;  %2283 = vrot.lane.b32.xlu1 %v2093_v26, %s3594_s18  ;;  %2481 = vrot.lane.b32.xlu0 %v2130_v43, %s3601_s14  ;;  %vm1737_vm12 = vcmp.ge.s32.totalorder %v1705_v56, %v4513_v17 }
 0x27c   : > { %2035 = vst.msk [vmem:[#allocation3 + $0x60] sm:$0xff] %vm1209_vm0, %v2012_v23  ;;  %v1633_v44 = vpop.f32.mrb[0].mxu1  ;;  %vm1784_vm14 = vmand %vm1737_vm12, %vm1761_vm13 }
 0x27d   : > { %v1634_v50 = vadd.f32 %v4510_v31, %v1633_v44  ;;  %v3420_v62 = vpop.f32.mrb[1].mxu1 }
 0x27f   : > { %v1683_v41 = vmax.f32 %v1634_v50, 0.0  ;;  %2285 = vrot.lane.b32.xlu0 %v2094_v20, %s3594_s18  ;;  %2535 = vrot.lane.b32.xlu1 %v2131_v32, %s3600_s13  ;;  %v1709_v50 = vadd.s32 144, %v4505_v1 }
 0x281   : > { %v1947_v15 = vmul.f32 %v1899_v54, %v1683_v41  ;;  %v2115_v54 = vld [vmem:[#allocation3 + $0x53] sm:$0xff]  ;;  %vm1765_vm1 = vcmp.lt.s32.totalorder %v1709_v50, %v4515_v7 }
 0x283   : > { %v2016_v46 = vsel %vm1786_vm15, %v1947_v15, 0.0  ;;  %2339 = vrot.lane.b32.xlu1 %v2095_v59, %s3595_s19  ;;  %2537 = vrot.lane.b32.xlu0 %v2132_v30, %s3600_s13  ;;  %v4742_v60 = vld [vmem:[#allocation3 + $0x5c] sm:$0xff]  ;;  %vm1741_vm15 = vcmp.ge.s32.totalorder %v1709_v50, %v4513_v17 }
 0x284   : > { %2039 = vst.msk [vmem:[#allocation3 + $0x80] sm:$0xff] %vm1209_vm0, %v2016_v46  ;;  %v4755_v23 = vld [vmem:[#allocation3 + $0x5a] sm:$0xff]  ;;  %vm1788_vm9 = vmand %vm1741_vm15, %vm1765_vm1  ;;  %vm5331_vm15 = vcmask 261120   ;;  %vm5332_vm1 = vcmask 293888  }
 0x285   : > { %v2152_v15 = vld [vmem:[#allocation3 + $0x5d] sm:$0xff] }
 0x286   : > { %v2080_v25 = vld [vmem:[#allocation3 + $0x59] sm:$0xff] }
 0x287   : > { %2607 = vrot.lane.b32.xlu1 %v2149_v61, %s3602_s15  ;;  %2341 = vrot.lane.b32.xlu0 %v2096_v48, %s3595_s19 }
 0x28b   : > { %2411 = vrot.lane.b32.xlu1 %v2113_v0, %s3599_s12  ;;  %2609 = vrot.lane.b32.xlu0 %v2150_v34, %s3602_s15 }
 0x28c   : > { %v1618_v24 = vpop.f32.mrb[26].mxu0 }
 0x28d   : > { %v1619_v29 = vadd.f32 %v4510_v31, %v1618_v24  ;;  %v3411_v63 = vpop.f32.mrb[27].mxu0 }
 0x28e   : > { %v2116_v63 = vld [vmem:[#allocation3 + $0x5b] sm:$0xff] }
 0x28f   : > { %v1680_v14 = vmax.f32 %v1619_v29, 0.0  ;;  %2679 = vrot.lane.b32.xlu1 %v2167_v5, %s3603_s20  ;;  %2215 = vrot.lane.b32.xlu0 %v2077_v16, %s3593_s17  ;;  %v1706_v5 = vadd.s32 120, %v4505_v1 }
 0x291   : > { %v1944_v2 = vmul.f32 %v1884_v28, %v1680_v14  ;;  %vm1762_vm8 = vcmp.lt.s32.totalorder %v1706_v5, %v4515_v7 }
 0x293   : > { %v2013_v19 = vsel %vm1783_vm10, %v1944_v2, 0.0  ;;  %2413 = vrot.lane.b32.xlu1 %v2114_v55, %s3599_s12  ;;  %2483 = vrot.lane.b32.xlu0 %v2131_v32, %s3601_s14  ;;  %v2170_v2 = vld [vmem:[#allocation3 + $0x5e] sm:$0xff]  ;;  %v1710_v55 = vadd.s32 152, %v4505_v1  ;;  %vm1738_vm10 = vcmp.ge.s32.totalorder %v1706_v5, %v4513_v17 }
 0x294   : > { %2036 = vst.msk [vmem:[#allocation3 + $0x68] sm:$0xff] %vm1209_vm0, %v2013_v19  ;;  %v1638_v45 = vpop.f32.mrb[2].mxu1  ;;  %vm4799_vm2 = vmand %vm1738_vm10, %vm1762_vm8 }
 0x295   : > { %v1639_v47 = vadd.f32 %v4510_v31, %v1638_v45  ;;  %v3423_v26 = vpop.f32.mrb[3].mxu1  ;;  %v4718_v43 = vpop.permute.xlu0 %2199  ;;  %vm1766_vm12 = vcmp.lt.s32.totalorder %v1710_v55, %v4515_v7 }
 0x297   : > { %v1684_v9 = vmax.f32 %v1639_v47, 0.0  ;;  %2681 = vrot.lane.b32.xlu1 %v2168_v8, %s3603_s20  ;;  %2217 = vrot.lane.b32.xlu0 %v2078_v22, %s3593_s17  ;;  %v2051_v8 = vld [vmem:[#allocation3] sm:$0xff] }
 0x299   : > { %v1948_v11 = vmul.f32 %v1904_v52, %v1684_v9  ;;  %v4722_v20 = vpop.permute.xlu0 %2271  ;;  %v4724_v42 = vpop.permute.xlu1 %2201  ;;  %v2725_v9 = vsel %vm1209_vm0, %v2051_v8, %v4718_v43 }
 0x29b   : > { %v2017_v10 = vsel %vm1787_vm11, %v1948_v11, 0.0  ;;  %2287 = vrot.lane.b32.xlu1 %v2095_v59, %s3594_s18  ;;  %2485 = vrot.lane.b32.xlu0 %v2132_v30, %s3601_s14  ;;  %vm1742_vm11 = vcmp.ge.s32.totalorder %v1710_v55, %v4513_v17  ;;  %v2117_v55 = vld [vmem:[#allocation3 + $0x63] sm:$0xff]  ;;  %v1712_v11 = vadd.s32 168, %v4505_v1 }
 0x29c   : > { %2040 = vst.msk [vmem:[#allocation3 + $0x88] sm:$0xff] %vm1209_vm0, %v2017_v10  ;;  %vm1789_vm13 = vmand %vm1742_vm11, %vm1766_vm12 }
 0x29d   : > { %v4729_v37 = vpop.permute.xlu1 %2273  ;;  %v4731_v51 = vpop.permute.xlu0 %2327  ;;  %vm5335_vm12 = vmmov %vm5332_vm1 }
 0x29f   : > { %2289 = vrot.lane.b32.xlu0 %v2096_v48, %s3594_s18  ;;  %2539 = vrot.lane.b32.xlu1 %v2133_v36, %s3600_s13  ;;  %v2169_v48 = vld [vmem:[#allocation3 + $0x56] sm:$0xff] }
 0x2a1   : > { %v4736_v13 = vpop.permute.xlu0 %2399  ;;  %v4738_v35 = vpop.permute.xlu1 %2329 }
 0x2a3   : > { %2343 = vrot.lane.b32.xlu1 %v4740_v6, %s3595_s19  ;;  %2541 = vrot.lane.b32.xlu0 %v4742_v60, %s3600_s13  ;;  %v1623_v38 = vpop.f32.mrb[28].mxu0 }
 0x2a4   : > { %v1624_v27 = vadd.f32 %v4510_v31, %v1623_v38  ;;  %v3414_v12 = vpop.f32.mrb[29].mxu0 }
 0x2a5   : > { %v4751_v53 = vpop.permute.xlu0 %2401  ;;  %v4753_v28 = vpop.permute.xlu1 %2203 }
 0x2a6   : > { %v1681_v57 = vmax.f32 %v1624_v27, 0.0 }
 0x2a7   : > { %2611 = vrot.lane.b32.xlu1 %v2151_v3, %s3602_s15  ;;  %2345 = vrot.lane.b32.xlu0 %v4755_v23, %s3595_s19  ;;  %v4821_v3 = vld [vmem:[#allocation3 + $0x64] sm:$0xff] }
 0x2a8   : > { %v1945_v44 = vmul.f32 %v4676_v33, %v1681_v57 }
 0x2a9   : > { %v4762_v62 = vpop.permute.xlu1 %2471  ;;  %v4764_v32 = vpop.permute.xlu0 %2205 }
 0x2aa   : > { %v2014_v41 = vsel %vm1784_vm14, %v1945_v44, 0.0  ;;  %vm5330_vm14 = vcmask 228352  }
 0x2ab   : > { %2037 = vst.msk [vmem:[#allocation3 + $0x70] sm:$0xff] %vm1209_vm0, %v2014_v41  ;;  %v1643_v59 = vpop.f32.mrb[4].mxu1  ;;  %2415 = vrot.lane.b32.xlu1 %v2115_v54, %s3599_s12  ;;  %2613 = vrot.lane.b32.xlu0 %v2152_v15, %s3602_s15  ;;  %vm5333_vm8 = vmmov %vm5330_vm14 }
 0x2ac   : > { %v1644_v30 = vadd.f32 %v4510_v31, %v1643_v59  ;;  %v3426_v33 = vpop.f32.mrb[5].mxu1  ;;  %v4838_v59 = vld [vmem:[#allocation3 + $0x62] sm:$0xff] }
 0x2ad   : > { %v4772_v46 = vpop.permute.xlu1 %2275  ;;  %v4774_v52 = vpop.permute.xlu0 %2473  ;;  %v1711_v33 = vadd.s32 160, %v4505_v1 }
 0x2ae   : > { %v1685_v61 = vmax.f32 %v1644_v30, 0.0 }
 0x2af   : > { %2683 = vrot.lane.b32.xlu1 %v2169_v48, %s3603_s20  ;;  %2219 = vrot.lane.b32.xlu0 %v2079_v58, %s3593_s17  ;;  %vm1767_vm10 = vcmp.lt.s32.totalorder %v1711_v33, %v4515_v7 }
 0x2b0   : > { %v1949_v0 = vmul.f32 %v4693_v4, %v1685_v61 }
 0x2b1   : > { %v4779_v34 = vpop.permute.xlu0 %2277  ;;  %v2528_v24 = vpop.permute.xlu1 %2527 }
 0x2b2   : > { %v2018_v29 = vsel %vm1788_vm9, %v1949_v0, 0.0  ;;  %v2153_v0 = vld [vmem:[#allocation3 + $0x65] sm:$0xff]  ;;  %vm1743_vm9 = vcmp.ge.s32.totalorder %v1711_v33, %v4513_v17 }
 0x2b3   : > { %2041 = vst.msk [vmem:[#allocation3 + $0x90] sm:$0xff] %vm1209_vm0, %v2018_v29  ;;  %2417 = vrot.lane.b32.xlu1 %v2116_v63, %s3599_s12  ;;  %2487 = vrot.lane.b32.xlu0 %v2133_v36, %s3601_s14  ;;  %v2743_v36 = vsel %vm1233_vm3, %v2725_v9, %v4722_v20  ;;  %v4864_v29 = vld [vmem:[#allocation3 + $0x6a] sm:$0xff]  ;;  %vm1790_vm11 = vmand %vm1743_vm9, %vm1767_vm10  ;;  %v2081_v9 = vld [vmem:[#allocation3 + $0x61] sm:$0xff] }
 0x2b4   : > { %v2761_v27 = vsel %vm1257_vm4, %v2743_v36, %v4731_v51  ;;  %v2118_v36 = vld [vmem:[#allocation3 + $0x6b] sm:$0xff] }
 0x2b5   : > { %v4785_v16 = vpop.permute.xlu1 %2331  ;;  %v4787_v14 = vpop.permute.xlu0 %2529 }
 0x2b7   : > { %2685 = vrot.lane.b32.xlu1 %v2170_v2, %s3603_s20  ;;  %2221 = vrot.lane.b32.xlu0 %v2080_v25, %s3593_s17  ;;  %v1628_v4 = vpop.f32.mrb[30].mxu0 }
 0x2b8   : > { %v1629_v19 = vadd.f32 %v4510_v31, %v1628_v4  ;;  %v3417_v45 = vpop.f32.mrb[31].mxu0 }
 0x2b9   : > { %v2600_v47 = vpop.permute.xlu1 %2599  ;;  %v4795_v26 = vpop.permute.xlu0 %2333 }
 0x2ba   : > { %v1682_v22 = vmax.f32 %v1629_v19, 0.0 }
 0x2bb   : > { %v1648_v10 = vpop.f32.mrb[6].mxu1  ;;  %2291 = vrot.lane.b32.xlu1 %v4740_v6, %s3594_s18  ;;  %2489 = vrot.lane.b32.xlu0 %v4742_v60, %s3601_s14  ;;  %v2779_v6 = vsel %vm1281_vm5, %v2761_v27, %v4736_v13 }
 0x2bc   : > { %v1946_v56 = vmul.f32 %v4684_v18, %v1682_v22  ;;  %v1649_v43 = vadd.f32 %v4510_v31, %v1648_v10  ;;  %v3429_v38 = vpop.f32.mrb[7].mxu1  ;;  %v2797_v18 = vsel %vm1305_vm6, %v2779_v6, %v4762_v62  ;;  %v2052_v62 = vld [vmem:[#allocation3 + $0x8] sm:$0xff] }
 0x2bd   : > { %v4815_v12 = vpop.permute.xlu1 %2403  ;;  %v2602_v57 = vpop.permute.xlu0 %2601  ;;  %v2815_v51 = vsel %vm1329_vm7, %v2797_v18, %v2528_v24  ;;  %v2171_v22 = vld [vmem:[#allocation3 + $0x66] sm:$0xff] }
 0x2be   : > { %v2015_v60 = vsel %vm4799_vm2, %v1946_v56, 0.0  ;;  %v1686_v20 = vmax.f32 %v1649_v43, 0.0  ;;  %v2833_v44 = vsel %vm5330_vm14, %v2815_v51, %v2600_v47  ;;  %vm5334_vm2 = vmmov %vm5331_vm15  ;;  %vm1768_vm14 = vcmp.lt.s32.totalorder %v1712_v11, %v4515_v7 }
 0x2bf   : > { %2038 = vst.msk [vmem:[#allocation3 + $0x78] sm:$0xff] %vm1209_vm0, %v2015_v60  ;;  %2293 = vrot.lane.b32.xlu0 %v4755_v23, %s3594_s18  ;;  %2543 = vrot.lane.b32.xlu1 %v4821_v3, %s3600_s13  ;;  %v2726_v23 = vsel %vm1209_vm0, %v2052_v62, %v4724_v42  ;;  %v2172_v60 = vld [vmem:[#allocation3 + $0x6e] sm:$0xff] }
 0x2c0   : > { %v1950_v13 = vmul.f32 %v4696_v21, %v1686_v20  ;;  %v4846_v21 = vld [vmem:[#allocation3 + $0x6c] sm:$0xff]  ;;  %v2744_v30 = vsel %vm1233_vm3, %v2726_v23, %v4729_v37 }
 0x2c1   : > { %v2672_v50 = vpop.permute.xlu1 %2671  ;;  %v4835_v41 = vpop.permute.xlu0 %2207  ;;  %v2762_v42 = vsel %vm1257_vm4, %v2744_v30, %v4738_v35  ;;  %v2082_v20 = vld [vmem:[#allocation3 + $0x69] sm:$0xff] }
 0x2c2   : > { %v2019_v54 = vsel %vm1789_vm13, %v1950_v13, 0.0  ;;  %v2851_v15 = vsel %vm5331_vm15, %v2833_v44, %v2672_v50  ;;  %v2780_v58 = vsel %vm1281_vm5, %v2762_v42, %v4751_v53  ;;  %vm1744_vm13 = vcmp.ge.s32.totalorder %v1712_v11, %v4513_v17  ;;  %v2054_v42 = vld [vmem:[#allocation3 + $0x18] sm:$0xff] }
 0x2c3   : > { %2042 = vst.msk [vmem:[#allocation3 + $0x98] sm:$0xff] %vm1209_vm0, %v2019_v54  ;;  %3449 = vmatprep.mubr.msk.f32.mxu1 %vm5332_vm1, %v2851_v15  ;;  %2347 = vrot.lane.b32.xlu1 %v4838_v59, %s3595_s19  ;;  %v2798_v24 = vsel %vm1305_vm6, %v2780_v58, %v4774_v52  ;;  %vm1791_vm15 = vmand %vm1744_vm13, %vm1768_vm14  ;;  %v1713_v44 = vadd.s32 176, %v4505_v1 }
 0x2c4   : > { %2545 = vrot.lane.b32.xlu0 %v4846_v21, %s3600_s13  ;;  %v2816_v63 = vsel %vm1329_vm7, %v2798_v24, %v4787_v14  ;;  %v2154_v14 = vld [vmem:[#allocation3 + $0x6d] sm:$0xff]  ;;  %v2728_v24 = vsel %vm1209_vm0, %v2054_v42, %v4764_v32  ;;  %vm5339_vm13 = vmmov %vm5333_vm8 }
 0x2c5   : > { %v4855_v61 = vpop.permute.xlu1 %2405  ;;  %v4857_v48 = vpop.permute.xlu0 %2475  ;;  %v2834_v52 = vsel %vm5333_vm8, %v2816_v63, %v2602_v57  ;;  %vm1745_vm1 = vcmp.ge.s32.totalorder %v1713_v44, %v4513_v17  ;;  %vm1769_vm9 = vcmp.lt.s32.totalorder %v1713_v44, %v4515_v7 }
 0x2c6   : > { %v2137_v30 = vld [vmem:[#allocation3 + $0x74] sm:$0xff]  ;;  %vm4927_vm10 = vmand %vm1745_vm1, %vm1769_vm9 }
 0x2c7   : > { %v1653_v37 = vpop.f32.mrb[8].mxu1  ;;  %2615 = vrot.lane.b32.xlu1 %v2153_v0, %s3602_s15  ;;  %v2101_v0 = vld [vmem:[#allocation3 + $0x72] sm:$0xff]  ;;  %vm5342_vm1 = vmmov %vm5333_vm8 }
 0x2c8   : > { %v1654_v35 = vadd.f32 %v4510_v31, %v1653_v37  ;;  %2349 = vrot.lane.b32.xlu0 %v4864_v29, %s3595_s19  ;;  %v3432_v53 = vpop.f32.mrb[9].mxu1 }
 0x2c9   : > { %v2674_v5 = vpop.permute.xlu1 %2673  ;;  %v4874_v2 = vpop.permute.xlu0 %2209 }
 0x2ca   : > { %v1687_v25 = vmax.f32 %v1654_v35, 0.0  ;;  %v2852_v4 = vsel %vm5334_vm2, %v2834_v52, %v2674_v5  ;;  %vm2045_vm2 = vcmask 27648   ;;  %v2155_v52 = vld [vmem:[#allocation3 + $0x75] sm:$0xff] }
 0x2cb   : > { %3450 = vmatmul.mubr.msk.f32.vlgmr.msra.gmra.mrb[14].mxu1 %vm5335_vm12, %v2852_v4  ;;  %2419 = vrot.lane.b32.xlu1 %v2117_v55, %s3599_s12 }
 0x2cc   : > { %v1951_v19 = vmul.f32 %v4703_v39, %v1687_v25  ;;  %2617 = vrot.lane.b32.xlu0 %v2154_v14, %s3602_s15  ;;  %v2102_v25 = vld [vmem:[#allocation3 + $0x7a] sm:$0xff] }
 0x2cd   : > { %v4881_v45 = vpop.permute.xlu1 %2279  ;;  %v4883_v47 = vpop.permute.xlu0 %2477 }
 0x2ce   : > { %v2020_v8 = vsel %vm1790_vm11, %v1951_v19, 0.0  ;;  %vm5338_vm11 = vcmask 261120   ;;  %v2156_v19 = vld [vmem:[#allocation3 + $0x7d] sm:$0xff] }
 0x2cf   : > { %2043 = vst.msk [vmem:[#allocation3 + $0xa0] sm:$0xff] %vm1209_vm0, %v2020_v8  ;;  %2687 = vrot.lane.b32.xlu1 %v2171_v22, %s3603_s20  ;;  %vm5340_vm14 = vmmov %vm5338_vm11  ;;  %v2173_v22 = vld [vmem:[#allocation3 + $0x76] sm:$0xff] }
 0x2d0   : > { %2223 = vrot.lane.b32.xlu0 %v2081_v9, %s3593_s17  ;;  %v2083_v9 = vld [vmem:[#allocation3 + $0x71] sm:$0xff]  ;;  %vm5343_vm9 = vmmov %vm5338_vm11 }
 0x2d1   : > { %v4889_v10 = vpop.permute.xlu0 %2281  ;;  %v2532_v39 = vpop.permute.xlu1 %2531 }
 0x2d3   : > { %v1658_v56 = vpop.f32.mrb[10].mxu1  ;;  %2421 = vrot.lane.b32.xlu1 %v2118_v36, %s3599_s12  ;;  %v2120_v36 = vld [vmem:[#allocation3 + $0x7b] sm:$0xff] }
 0x2d4   : > { %v1659_v43 = vadd.f32 %v4510_v31, %v1658_v56  ;;  %2491 = vrot.lane.b32.xlu0 %v4821_v3, %s3601_s14  ;;  %v3435_v38 = vpop.f32.mrb[11].mxu1  ;;  %v2053_v3 = vld [vmem:[#allocation3 + $0x10] sm:$0xff] }
 0x2d5   : > { %v4897_v27 = vpop.permute.xlu1 %2335  ;;  %v2534_v57 = vpop.permute.xlu0 %2533  ;;  %v2727_v62 = vsel %vm1209_vm0, %v2053_v3, %v4753_v28  ;;  %v2174_v38 = vld [vmem:[#allocation3 + $0x7e] sm:$0xff] }
 0x2d6   : > { %v1688_v6 = vmax.f32 %v1659_v43, 0.0 }
 0x2d7   : > { %2689 = vrot.lane.b32.xlu1 %v2172_v60, %s3603_s20  ;;  %v2055_v60 = vld [vmem:[#allocation3 + $0x20] sm:$0xff] }
 0x2d8   : > { %v1952_v18 = vmul.f32 %v4707_v40, %v1688_v6  ;;  %2225 = vrot.lane.b32.xlu0 %v2082_v20, %s3593_s17  ;;  %v2745_v40 = vsel %vm1233_vm3, %v2727_v62, %v4772_v46 }
 0x2d9   : > { %v2604_v51 = vpop.permute.xlu1 %2603  ;;  %v4902_v13 = vpop.permute.xlu0 %2337  ;;  %v2763_v1 = vsel %vm1257_vm4, %v2745_v40, %v4785_v16  ;;  %v2139_v40 = vld [vmem:[#allocation3 + $0x84] sm:$0xff] }
 0x2da   : > { %v2021_v50 = vsel %vm1791_vm15, %v1952_v18, 0.0  ;;  %vm5341_vm15 = vmmov %vm5335_vm12  ;;  %v2729_v18 = vsel %vm1209_vm0, %v2055_v60, %v4835_v41  ;;  %v2105_v60 = vld [vmem:[#allocation3 + $0x92] sm:$0xff] }
 0x2db   : > { %2044 = vst.msk [vmem:[#allocation3 + $0xa8] sm:$0xff] %vm1209_vm0, %v2021_v50  ;;  %2295 = vrot.lane.b32.xlu1 %v4838_v59, %s3594_s18  ;;  %v2781_v59 = vsel %vm1281_vm5, %v2763_v1, %v4815_v12 }
 0x2dc   : > { %2493 = vrot.lane.b32.xlu0 %v4846_v21, %s3601_s14  ;;  %v1663_v54 = vpop.f32.mrb[12].mxu1  ;;  %v2799_v21 = vsel %vm1305_vm6, %v2781_v59, %v4857_v48  ;;  %v2103_v59 = vld [vmem:[#allocation3 + $0x82] sm:$0xff] }
 0x2dd   : > { %v1664_v15 = vadd.f32 %v4510_v31, %v1663_v54  ;;  %v3438_v28 = vpop.f32.mrb[13].mxu1  ;;  %v4919_v23 = vpop.permute.xlu1 %2407  ;;  %v2817_v31 = vsel %vm1329_vm7, %v2799_v21, %v2532_v39 }
 0x2de   : > { %v2606_v46 = vpop.permute.xlu0 %2605  ;;  %v2835_v7 = vsel %vm5333_vm8, %v2817_v31, %v2604_v51  ;;  %v2747_v51 = vsel %vm1233_vm3, %v2729_v18, %v4881_v45  ;;  %vm5345_vm8 = vmmov %vm5342_vm1 }
 0x2df   : > { %v1689_v33 = vmax.f32 %v1664_v15, 0.0  ;;  %2547 = vrot.lane.b32.xlu1 %v2137_v30, %s3600_s13  ;;  %v2765_v44 = vsel %vm1257_vm4, %v2747_v51, %v4897_v27  ;;  %v2056_v15 = vld [vmem:[#allocation3 + $0x28] sm:$0xff]  ;;  %v2142_v51 = vld [vmem:[#allocation3 + $0x9c] sm:$0xff] }
 0x2e0   : > { %2297 = vrot.lane.b32.xlu0 %v4864_v29, %s3594_s18  ;;  %v2138_v29 = vld [vmem:[#allocation3 + $0x7c] sm:$0xff]  ;;  %v2783_v50 = vsel %vm1281_vm5, %v2765_v44, %v4919_v23  ;;  %v2730_v23 = vsel %vm1209_vm0, %v2056_v15, %v4874_v2  ;;  %v2157_v2 = vld [vmem:[#allocation3 + $0x85] sm:$0xff] }
 0x2e1   : > { %v1953_v16 = vmul.f32 %v4712_v49, %v1689_v33  ;;  %v2676_v12 = vpop.permute.xlu1 %2675  ;;  %v2746_v49 = vsel %vm1233_vm3, %v2728_v24, %v4779_v34  ;;  %v2158_v24 = vld [vmem:[#allocation3 + $0x8d] sm:$0xff] }
 0x2e2   : > { %v2853_v48 = vsel %vm5338_vm11, %v2835_v7, %v2676_v12  ;;  %v4936_v58 = vpop.permute.xlu0 %2211  ;;  %v2764_v63 = vsel %vm1257_vm4, %v2746_v49, %v4795_v26  ;;  %v2175_v49 = vld [vmem:[#allocation3 + $0x86] sm:$0xff] }
 0x2e3   : > { %v2022_v37 = vsel %vm4927_vm10, %v1953_v16, 0.0  ;;  %3452 = vmatprep.mubr.msk.f32.mxu1 %vm5335_vm12, %v2853_v48  ;;  %2351 = vrot.lane.b32.xlu1 %v2101_v0, %s3595_s19  ;;  %v2782_v32 = vsel %vm1281_vm5, %v2764_v63, %v4855_v61  ;;  %v2119_v61 = vld [vmem:[#allocation3 + $0x73] sm:$0xff]  ;;  %vm5344_vm10 = vmmov %vm5335_vm12  ;;  %v2104_v16 = vld [vmem:[#allocation3 + $0x8a] sm:$0xff] }
 0x2e4   : > { %2046 = vst.msk [vmem:[#allocation3 + $0xb0] sm:$0xf] %vm2045_vm2, %v2022_v37  ;;  %2549 = vrot.lane.b32.xlu0 %v2138_v29, %s3600_s13  ;;  %v2800_v5 = vsel %vm1305_vm6, %v2782_v32, %v4883_v47  ;;  %vm5346_vm2 = vmmov %vm5343_vm9  ;;  %v2085_v63 = vld [vmem:[#allocation3 + $0x81] sm:$0xff] }
 0x2e5   : > { %v4949_v35 = vpop.permute.xlu1 %2409  ;;  %v2818_v34 = vsel %vm1329_vm7, %v2800_v5, %v2534_v57  ;;  %v2084_v57 = vld [vmem:[#allocation3 + $0x79] sm:$0xff]  ;;  %vm5347_vm11 = vmmov %vm5344_vm10 }
 0x2e6   : > { %v2480_v53 = vpop.permute.xlu0 %2479  ;;  %v2836_v4 = vsel %vm5339_vm13, %v2818_v34, %v2606_v46  ;;  %v2140_v46 = vld [vmem:[#allocation3 + $0x8c] sm:$0xff]  ;;  %vm5348_vm12 = vmmov %vm5342_vm1 }
 0x2e7   : > { %2619 = vrot.lane.b32.xlu1 %v2155_v52, %s3602_s15  ;;  %v2801_v54 = vsel %vm1305_vm6, %v2783_v50, %v2480_v53  ;;  %v2122_v53 = vld [vmem:[#allocation3 + $0x8b] sm:$0xff]  ;;  %vm5349_vm13 = vmmov %vm5346_vm2 }
 0x2e8   : > { %2353 = vrot.lane.b32.xlu0 %v2102_v25, %s3595_s19  ;;  %v2086_v34 = vld [vmem:[#allocation3 + $0x89] sm:$0xff] }
 0x2e9   : > { %v2678_v26 = vpop.permute.xlu1 %2677 }
 0x2ea   : > { %v2854_v55 = vsel %vm5340_vm14, %v2836_v4, %v2678_v26  ;;  %v4960_v14 = vpop.permute.xlu0 %2213  ;;  %v2057_v26 = vld [vmem:[#allocation3 + $0x30] sm:$0xff]  ;;  %vm5350_vm14 = vmmov %vm5344_vm10 }
 0x2eb   : > { %3453 = vmatmul.mubr.msk.f32.gmra.mrb[16].mxu1 %vm5341_vm15, %v2854_v55  ;;  %2423 = vrot.lane.b32.xlu1 %v2119_v61, %s3599_s12  ;;  %v2731_v61 = vsel %vm1209_vm0, %v2057_v26, %v4936_v58  ;;  %vm5351_vm15 = vmmov %vm5342_vm1  ;;  %v2060_v26 = vld [vmem:[#allocation3 + $0x48] sm:$0xff] }
 0x2ec   : > { %2621 = vrot.lane.b32.xlu0 %v2156_v19, %s3602_s15 }
 0x2ed   : > { %v4965_v47 = vpop.permute.xlu1 %2283 }
 0x2ee   : > { %v2482_v8 = vpop.permute.xlu0 %2481  ;;  %v2749_v19 = vsel %vm1233_vm3, %v2731_v61, %v4965_v47 }
 0x2ef   : > { %2691 = vrot.lane.b32.xlu1 %v2173_v22, %s3603_s20 }
 0x2f0   : > { %2227 = vrot.lane.b32.xlu0 %v2083_v9, %s3593_s17 }
 0x2f1   : > { %v2536_v11 = vpop.permute.xlu1 %2535 }
 0x2f2   : > { %v4969_v39 = vpop.permute.xlu0 %2285  ;;  %v2819_v41 = vsel %vm1329_vm7, %v2801_v54, %v2536_v11 }
 0x2f3   : > { %2425 = vrot.lane.b32.xlu1 %v2120_v36, %s3599_s12  ;;  %v2141_v36 = vld [vmem:[#allocation3 + $0x94] sm:$0xff] }
 0x2f4   : > { %2495 = vrot.lane.b32.xlu0 %v2137_v30, %s3601_s14  ;;  %v2748_v30 = vsel %vm1233_vm3, %v2730_v23, %v4889_v10 }
 0x2f5   : > { %v4973_v56 = vpop.permute.xlu1 %2339  ;;  %v2766_v21 = vsel %vm1257_vm4, %v2748_v30, %v4902_v13  ;;  %v2177_v30 = vld [vmem:[#allocation3 + $0x96] sm:$0xff] }
 0x2f6   : > { %v2538_v43 = vpop.permute.xlu0 %2537  ;;  %v2784_v31 = vsel %vm1281_vm5, %v2766_v21, %v4949_v35  ;;  %v2124_v21 = vld [vmem:[#allocation3 + $0x9b] sm:$0xff] }
 0x2f7   : > { %2693 = vrot.lane.b32.xlu1 %v2174_v38, %s3603_s20  ;;  %v2802_v7 = vsel %vm1305_vm6, %v2784_v31, %v2482_v8  ;;  %v2767_v8 = vsel %vm1257_vm4, %v2749_v19, %v4973_v56  ;;  %v2180_v19 = vld [vmem:[#allocation3 + $0xae] sm:$0xff] }
 0x2f8   : > { %2229 = vrot.lane.b32.xlu0 %v2084_v57, %s3593_s17  ;;  %v2820_v12 = vsel %vm1329_vm7, %v2802_v7, %v2538_v43  ;;  %v2058_v57 = vld [vmem:[#allocation3 + $0x38] sm:$0xff] }
 0x2f9   : > { %v2608_v6 = vpop.permute.xlu1 %2607  ;;  %v2732_v18 = vsel %vm1209_vm0, %v2058_v57, %v4960_v14  ;;  %v2159_v14 = vld [vmem:[#allocation3 + $0x95] sm:$0xff] }
 0x2fa   : > { %v4977_v20 = vpop.permute.xlu0 %2341  ;;  %v2837_v45 = vsel %vm5342_vm1, %v2819_v41, %v2608_v6  ;;  %v2750_v44 = vsel %vm1233_vm3, %v2732_v18, %v4969_v39  ;;  %v2106_v41 = vld [vmem:[#allocation3 + $0x9a] sm:$0xff]  ;;  %vm5352_vm1 = vmmov %vm5346_vm2 }
 0x2fb   : > { %2299 = vrot.lane.b32.xlu1 %v2101_v0, %s3594_s18  ;;  %v2121_v0 = vld [vmem:[#allocation3 + $0x83] sm:$0xff] }
 0x2fc   : > { %2497 = vrot.lane.b32.xlu0 %v2138_v29, %s3601_s14 }
 0x2fd   : > { %v4987_v3 = vpop.permute.xlu1 %2411 }
 0x2fe   : > { %v2610_v62 = vpop.permute.xlu0 %2609  ;;  %v2785_v9 = vsel %vm1281_vm5, %v2767_v8, %v4987_v3  ;;  %v2768_v3 = vsel %vm1257_vm4, %v2750_v44, %v4977_v20 }
 0x2ff   : > { %2551 = vrot.lane.b32.xlu1 %v2139_v40, %s3600_s13  ;;  %v2838_v10 = vsel %vm5345_vm8, %v2820_v12, %v2610_v62 }
 0x300   : > { %2301 = vrot.lane.b32.xlu0 %v2102_v25, %s3594_s18  ;;  %v2176_v25 = vld [vmem:[#allocation3 + $0x8e] sm:$0xff] }
 0x301   : > { %v2680_v1 = vpop.permute.xlu1 %2679 }
 0x302   : > { %v2855_v27 = vsel %vm5343_vm9, %v2837_v45, %v2680_v1  ;;  %v4997_v28 = vpop.permute.xlu0 %2215  ;;  %vm5353_vm9 = vmmov %vm5344_vm10 }
 0x303   : > { %3455 = vmatprep.mubr.msk.f32.mxu1 %vm5344_vm10, %v2855_v27  ;;  %2355 = vrot.lane.b32.xlu1 %v2103_v59, %s3595_s19  ;;  %v2123_v27 = vld [vmem:[#allocation3 + $0x93] sm:$0xff]  ;;  %vm5354_vm10 = vmmov %vm5345_vm8 }
 0x304   : > { %2553 = vrot.lane.b32.xlu0 %v2140_v46, %s3600_s13  ;;  %vm5355_vm8 = vmmov %vm5352_vm1 }
 0x305   : > { %v5008_v33 = vpop.permute.xlu1 %2413 }
 0x306   : > { %v2484_v17 = vpop.permute.xlu0 %2483  ;;  %v2786_v62 = vsel %vm1281_vm5, %v2768_v3, %v5008_v33 }
 0x307   : > { %2623 = vrot.lane.b32.xlu1 %v2157_v2, %s3602_s15  ;;  %v2803_v43 = vsel %vm1305_vm6, %v2785_v9, %v2484_v17  ;;  %v2178_v17 = vld [vmem:[#allocation3 + $0x9e] sm:$0xff] }
 0x308   : > { %2357 = vrot.lane.b32.xlu0 %v2104_v16, %s3595_s19 }
 0x309   : > { %v2682_v42 = vpop.permute.xlu1 %2681 }
 0x30a   : > { %v2856_v13 = vsel %vm5346_vm2, %v2838_v10, %v2682_v42  ;;  %v5018_v48 = vpop.permute.xlu0 %2217  ;;  %v2059_v10 = vld [vmem:[#allocation3 + $0x40] sm:$0xff]  ;;  %vm5356_vm2 = vmmov %vm5353_vm9 }
 0x30b   : > { %3456 = vmatmul.mubr.msk.f32.gmra.mrb[18].mxu1 %vm5347_vm11, %v2856_v13  ;;  %2427 = vrot.lane.b32.xlu1 %v2121_v0, %s3599_s12  ;;  %v2144_v13 = vld [vmem:[#allocation3 + $0xac] sm:$0xff]  ;;  %v2733_v0 = vsel %vm1209_vm0, %v2059_v10, %v4997_v28  ;;  %v2734_v8 = vsel %vm1209_vm0, %v2060_v26, %v5018_v48  ;;  %vm5357_vm11 = vmmov %vm5354_vm10 }
 0x30c   : > { %2625 = vrot.lane.b32.xlu0 %v2158_v24, %s3602_s15  ;;  %v2161_v24 = vld [vmem:[#allocation3 + $0xa5] sm:$0xff] }
 0x30d   : > { %v5023_v37 = vpop.permute.xlu1 %2287  ;;  %v2179_v28 = vld [vmem:[#allocation3 + $0xa6] sm:$0xff] }
 0x30e   : > { %v2486_v29 = vpop.permute.xlu0 %2485 }
 0x30f   : > { %2695 = vrot.lane.b32.xlu1 %v2175_v49, %s3603_s20  ;;  %v2804_v54 = vsel %vm1305_vm6, %v2786_v62, %v2486_v29  ;;  %v2751_v29 = vsel %vm1233_vm3, %v2733_v0, %v5023_v37 }
 0x310   : > { %2231 = vrot.lane.b32.xlu0 %v2085_v63, %s3593_s17 }
 0x311   : > { %v2540_v35 = vpop.permute.xlu1 %2539 }
 0x312   : > { %v5027_v32 = vpop.permute.xlu0 %2289  ;;  %v2821_v58 = vsel %vm1329_vm7, %v2803_v43, %v2540_v35 }
 0x313   : > { %2429 = vrot.lane.b32.xlu1 %v2122_v53, %s3599_s12 }
 0x314   : > { %2499 = vrot.lane.b32.xlu0 %v2139_v40, %s3601_s14 }
 0x315   : > { %v5031_v52 = vpop.permute.xlu1 %2343 }
 0x316   : > { %v2542_v5 = vpop.permute.xlu0 %2541  ;;  %v2769_v49 = vsel %vm1257_vm4, %v2751_v29, %v5031_v52 }
 0x317   : > { %2697 = vrot.lane.b32.xlu1 %v2176_v25, %s3603_s20  ;;  %v2822_v45 = vsel %vm1329_vm7, %v2804_v54, %v2542_v5  ;;  %v2162_v5 = vld [vmem:[#allocation3 + $0xad] sm:$0xff] }
 0x318   : > { %2233 = vrot.lane.b32.xlu0 %v2086_v34, %s3593_s17 }
 0x319   : > { %v2612_v4 = vpop.permute.xlu1 %2611 }
 0x31a   : > { %v5035_v55 = vpop.permute.xlu0 %2345  ;;  %v2839_v47 = vsel %vm5348_vm12, %v2821_v58, %v2612_v4  ;;  %vm5358_vm12 = vmmov %vm5352_vm1 }
 0x31b   : > { %2303 = vrot.lane.b32.xlu1 %v2103_v59, %s3594_s18  ;;  %v2160_v59 = vld [vmem:[#allocation3 + $0x9d] sm:$0xff] }
 0x31c   : > { %2501 = vrot.lane.b32.xlu0 %v2140_v46, %s3601_s14 }
 0x31d   : > { %v5045_v22 = vpop.permute.xlu1 %2415 }
 0x31e   : > { %v2614_v11 = vpop.permute.xlu0 %2613  ;;  %v2787_v35 = vsel %vm1281_vm5, %v2769_v49, %v5045_v22  ;;  %v2752_v22 = vsel %vm1233_vm3, %v2734_v8, %v5027_v32 }
 0x31f   : > { %2555 = vrot.lane.b32.xlu1 %v2141_v36, %s3600_s13  ;;  %v2840_v39 = vsel %vm5351_vm15, %v2822_v45, %v2614_v11  ;;  %v2770_v9 = vsel %vm1257_vm4, %v2752_v22, %v5035_v55  ;;  %vm5361_vm15 = vmmov %vm5352_vm1 }
 0x320   : > { %2305 = vrot.lane.b32.xlu0 %v2104_v16, %s3594_s18  ;;  %v2143_v16 = vld [vmem:[#allocation3 + $0xa4] sm:$0xff] }
 0x321   : > { %v2684_v38 = vpop.permute.xlu1 %2683 }
 0x322   : > { %v2857_v56 = vsel %vm5349_vm13, %v2839_v47, %v2684_v38  ;;  %v5055_v6 = vpop.permute.xlu0 %2219  ;;  %vm5359_vm13 = vmmov %vm5356_vm2 }
 0x323   : > { %3458 = vmatprep.mubr.msk.f32.mxu1 %vm5350_vm14, %v2857_v56  ;;  %2359 = vrot.lane.b32.xlu1 %v2105_v60, %s3595_s19  ;;  %vm5360_vm14 = vmmov %vm5354_vm10 }
 0x324   : > { %2557 = vrot.lane.b32.xlu0 %v2142_v51, %s3600_s13 }
 0x325   : > { %v5066_v50 = vpop.permute.xlu1 %2417 }
 0x326   : > { %v2488_v40 = vpop.permute.xlu0 %2487 }
 0x327   : > { %2627 = vrot.lane.b32.xlu1 %v2159_v14, %s3602_s15  ;;  %v2805_v25 = vsel %vm1305_vm6, %v2787_v35, %v2488_v40 }
 0x328   : > { %2361 = vrot.lane.b32.xlu0 %v2106_v41, %s3595_s19 }
 0x329   : > { %v2686_v1 = vpop.permute.xlu1 %2685 }
 0x32a   : > { %v2858_v20 = vsel %vm5352_vm1, %v2840_v39, %v2686_v1  ;;  %v5076_v15 = vpop.permute.xlu0 %2221  ;;  %vm5362_vm1 = vmmov %vm5356_vm2 }
 0x32b   : > { %3459 = vmatmul.mubr.msk.f32.gmra.mrb[20].mxu1 %vm5353_vm9, %v2858_v20  ;;  %2431 = vrot.lane.b32.xlu1 %v2123_v27, %s3599_s12  ;;  %vm5363_vm9 = vmmov %vm5354_vm10 }
 0x32c   : > { %2629 = vrot.lane.b32.xlu0 %v2160_v59, %s3602_s15 }
 0x32d   : > { %v5081_v23 = vpop.permute.xlu1 %2291 }
 0x32e   : > { %v2490_v46 = vpop.permute.xlu0 %2489 }
 0x32f   : > { %2699 = vrot.lane.b32.xlu1 %v2177_v30, %s3603_s20 }
 0x330   : > { %2433 = vrot.lane.b32.xlu0 %v2124_v21, %s3599_s12 }
 0x331   : > { %v2544_v33 = vpop.permute.xlu1 %2543 }
 0x332   : > { %v5085_v31 = vpop.permute.xlu0 %2293  ;;  %v2823_v34 = vsel %vm1329_vm7, %v2805_v25, %v2544_v33 }
 0x333   : > { %2503 = vrot.lane.b32.xlu1 %v2141_v36, %s3601_s14  ;;  %v2788_v36 = vsel %vm1281_vm5, %v2770_v9, %v5066_v50  ;;  %v2061_v50 = vld [vmem:[#allocation3 + $0x50] sm:$0xff]  ;;  %v2064_v9 = vld [vmem:[#allocation3 + $0x68] sm:$0xff] }
 0x334   : > { %2701 = vrot.lane.b32.xlu0 %v2178_v17, %s3603_s20  ;;  %v2806_v58 = vsel %vm1305_vm6, %v2788_v36, %v2490_v46  ;;  %v2735_v40 = vsel %vm1209_vm0, %v2061_v50, %v5055_v6  ;;  %v2062_v46 = vld [vmem:[#allocation3 + $0x58] sm:$0xff] }
 0x335   : > { %v2348_v2 = vpop.permute.xlu1 %2347  ;;  %v2753_v14 = vsel %vm1233_vm3, %v2735_v40, %v5081_v23  ;;  %v2736_v23 = vsel %vm1209_vm0, %v2062_v46, %v5076_v15 }
 0x336   : > { %v2546_v7 = vpop.permute.xlu0 %2545  ;;  %v2771_v54 = vsel %vm1257_vm4, %v2753_v14, %v2348_v2  ;;  %v2754_v21 = vsel %vm1233_vm3, %v2736_v23, %v5085_v31 }
 0x337   : > { %2505 = vrot.lane.b32.xlu1 %v2142_v51, %s3601_s14  ;;  %v2824_v47 = vsel %vm1329_vm7, %v2806_v58, %v2546_v7 }
 0x338   : > { %2559 = vrot.lane.b32.xlu0 %v2143_v16, %s3600_s13 }
 0x339   : > { %v2616_v12 = vpop.permute.xlu1 %2615 }
 0x33a   : > { %v5091_v42 = vpop.permute.xlu0 %2349  ;;  %v2841_v37 = vsel %vm5354_vm10, %v2823_v34, %v2616_v12  ;;  %vm5364_vm10 = vmmov %vm5355_vm8 }
 0x33b   : > { %2561 = vrot.lane.b32.xlu1 %v2144_v13, %s3600_s13  ;;  %v2772_v33 = vsel %vm1257_vm4, %v2754_v21, %v5091_v42  ;;  %v2066_v21 = vld [vmem:[#allocation3 + $0x78] sm:$0xff] }
 0x33c   : > { %2631 = vrot.lane.b32.xlu0 %v2161_v24, %s3602_s15 }
 0x33d   : > { %v2420_v63 = vpop.permute.xlu1 %2419 }
 0x33e   : > { %v2618_v53 = vpop.permute.xlu0 %2617  ;;  %v2789_v45 = vsel %vm1281_vm5, %v2771_v54, %v2420_v63  ;;  %v2065_v54 = vld [vmem:[#allocation3 + $0x70] sm:$0xff] }
 0x33f   : > { %2633 = vrot.lane.b32.xlu1 %v2162_v5, %s3602_s15  ;;  %v2842_v48 = vsel %vm5357_vm11, %v2824_v47, %v2618_v53  ;;  %v2063_v53 = vld [vmem:[#allocation3 + $0x60] sm:$0xff]  ;;  %vm5367_vm11 = vmmov %vm5364_vm10 }
 0x340   : > { %2703 = vrot.lane.b32.xlu0 %v2179_v28, %s3603_s20 }
 0x341   : > { %v2688_v4 = vpop.permute.xlu1 %2687 }
 0x342   : > { %v2859_v52 = vsel %vm5355_vm8, %v2841_v37, %v2688_v4  ;;  %v5109_v61 = vpop.permute.xlu0 %2223  ;;  %vm5365_vm8 = vmmov %vm5362_vm1 }
 0x343   : > { %3461 = vmatprep.mubr.msk.f32.mxu1 %vm5356_vm2, %v2859_v52  ;;  %2705 = vrot.lane.b32.xlu1 %v2180_v19, %s3603_s20  ;;  %v2737_v25 = vsel %vm1209_vm0, %v2063_v53, %v5109_v61  ;;  %vm5366_vm2 = vmmov %vm5363_vm9 }
 0x345   : > { %v2422_v11 = vpop.permute.xlu1 %2421 }
 0x346   : > { %v2492_v43 = vpop.permute.xlu0 %2491  ;;  %v2790_v2 = vsel %vm1281_vm5, %v2772_v33, %v2422_v11 }
 0x347   : > { %v2807_v1 = vsel %vm1305_vm6, %v2789_v45, %v2492_v43 }
 0x349   : > { %v2690_v38 = vpop.permute.xlu1 %2689 }
 0x34a   : > { %v2860_v57 = vsel %vm5358_vm12, %v2842_v48, %v2690_v38  ;;  %v2226_v56 = vpop.permute.xlu0 %2225  ;;  %vm5368_vm12 = vmmov %vm5362_vm1 }
 0x34b   : > { %3462 = vmatmul.mubr.msk.f32.gmra.mrb[22].mxu1 %vm5359_vm13, %v2860_v57  ;;  %v2738_v61 = vsel %vm1209_vm0, %v2064_v9, %v2226_v56  ;;  %vm5369_vm13 = vmmov %vm5366_vm2  ;;  %v2068_v9 = vld [vmem:[#allocation3 + $0x88] sm:$0xff] }
 0x34d   : > { %v2296_v32 = vpop.permute.xlu1 %2295 }
 0x34e   : > { %v2494_v60 = vpop.permute.xlu0 %2493  ;;  %v2755_v28 = vsel %vm1233_vm3, %v2737_v25, %v2296_v32 }
 0x34f   : > { %v2808_v16 = vsel %vm1305_vm6, %v2790_v2, %v2494_v60 }
 0x351   : > { %v2548_v55 = vpop.permute.xlu1 %2547 }
 0x352   : > { %v2298_v18 = vpop.permute.xlu0 %2297  ;;  %v2825_v20 = vsel %vm1329_vm7, %v2807_v1, %v2548_v55  ;;  %v5175_v1 = vld [vmem:[%s5286_s5] ss:$0 sm:$0xff] }
 0x353   : > { %v2756_v43 = vsel %vm1233_vm3, %v2738_v61, %v2298_v18 }
 0x355   : > { %v2352_v51 = vpop.permute.xlu1 %2351 }
 0x356   : > { %v2550_v44 = vpop.permute.xlu0 %2549  ;;  %v2773_v34 = vsel %vm1257_vm4, %v2755_v28, %v2352_v51 }
 0x357   : > { %v2826_v12 = vsel %vm1329_vm7, %v2808_v16, %v2550_v44 }
 0x359   : > { %v2620_v3 = vpop.permute.xlu1 %2619 }
 0x35a   : > { %v2354_v62 = vpop.permute.xlu0 %2353  ;;  %v2843_v27 = vsel %vm5360_vm14, %v2825_v20, %v2620_v3  ;;  %vm5370_vm14 = vmmov %vm5364_vm10 }
 0x35b   : > { %v2774_v58 = vsel %vm1257_vm4, %v2756_v43, %v2354_v62 }
 0x35d   : > { %v2424_v41 = vpop.permute.xlu1 %2423 }
 0x35e   : > { %v2622_v39 = vpop.permute.xlu0 %2621  ;;  %v2791_v4 = vsel %vm1281_vm5, %v2773_v34, %v2424_v41 }
 0x35f   : > { %v2844_v10 = vsel %vm5363_vm9, %v2826_v12, %v2622_v39  ;;  %vm5373_vm9 = vmmov %vm5364_vm10 }
 0x361   : > { %v2692_v59 = vpop.permute.xlu1 %2691 }
 0x362   : > { %v2861_v30 = vsel %vm5361_vm15, %v2843_v27, %v2692_v59  ;;  %v2228_v6 = vpop.permute.xlu0 %2227  ;;  %vm5371_vm15 = vmmov %vm5362_vm1 }
 0x363   : > { %3464 = vmatprep.mubr.msk.f32.mxu1 %vm5362_vm1, %v2861_v30  ;;  %v2739_v45 = vsel %vm1209_vm0, %v2065_v54, %v2228_v6  ;;  %v2875_v30 = vld [vmem:[#allocation2 + $0x2e] sm:$0xff]  ;;  %vm5372_vm1 = vmmov %vm5366_vm2  ;;  %v2876_v54 = vld [vmem:[#allocation2 + $0x36] sm:$0xff] }
 0x365   : > { %v2426_v17 = vpop.permute.xlu1 %2425 }
 0x366   : > { %v2496_v7 = vpop.permute.xlu0 %2495  ;;  %v2792_v48 = vsel %vm1281_vm5, %v2774_v58, %v2426_v17  ;;  %v2874_v17 = vld [vmem:[#allocation2 + $0x26] sm:$0xff] }
 0x367   : > { %v2809_v52 = vsel %vm1305_vm6, %v2791_v4, %v2496_v7 }
 0x369   : > { %v2694_v13 = vpop.permute.xlu1 %2693 }
 0x36a   : > { %v2862_v15 = vsel %vm5364_vm10, %v2844_v10, %v2694_v13  ;;  %v2230_v0 = vpop.permute.xlu0 %2229  ;;  %vm5374_vm10 = vmmov %vm5365_vm8 }
 0x36b   : > { %3465 = vmatmul.mubr.msk.f32.gmra.mrb[24].mxu1 %vm5365_vm8, %v2862_v15  ;;  %v2740_v7 = vsel %vm1209_vm0, %v2066_v21, %v2230_v0  ;;  %vm5375_vm8 = vmmov %vm5372_vm1  ;;  %v2878_v21 = vld [vmem:[#allocation2 + $0x46] sm:$0xff] }
 0x36d   : > { %v2300_v31 = vpop.permute.xlu1 %2299 }
 0x36e   : > { %v2498_v24 = vpop.permute.xlu0 %2497  ;;  %v2757_v39 = vsel %vm1233_vm3, %v2739_v45, %v2300_v31 }
 0x36f   : > { %v2810_v57 = vsel %vm1305_vm6, %v2792_v48, %v2498_v24 }
 0x371   : > { %v2552_v29 = vpop.permute.xlu1 %2551 }
 0x372   : > { %v2302_v42 = vpop.permute.xlu0 %2301  ;;  %v2827_v19 = vsel %vm1329_vm7, %v2809_v52, %v2552_v29  ;;  %v2067_v52 = vld [vmem:[#allocation3 + $0x80] sm:$0xff] }
 0x373   : > { %v2758_v10 = vsel %vm1233_vm3, %v2740_v7, %v2302_v42 }
 0x375   : > { %v2356_v49 = vpop.permute.xlu1 %2355 }
 0x376   : > { %v2554_v63 = vpop.permute.xlu0 %2553  ;;  %v2775_v20 = vsel %vm1257_vm4, %v2757_v39, %v2356_v49 }
 0x377   : > { %v2828_v32 = vsel %vm1329_vm7, %v2810_v57, %v2554_v63 }
 0x379   : > { %v2624_v35 = vpop.permute.xlu1 %2623 }
 0x37a   : > { %v2358_v5 = vpop.permute.xlu0 %2357  ;;  %v2845_v8 = vsel %vm5366_vm2, %v2827_v19, %v2624_v35  ;;  %vm5376_vm2 = vmmov %vm5373_vm9 }
 0x37b   : > { %v2776_v24 = vsel %vm1257_vm4, %v2758_v10, %v2358_v5 }
 0x37d   : > { %v2428_v37 = vpop.permute.xlu1 %2427 }
 0x37e   : > { %v2626_v26 = vpop.permute.xlu0 %2625  ;;  %v2793_v59 = vsel %vm1281_vm5, %v2775_v20, %v2428_v37 }
 0x37f   : > { %v2846_v60 = vsel %vm5369_vm13, %v2828_v32, %v2626_v26  ;;  %vm5379_vm13 = vmmov %vm5376_vm2 }
 0x381   : > { %v2696_v22 = vpop.permute.xlu1 %2695 }
 0x382   : > { %v2863_v11 = vsel %vm5367_vm11, %v2845_v8, %v2696_v22  ;;  %v5158_v36 = vpop.permute.xlu0 %2231  ;;  %vm5377_vm11 = vmmov %vm5374_vm10 }
 0x383   : > { %3467 = vmatprep.mubr.msk.f32.mxu1 %vm5368_vm12, %v2863_v11  ;;  %v2741_v19 = vsel %vm1209_vm0, %v2067_v52, %v5158_v36  ;;  %vm5378_vm12 = vmmov %vm5372_vm1  ;;  %v2885_v52 = vld [vmem:[#allocation2 + $0x7e] sm:$0xff] }
 0x385   : > { %v2430_v47 = vpop.permute.xlu1 %2429 }
 0x386   : > { %v2500_v38 = vpop.permute.xlu0 %2499  ;;  %v2794_v0 = vsel %vm1281_vm5, %v2776_v24, %v2430_v47 }
 0x387   : > { %v2811_v33 = vsel %vm1305_vm6, %v2793_v59, %v2500_v38 }
 0x389   : > { %v2698_v55 = vpop.permute.xlu1 %2697 }
 0x38a   : > { %v2864_v51 = vsel %vm5370_vm14, %v2846_v60, %v2698_v55  ;;  %v2234_v56 = vpop.permute.xlu0 %2233  ;;  %vm5380_vm14 = vmmov %vm5374_vm10 }
 0x38b   : > { %3468 = vmatmul.mubr.msk.f32.gmra.mrb[26].mxu1 %vm5371_vm15, %v2864_v51  ;;  %v2742_v43 = vsel %vm1209_vm0, %v2068_v9, %v2234_v56  ;;  %vm5383_vm15 = vmmov %vm5374_vm10 }
 0x38d   : > { %v2304_v44 = vpop.permute.xlu1 %2303 }
 0x38e   : > { %v2502_v18 = vpop.permute.xlu0 %2501  ;;  %v2759_v8 = vsel %vm1233_vm3, %v2741_v19, %v2304_v44 }
 0x38f   : > { %v2812_v53 = vsel %vm1305_vm6, %v2794_v0, %v2502_v18 }
 0x391   : > { %v2556_v3 = vpop.permute.xlu1 %2555 }
 0x392   : > { %v2306_v50 = vpop.permute.xlu0 %2305  ;;  %v2829_v16 = vsel %vm1329_vm7, %v2811_v33, %v2556_v3 }
 0x393   : > { %v2760_v47 = vsel %vm1233_vm3, %v2742_v43, %v2306_v50  ;;  %vm5381_vm3 = vmmov %vm5372_vm1 }
 0x395   : > { %v2360_v62 = vpop.permute.xlu1 %2359 }
 0x396   : > { %v2558_v40 = vpop.permute.xlu0 %2557  ;;  %v2777_v11 = vsel %vm1257_vm4, %v2759_v8, %v2360_v62  ;;  %v2877_v62 = vld [vmem:[#allocation2 + $0x3e] sm:$0xff] }
 0x397   : > { %v2830_v42 = vsel %vm1329_vm7, %v2812_v53, %v2558_v40 }
 0x399   : > { %v2628_v14 = vpop.permute.xlu1 %2627 }
 0x39a   : > { %v2362_v41 = vpop.permute.xlu0 %2361  ;;  %v2847_v13 = vsel %vm5372_vm1, %v2829_v16, %v2628_v14 }
 0x39b   : > { %v2778_v38 = vsel %vm1257_vm4, %v2760_v47, %v2362_v41  ;;  %vm5382_vm4 = vmmov %vm5376_vm2 }
 0x39d   : > { %v2432_v27 = vpop.permute.xlu1 %2431 }
 0x39e   : > { %v2630_v46 = vpop.permute.xlu0 %2629  ;;  %v3451_v23 = vpop.f32.mrb[14].mxu1  ;;  %v2795_v58 = vsel %vm1281_vm5, %v2777_v11, %v2432_v27 }
 0x39f   : > { %v3028_v6 = vadd.f32 %v3451_v23, %v5175_v1  ;;  %v3022_v2 = vpop.f32.mrb[15].mxu1  ;;  %v2848_v34 = vsel %vm5375_vm8, %v2830_v42, %v2630_v46  ;;  %v2879_v46 = vld [vmem:[#allocation2 + $0x4e] sm:$0xff]  ;;  %v2882_v42 = vld [vmem:[#allocation2 + $0x66] sm:$0xff] }
 0x3a0   : > { %v3023_v12 = vadd.f32 %v5175_v1, %v3022_v2 }
 0x3a1   : > { %v3112_v15 = vadd.f32 %v3028_v6, %v2875_v30  ;;  %v2700_v31 = vpop.permute.xlu1 %2699 }
 0x3a2   : > { %v3111_v29 = vadd.f32 %v3023_v12, %v2874_v17  ;;  %v2865_v49 = vsel %vm5373_vm9, %v2847_v13, %v2700_v31  ;;  %v2434_v63 = vpop.permute.xlu0 %2433  ;;  %v2881_v12 = vld [vmem:[#allocation2 + $0x5e] sm:$0xff] }
 0x3a3   : > { %v3130_v35 = vmax.f32 %v3112_v15, 0.0  ;;  %3470 = vmatprep.mubr.msk.f32.mxu1 %vm5374_vm10, %v2865_v49  ;;  %v2796_v32 = vsel %vm1281_vm5, %v2778_v38, %v2434_v63  ;;  %v2880_v15 = vld [vmem:[#allocation2 + $0x56] sm:$0xff] }
 0x3a4   : > { %v3129_v25 = vmax.f32 %v3111_v29, 0.0 }
 0x3a5   : > { %3148 = vst.msk [vmem:[%s3687_s16 + $0x8] sm:$0xff] %vm1209_vm0, %v3130_v35  ;;  %v2504_v28 = vpop.permute.xlu1 %2503  ;;  %v2883_v35 = vld [vmem:[#allocation2 + $0x6e] sm:$0xff] }
 0x3a6   : > { %3147 = vst.msk [vmem:[%s3687_s16] sm:$0xff] %vm1209_vm0, %v3129_v25  ;;  %v2702_v5 = vpop.permute.xlu0 %2701  ;;  %v2813_v48 = vsel %vm1305_vm6, %v2795_v58, %v2504_v28 }
 0x3a7   : > { %v2866_v37 = vsel %vm5376_vm2, %v2848_v34, %v2702_v5 }
 0x3a8   : > { %3471 = vmatmul.mubr.msk.f32.gmra.mrb[28].mxu1 %vm5377_vm11, %v2866_v37 }
 0x3a9   : > { %v2506_v4 = vpop.permute.xlu1 %2505 }
 0x3aa   : > { %v2560_v26 = vpop.permute.xlu0 %2559  ;;  %v2814_v51 = vsel %vm1305_vm6, %v2796_v32, %v2506_v4 }
 0x3ab   : > { %v2831_v57 = vsel %vm1329_vm7, %v2813_v48, %v2560_v26  ;;  %v2887_v48 = vld [vmem:[#allocation2 + $0x8e] sm:$0xff] }
 0x3ad   : > { %v2562_v22 = vpop.permute.xlu1 %2561 }
 0x3ae   : > { %v2632_v61 = vpop.permute.xlu0 %2631  ;;  %v2832_v44 = vsel %vm1329_vm7, %v2814_v51, %v2562_v22  ;;  %v2884_v22 = vld [vmem:[#allocation2 + $0x76] sm:$0xff] }
 0x3af   : > { %v2849_v60 = vsel %vm5378_vm12, %v2831_v57, %v2632_v61 }
 0x3b1   : > { %v2634_v36 = vpop.permute.xlu1 %2633 }
 0x3b2   : > { %v2704_v55 = vpop.permute.xlu0 %2703  ;;  %v2850_v18 = vsel %vm5381_vm3, %v2832_v44, %v2634_v36  ;;  %v2886_v36 = vld [vmem:[#allocation2 + $0x86] sm:$0xff] }
 0x3b3   : > { %v2867_v56 = vsel %vm5379_vm13, %v2849_v60, %v2704_v55 }
 0x3b4   : > { %3473 = vmatprep.mubr.msk.f32.mxu1 %vm5380_vm14, %v2867_v56 }
 0x3b5   : > { %v2706_v3 = vpop.permute.xlu1 %2705 }
 0x3b6   : > { %v2868_v50 = vsel %vm5382_vm4, %v2850_v18, %v2706_v3  ;;  %v2889_v18 = vld [vmem:[#allocation2 + $0x9e] sm:$0xff] }
 0x3b7   : > { %3474 = vmatmul.mubr.msk.f32.gmra.mrb[30].mxu1 %vm5383_vm15, %v2868_v50 }
 0x3be   : > { %v3454_v40 = vpop.f32.mrb[16].mxu1 }
 0x3bf   : > { %v3038_v14 = vadd.f32 %v3454_v40, %v5175_v1  ;;  %v3032_v41 = vpop.f32.mrb[17].mxu1 }
 0x3c0   : > { %v3033_v45 = vadd.f32 %v5175_v1, %v3032_v41 }
 0x3c1   : > { %v3114_v39 = vadd.f32 %v3038_v14, %v2877_v62  ;;  %v2888_v62 = vld [vmem:[#allocation2 + $0x96] sm:$0xff] }
 0x3c2   : > { %v3113_v20 = vadd.f32 %v3033_v45, %v2876_v54 }
 0x3c3   : > { %v3132_v27 = vmax.f32 %v3114_v39, 0.0 }
 0x3c4   : > { %v3131_v59 = vmax.f32 %v3113_v20, 0.0  ;;  %v2891_v20 = vld [vmem:[#allocation2 + $0xae] sm:$0xff] }
 0x3c5   : > { %3150 = vst.msk [vmem:[%s3687_s16 + $0x18] sm:$0xff] %vm1209_vm0, %v3132_v27 }
 0x3c6   : > { %3149 = vst.msk [vmem:[%s3687_s16 + $0x10] sm:$0xff] %vm1209_vm0, %v3131_v59 }
 0x3de   : > { %v3457_v30 = vpop.f32.mrb[18].mxu1 }
 0x3df   : > { %v3048_v23 = vadd.f32 %v3457_v30, %v5175_v1  ;;  %v3042_v33 = vpop.f32.mrb[19].mxu1 }
 0x3e0   : > { %v3043_v6 = vadd.f32 %v5175_v1, %v3042_v33 }
 0x3e1   : > { %v3116_v17 = vadd.f32 %v3048_v23, %v2879_v46  ;;  %v2890_v46 = vld [vmem:[#allocation2 + $0xa6] sm:$0xff] }
 0x3e2   : > { %v3115_v2 = vadd.f32 %v3043_v6, %v2878_v21 }
 0x3e3   : > { %v3134_v7 = vmax.f32 %v3116_v17, 0.0 }
 0x3e4   : > { %v3133_v16 = vmax.f32 %v3115_v2, 0.0 }
 0x3e5   : > { %3152 = vst.msk [vmem:[%s3687_s16 + $0x28] sm:$0xff] %vm1209_vm0, %v3134_v7 }
 0x3e6   : > { %3151 = vst.msk [vmem:[%s3687_s16 + $0x20] sm:$0xff] %vm1209_vm0, %v3133_v16 }
 0x3fe   : > { %v3460_v10 = vpop.f32.mrb[20].mxu1 }
 0x3ff   : > { %v3058_v13 = vadd.f32 %v3460_v10, %v5175_v1  ;;  %v3052_v31 = vpop.f32.mrb[21].mxu1 }
 0x400   : > { %v3053_v24 = vadd.f32 %v5175_v1, %v3052_v31 }
 0x401   : > { %v3118_v29 = vadd.f32 %v3058_v13, %v2881_v12 }
 0x402   : > { %v3117_v49 = vadd.f32 %v3053_v24, %v2880_v15 }
 0x403   : > { %v3136_v63 = vmax.f32 %v3118_v29, 0.0 }
 0x404   : > { %v3135_v0 = vmax.f32 %v3117_v49, 0.0 }
 0x405   : > { %3154 = vst.msk [vmem:[%s3687_s16 + $0x38] sm:$0xff] %vm1209_vm0, %v3136_v63 }
 0x406   : > { %3153 = vst.msk [vmem:[%s3687_s16 + $0x30] sm:$0xff] %vm1209_vm0, %v3135_v0 }
 0x41e   : > { %v3463_v53 = vpop.f32.mrb[22].mxu1 }
 0x41f   : > { %v3068_v25 = vadd.f32 %v3463_v53, %v5175_v1  ;;  %v3062_v28 = vpop.f32.mrb[23].mxu1 }
 0x420   : > { %v3063_v34 = vadd.f32 %v5175_v1, %v3062_v28 }
 0x421   : > { %v3120_v5 = vadd.f32 %v3068_v25, %v2883_v35 }
 0x422   : > { %v3119_v37 = vadd.f32 %v3063_v34, %v2882_v42 }
 0x423   : > { %v3138_v4 = vmax.f32 %v3120_v5, 0.0 }
 0x424   : > { %v3137_v26 = vmax.f32 %v3119_v37, 0.0 }
 0x425   : > { %3156 = vst.msk [vmem:[%s3687_s16 + $0x48] sm:$0xff] %vm1209_vm0, %v3138_v4 }
 0x426   : > { %3155 = vst.msk [vmem:[%s3687_s16 + $0x40] sm:$0xff] %vm1209_vm0, %v3137_v26 }
 0x43e   : > { %v3466_v19 = vpop.f32.mrb[24].mxu1 }
 0x43f   : > { %v3078_v8 = vadd.f32 %v3466_v19, %v5175_v1  ;;  %v3072_v9 = vpop.f32.mrb[25].mxu1 }
 0x440   : > { %v3073_v11 = vadd.f32 %v5175_v1, %v3072_v9 }
 0x441   : > { %v3122_v61 = vadd.f32 %v3078_v8, %v2885_v52 }
 0x442   : > { %v3121_v43 = vadd.f32 %v3073_v11, %v2884_v22 }
 0x443   : > { %v3140_v58 = vmax.f32 %v3122_v61, 0.0 }
 0x444   : > { %v3139_v47 = vmax.f32 %v3121_v43, 0.0 }
 0x445   : > { %3158 = vst.msk [vmem:[%s3687_s16 + $0x58] sm:$0xff] %vm1209_vm0, %v3140_v58 }
 0x446   : > { %3157 = vst.msk [vmem:[%s3687_s16 + $0x50] sm:$0xff] %vm1209_vm0, %v3139_v47 }
 0x45e   : > { %v3469_v38 = vpop.f32.mrb[26].mxu1 }
 0x45f   : > { %v3088_v57 = vadd.f32 %v3469_v38, %v5175_v1  ;;  %v3082_v32 = vpop.f32.mrb[27].mxu1 }
 0x460   : > { %v3083_v60 = vadd.f32 %v5175_v1, %v3082_v32 }
 0x461   : > { %v3124_v55 = vadd.f32 %v3088_v57, %v2887_v48 }
 0x462   : > { %v3123_v51 = vadd.f32 %v3083_v60, %v2886_v36 }
 0x463   : > { %v3142_v56 = vmax.f32 %v3124_v55, 0.0 }
 0x464   : > { %v3141_v44 = vmax.f32 %v3123_v51, 0.0 }
 0x465   : > { %3160 = vst.msk [vmem:[%s3687_s16 + $0x68] sm:$0xff] %vm1209_vm0, %v3142_v56 }
 0x466   : > { %3159 = vst.msk [vmem:[%s3687_s16 + $0x60] sm:$0xff] %vm1209_vm0, %v3141_v44 }
 0x47b   : > { %v3472_v3 = vpop.f32.mrb[28].mxu1 }
 0x47c   : > { %v3098_v50 = vadd.f32 %v3472_v3, %v5175_v1  ;;  %v3092_v40 = vpop.f32.mrb[29].mxu1 }
 0x47d   : > { %v3093_v14 = vadd.f32 %v5175_v1, %v3092_v40 }
 0x47e   : > { %v3126_v54 = vadd.f32 %v3098_v50, %v2889_v18 }
 0x47f   : > { %v3125_v41 = vadd.f32 %v3093_v14, %v2888_v62 }
 0x480   : > { %v3144_v45 = vmax.f32 %v3126_v54, 0.0 }
 0x481   : > { %v3143_v39 = vmax.f32 %v3125_v41, 0.0 }
 0x482   : > { %3162 = vst.msk [vmem:[%s3687_s16 + $0x78] sm:$0xff] %vm1209_vm0, %v3144_v45 }
 0x483   : > { %3161 = vst.msk [vmem:[%s3687_s16 + $0x70] sm:$0xff] %vm1209_vm0, %v3143_v39 }
 0x48a   : > { %v3475_v27 = vpop.f32.mrb[30].mxu1 }
 0x48b   : > { %v3108_v59 = vadd.f32 %v3475_v27, %v5175_v1  ;;  %v3102_v30 = vpop.f32.mrb[31].mxu1 }
 0x48c   : > { %v3103_v23 = vadd.f32 %v5175_v1, %v3102_v30 }
 0x48d   : > { %v3128_v21 = vadd.f32 %v3108_v59, %v2891_v20 }
 0x48e   : > { %v3127_v33 = vadd.f32 %v3103_v23, %v2890_v46 }
 0x48f   : > { %v3146_v6 = vmax.f32 %v3128_v21, 0.0 }
 0x490   : > { %v3145_v17 = vmax.f32 %v3127_v33, 0.0 }
 0x491   : > { %3164 = vst.msk [vmem:[%s3687_s16 + $0x88] sm:$0xff] %vm1209_vm0, %v3146_v6 }
 0x492   : > { %3163 = vst.msk [vmem:[%s3687_s16 + $0x80] sm:$0xff] %vm1209_vm0, %v3145_v17 }
 0x493 PF: > { %s16_s25 = sadd.s32 1, %s3591_s25   ;;  %s5384_s21 = smov %s3583_s23 }
 0x494   : > { %p13_p8 = scmp.ge.s32.totalorder %s16_s25, 6   ;;  %s5385_s22 = smov %s3587_s24 }
 0x495   : > { %s5386_s23 = smov %s5389_s26  ;;  %s5387_s24 = smov %s5393_s27 }
 0x496   :  { %15 = sbr.rel (!%p13_p8) target bundleno = 3 (0x3), region = 119 }
 0x49d   :  { %3192 = vsyncmov [#allocation4] }
 0x4a0   :  { %s3193_s16 = vpop.sfrf %3192 }
 0x4a1   :  { %p3308_p9 = scmp.ne.s32.totalorder %s3193_s16, 0 }
 0x4a3   :  { %3197 = shalt.err (%p3308_p9)  }

</bundles_post_ra>
